<compile_context>
chip_gen: v7x
topology: tpu7x:2x2x1
jax: 0.10.0
libtpu: 0.0.40
codegen_flags: <defaults>
</compile_context>

<pallas_src>
import functools
import math

import jax
import jax.numpy as jnp
from jax.experimental import pallas as pl
from jax.experimental.pallas import tpu as pltpu


# ----------------------------------------------------------------------------
# small static helpers
# ----------------------------------------------------------------------------
def _cdiv(a, b):
    return -(-a // b)


def _round_up(a, b):
    return _cdiv(a, b) * b


def _pick_tile(m, target):
    """Largest multiple of 8 that divides m and is <= target (else target)."""
    best = None
    t = 8
    while t <= min(m, target):
        if m % t == 0:
            best = t
        t += 8
    return best if best is not None else min(_round_up(m, 8), target)


# ----------------------------------------------------------------------------
# Stage 1 kernel: conv1 + bias + ReLU + 2x2 max-pool + y concat
# ----------------------------------------------------------------------------
def _conv1_pool_kernel(a_ref, y_ref, w_ref, b_ref, o_ref):
    # a: (4, tm, 147) bf16 - conv1 im2col patches, one slab per 2x2 pool phase
    # y: (tm, 1)  f32      - depth prior, one value per pooled pixel
    # w: (147, 64) bf16    - conv1 weights (63 real filters + 1 pad column)
    # b: (1, 64)  f32
    # o: (tm, 64) bf16     - pooled conv1 output with y in channel 63
    w = w_ref[...]
    acc = jnp.dot(a_ref[0], w, preferred_element_type=jnp.float32)
    for p in range(1, 4):
        acc = jnp.maximum(
            acc, jnp.dot(a_ref[p], w, preferred_element_type=jnp.float32))
    # bias is shared across phases and ReLU is monotone, so
    # max(relu(x_p + b)) == relu(max(x_p) + b).
    acc = jnp.maximum(acc + b_ref[...], 0.0)
    # torch.cat((conv1_pool, y), dim=1): overwrite lane 63 with y.
    lane = jax.lax.broadcasted_iota(jnp.int32, acc.shape, 1)
    acc = jnp.where(lane == 63, y_ref[...], acc)
    o_ref[...] = acc.astype(o_ref.dtype)


def conv1_pool_merge(a4, yflat, w, b, *, tm):
    P, Mp, K = a4.shape
    return pl.pallas_call(
        _conv1_pool_kernel,
        out_shape=jax.ShapeDtypeStruct((Mp, 64), jnp.bfloat16),
        grid_spec=pltpu.PrefetchScalarGridSpec(
            num_scalar_prefetch=0,
            grid=(Mp // tm,),
            in_specs=[
                pl.BlockSpec((4, tm, K), lambda i: (0, i, 0)),
                pl.BlockSpec((tm, 1), lambda i: (i, 0)),
                pl.BlockSpec((K, 64), lambda i: (0, 0)),
                pl.BlockSpec((1, 64), lambda i: (0, 0)),
            ],
            out_specs=pl.BlockSpec((tm, 64), lambda i: (i, 0)),
        ),
        compiler_params=pltpu.CompilerParams(
            dimension_semantics=("parallel",)),
    )(a4, yflat, w, b)


# ----------------------------------------------------------------------------
# Stage 2 kernel: conv2 + ReLU + conv3 fused, whole image per grid step
# ----------------------------------------------------------------------------
def _conv23_kernel(x_ref, w2_ref, b2_ref, w3_ref, b3_ref, o_ref,
                   x5_ref, z_ref, *, Wp, W2, G, CH, LEAD, DELTA):
    # x : (RIN, 64) bf16  - flattened, spatially padded pooled map (one image)
    # w2: (5, 320, 64) bf16 - conv2 weights, one (5*Cin, Cout) matrix per k-row
    # b2: (1, 64) f32
    # w3: (25, 64) f32    - conv3 weights, one 64-vector per 5x5 tap
    # b3: (1, 1) f32
    # o : (G, 1) f32      - conv3 output on gapped rows q = ho*Wp + wo
    # x5: (Rp, 320) bf16 scratch - conv2 LHS with the 5 column taps in lanes
    # z : (RZ, 64) f32 scratch   - conv2 output == conv3's padded, flat input
    Rp = x5_ref.shape[0]
    RZ = z_ref.shape[0]

    # Lane-unroll the 5 column taps once: x5[r, 64*j + c] = x[r + j, c].
    x5_ref[...] = jnp.concatenate(
        [x_ref[pl.ds(j, Rp), :] for j in range(5)], axis=1)

    # Zero only the padding rows of z (conv2 fully writes the rows in between).
    z_ref[pl.ds(0, LEAD), :] = jnp.zeros((LEAD, 64), jnp.float32)
    tail = RZ - (LEAD + G)
    z_ref[pl.ds(LEAD + G, tail), :] = jnp.zeros((tail, 64), jnp.float32)

    w2 = w2_ref[...]                                   # (5, 320, 64)
    b2 = b2_ref[...]                                   # (1, 64)
    w3 = w3_ref[...]                                   # (25, 64)
    w3_rows = [w3[t][None, :] for t in range(25)]      # hoisted (1, 64) slices
    b3 = b3_ref[...]                                   # (1, 1)

    # Gap-column mask (the zeroed gap acts as conv3's horizontal padding).
    rows = jax.lax.broadcasted_iota(jnp.int32, (CH, 64), 0)
    valid = (rows % Wp) < W2
    n_chunks = G // CH

    # conv2: per row chunk, 5 K-fused (CH, 320) @ (320, 64) MXU matmuls with
    # the f32 accumulator living in vregs; bias + ReLU + gap zeroing; store
    # into z at the conv3 padding offset.
    def conv2_chunk(c, carry):
        start = pl.multiple_of(c * CH, 16)
        acc = jnp.zeros((CH, 64), jnp.float32)
        for i in range(5):
            lhs = x5_ref[pl.ds(start + i * Wp, CH), :]
            acc = acc + jnp.dot(lhs, w2[i], preferred_element_type=jnp.float32)
        acc = jnp.maximum(acc + b2, 0.0)
        acc = jnp.where(valid, acc, 0.0)
        z_ref[pl.ds(start + LEAD, CH), :] = acc
        return carry

    jax.lax.fori_loop(0, n_chunks, conv2_chunk, 0)

    # conv3 (Cout=1): 25 broadcast MACs on the VPU over the 64 channels plus a
    # lane reduction.  No MXU work and no 128-lane-padded store (the previous
    # version spent ~2x conv2's MXU FLOPs and ~128x the store BW here).
    def conv3_chunk(c, carry):
        start = pl.multiple_of(c * CH, 16)
        acc = jnp.zeros((CH, 64), jnp.float32)
        for i in range(5):
            for j in range(5):
                zs = z_ref[pl.ds(start + i * Wp + j + DELTA, CH), :]
                acc = acc + zs * w3_rows[5 * i + j]
        out = jnp.sum(acc, axis=1, keepdims=True) + b3
        o_ref[pl.ds(start, CH), :] = out.astype(o_ref.dtype)
        return carry

    jax.lax.fori_loop(0, n_chunks, conv3_chunk, 0)


def conv2_conv3_fused(xflat, w2, b2, w3, b3, *, Wp, W2, G, Rp, RZ, CH, LEAD,
                      DELTA):
    N, RIN, _ = xflat.shape
    return pl.pallas_call(
        functools.partial(_conv23_kernel, Wp=Wp, W2=W2, G=G, CH=CH, LEAD=LEAD,
                          DELTA=DELTA),
        out_shape=jax.ShapeDtypeStruct((N, G, 1), jnp.float32),
        grid_spec=pltpu.PrefetchScalarGridSpec(
            num_scalar_prefetch=0,
            grid=(N,),
            in_specs=[
                pl.BlockSpec((None, RIN, 64), lambda n: (n, 0, 0)),
                pl.BlockSpec((5, 320, 64), lambda n: (0, 0, 0)),
                pl.BlockSpec((1, 64), lambda n: (0, 0)),
                pl.BlockSpec((25, 64), lambda n: (0, 0)),
                pl.BlockSpec((1, 1), lambda n: (0, 0)),
            ],
            out_specs=pl.BlockSpec((None, G, 1), lambda n: (n, 0, 0)),
            scratch_shapes=[
                pltpu.VMEM((Rp, 320), jnp.bfloat16),
                pltpu.VMEM((RZ, 64), jnp.float32),
            ],
        ),
        compiler_params=pltpu.CompilerParams(
            dimension_semantics=("parallel",),
            vmem_limit_bytes=40 * 1024 * 1024,
        ),
    )(xflat, w2, b2, w3, b3)


# ----------------------------------------------------------------------------
# XLA glue: conv1 im2col grouped by pool phase, weight re-layout
# ----------------------------------------------------------------------------
def _conv1_phase_patches(x_nhwc, H2, W2):
    """im2col of conv1 (k=7, s=2, p=3), grouped by 2x2 max-pool phase.

    Returns (4, N*H2*W2, 147): phase p = 2*dh + dw holds the patches of conv1
    output pixel (2*r + dh, 2*c + dw), so max over the phase axis == the pool.
    """
    # TODO(synk): on v5e, fold this gather into the Pallas kernel to avoid
    # materializing the blown-up patches matrix in HBM (minor on v6e/v7x).
    N, H, W, C = x_nhwc.shape
    xp = jnp.pad(x_nhwc, ((0, 0), (3, 3), (3, 3), (0, 0)))
    phases = []
    for dh in range(2):
        for dw in range(2):
            cols = []
            for di in range(7):
                for dj in range(7):
                    r0 = 2 * dh + di
                    c0 = 2 * dw + dj
                    cols.append(xp[:, r0:r0 + 4 * (H2 - 1) + 1:4,
                                   c0:c0 + 4 * (W2 - 1) + 1:4, :])
            p = jnp.stack(cols, axis=3).reshape(N, H2, W2, 49 * C)
            phases.append(p.reshape(N * H2 * W2, 49 * C))
    return jnp.stack(phases, axis=0)


def prepare_params(params):
    """One-off re-layout of PyTorch-style conv params into kernel layouts."""
    w1, b1 = params["w1"], params["b1"]                    # (63,3,7,7), (63,)
    # Pad conv1 Cout 63 -> 64 so the pooled map is lane-dense; the padded
    # channel is overwritten with y inside the kernel, so its values are
    # irrelevant (zeros for tidiness).
    w1p = jnp.concatenate([w1, jnp.zeros((1,) + w1.shape[1:], w1.dtype)], 0)
    b1p = jnp.concatenate([b1, jnp.zeros((1,), b1.dtype)])
    c1_w = jnp.transpose(w1p, (2, 3, 1, 0)).reshape(7 * 7 * 3, 64)
    c1_b = b1p.reshape(1, 64)

    w2 = params["w2"]                                      # (64,64,5,5)
    # (kh, kw, Cin, Cout) -> per kernel-row i a (kw*Cin, Cout) matrix whose
    # row index j*64 + cin matches the lane-unrolled LHS layout.
    c2_w = jnp.transpose(w2, (2, 3, 1, 0)).reshape(5, 5 * 64, 64)
    c2_b = params["b2"].reshape(1, 64)

    w3 = params["w3"]                                      # (1,64,5,5)
    c3_w = jnp.transpose(w3, (2, 3, 1, 0)).reshape(25, 64)  # row = 5*i + j
    c3_b = params["b3"].reshape(1, 1)

    return {
        "c1_w": c1_w.astype(jnp.bfloat16),
        "c1_b": c1_b.astype(jnp.float32),
        "c2_w": c2_w.astype(jnp.bfloat16),
        "c2_b": c2_b.astype(jnp.float32),
        "c3_w": c3_w.astype(jnp.float32),
        "c3_b": c3_b.astype(jnp.float32),
    }


# ----------------------------------------------------------------------------
# fineNet forward
# ----------------------------------------------------------------------------
def fine_net_forward(prep, x_nchw, y_nchw):
    N, _, H, W = x_nchw.shape
    assert H % 4 == 0 and W % 4 == 0
    H2, W2 = H // 4, W // 4

    x = jnp.transpose(x_nchw, (0, 2, 3, 1)).astype(jnp.bfloat16)    # NHWC
    yflat = jnp.transpose(y_nchw, (0, 2, 3, 1)).reshape(N * H2 * W2, 1)
    yflat = yflat.astype(jnp.float32)

    # ---- stage 1: conv1 + ReLU + 2x2 max-pool + y concat (one kernel) ----
    a4 = _conv1_phase_patches(x, H2, W2)                # (4, Mp, 147) bf16
    Mp = N * H2 * W2
    tm = _pick_tile(Mp, 512)
    Mp_pad = _round_up(Mp, tm)
    if Mp_pad != Mp:
        a4 = jnp.pad(a4, ((0, 0), (0, Mp_pad - Mp), (0, 0)))
        yflat = jnp.pad(yflat, ((0, Mp_pad - Mp), (0, 0)))
    pooled = conv1_pool_merge(a4, yflat, prep["c1_w"], prep["c1_b"], tm=tm)
    pooled = pooled[:Mp].reshape(N, H2, W2, 64)

    # ---- stage 2: conv2 + ReLU + conv3, fused, whole image per grid step ----
    Wp = _round_up(W2 + 4, 16)      # padded row length, sublane aligned shifts
    Hp = H2 + 4
    Rp = Hp * Wp                    # rows of the padded, flattened input
    RIN = Rp + 16                   # + halo rows read by the gapped tail
    G = H2 * Wp                     # gapped output rows per image
    LEAD = _round_up(2 * Wp + 2, 8)  # conv3 top-padding offset inside z
    DELTA = LEAD - (2 * Wp + 2)
    RZ = LEAD + G + 2 * Wp + 8
    k = 1
    for d in range(1, H2 + 1):      # largest row-chunk (<=256 rows) dividing G
        if H2 % d == 0 and d * Wp <= 256:
            k = d
    CH = k * Wp

    # Single padded re-layout feeding the fused kernel (the conv2<->conv3
    # relayouts of the previous version are gone - that stage stays in VMEM).
    xpad = jnp.pad(pooled, ((0, 0), (2, 2), (2, Wp - W2 - 2), (0, 0)))
    xflat = xpad.reshape(N, Rp, 64)
    xflat = jnp.pad(xflat, ((0, 0), (0, RIN - Rp), (0, 0)))

    out_g = conv2_conv3_fused(
        xflat, prep["c2_w"], prep["c2_b"], prep["c3_w"], prep["c3_b"],
        Wp=Wp, W2=W2, G=G, Rp=Rp, RZ=RZ, CH=CH, LEAD=LEAD, DELTA=DELTA)

    out = out_g.reshape(N, H2, Wp)[:, :, :W2]
    return out[:, None, :, :]                            # (N, 1, H2, W2)


# ----------------------------------------------------------------------------
# Deterministic parameter init (PyTorch default conv init style)
# ----------------------------------------------------------------------------
def init_params(key):
    ks = jax.random.split(key, 6)

    def u(k, shape, fan_in):
        bound = 1.0 / math.sqrt(fan_in)
        return jax.random.uniform(k, shape, jnp.float32, -bound, bound)

    return {
        "w1": u(ks[0], (63, 3, 7, 7), 3 * 7 * 7),
        "b1": u(ks[1], (63,), 3 * 7 * 7),
        "w2": u(ks[2], (64, 64, 5, 5), 64 * 5 * 5),
        "b2": u(ks[3], (64,), 64 * 5 * 5),
        "w3": u(ks[4], (1, 64, 5, 5), 64 * 5 * 5),
        "b3": u(ks[5], (1,), 64 * 5 * 5),
    }


# ----------------------------------------------------------------------------
# Pure-JAX f32 reference (for correctness check)
# ----------------------------------------------------------------------------
def reference_forward(params, x, y):
    def conv(h, w, b, stride, pad):
        out = jax.lax.conv_general_dilated(
            h, w, window_strides=(stride, stride),
            padding=((pad, pad), (pad, pad)),
            dimension_numbers=("NCHW", "OIHW", "NCHW"))
        return out + b.reshape(1, -1, 1, 1)

    h = jax.nn.relu(conv(x, params["w1"], params["b1"], 2, 3))
    h = jax.lax.reduce_window(h, -jnp.inf, jax.lax.max,
                              (1, 1, 2, 2), (1, 1, 2, 2), "VALID")
    h = jnp.concatenate([h, y], axis=1)
    h = jax.nn.relu(conv(h, params["w2"], params["b2"], 1, 2))
    return conv(h, params["w3"], params["b3"], 1, 2)


# ----------------------------------------------------------------------------
if __name__ == "__main__":
    key = jax.random.PRNGKey(0)
    kx, ky, kp = jax.random.split(key, 3)

    # Reference model uses [n, 3, 240, 320]; here a small consistent shape.
    N, H, W = 2, 32, 32
    x = jax.random.normal(kx, (N, 3, H, W), jnp.float32)
    y = jax.random.normal(ky, (N, 1, H // 4, W // 4), jnp.float32)

    params = init_params(kp)
    prep = prepare_params(params)

    fwd = jax.jit(fine_net_forward)
    out = jax.block_until_ready(fwd(prep, x, y))
    ref = jax.block_until_ready(reference_forward(params, x, y))

    assert out.shape == (N, 1, H // 4, W // 4), out.shape
    max_err = float(jnp.max(jnp.abs(out - ref)))
    # bf16 MXU path (f32 accumulation) -> slightly loose tolerance.
    assert jnp.allclose(out, ref, atol=5e-2, rtol=5e-2), max_err

    print("KERNEL_OK")
</pallas_src>

<mosaic_0001>
module attributes {stable_mosaic.version = 11 : i64} {
  func.func @_conv1_pool_kernel(%arg0: i32, %arg1: memref<4x128x147xbf16, #tpu.memory_space<vmem>>, %arg2: memref<128x1xf32, #tpu.memory_space<vmem>>, %arg3: memref<147x64xbf16, #tpu.memory_space<vmem>>, %arg4: memref<1x64xf32, #tpu.memory_space<vmem>>, %arg5: memref<128x64xbf16, #tpu.memory_space<vmem>>) attributes {dimension_semantics = [#tpu.dimension_semantics<parallel>], iteration_bounds = array<i64: 1>, scalar_prefetch = 0 : i64, scratch_operands = 0 : i64, tpu.core_type = #tpu.core_type<tc>, window_params = [{transform_indices = @transform_0, window_bounds = array<i64: 4, 128, 147>}, {transform_indices = @transform_1, window_bounds = array<i64: 128, 1>}, {pipeline_mode = #tpu.pipeline_mode<synchronous>, transform_indices = @transform_2, window_bounds = array<i64: 147, 64>}, {pipeline_mode = #tpu.pipeline_mode<synchronous>, transform_indices = @transform_3, window_bounds = array<i64: 1, 64>}, {transform_indices = @transform_4, window_bounds = array<i64: 128, 64>}]} {
    %c0 = arith.constant 0 : index
    %c0_0 = arith.constant 0 : index
    %0 = vector.load %arg3[%c0, %c0_0] : memref<147x64xbf16, #tpu.memory_space<vmem>>, vector<147x64xbf16>
    %c0_1 = arith.constant 0 : index
    %c0_2 = arith.constant 0 : index
    %c0_3 = arith.constant 0 : index
    %1 = vector.load %arg1[%c0_1, %c0_2, %c0_3] : memref<4x128x147xbf16, #tpu.memory_space<vmem>>, vector<1x128x147xbf16>
    %2 = vector.shape_cast %1 : vector<1x128x147xbf16> to vector<128x147xbf16>
    %cst = arith.constant dense<0.000000e+00> : vector<128x64xf32>
    %3 = tpu.matmul %2, %0, %cst {dimension_numbers = #tpu.dot_dimension_numbers<[1], [0], [0], [1], [0, 0, 1, 1], [], []>} : vector<128x147xbf16>, vector<147x64xbf16>, vector<128x64xf32> -> vector<128x64xf32>
    %c1 = arith.constant 1 : index
    %c0_4 = arith.constant 0 : index
    %c0_5 = arith.constant 0 : index
    %4 = vector.load %arg1[%c1, %c0_4, %c0_5] : memref<4x128x147xbf16, #tpu.memory_space<vmem>>, vector<1x128x147xbf16>
    %5 = vector.shape_cast %4 : vector<1x128x147xbf16> to vector<128x147xbf16>
    %cst_6 = arith.constant dense<0.000000e+00> : vector<128x64xf32>
    %6 = tpu.matmul %5, %0, %cst_6 {dimension_numbers = #tpu.dot_dimension_numbers<[1], [0], [0], [1], [0, 0, 1, 1], [], []>} : vector<128x147xbf16>, vector<147x64xbf16>, vector<128x64xf32> -> vector<128x64xf32>
    %7 = arith.maximumf %3, %6 : vector<128x64xf32>
    %c2 = arith.constant 2 : index
    %c0_7 = arith.constant 0 : index
    %c0_8 = arith.constant 0 : index
    %8 = vector.load %arg1[%c2, %c0_7, %c0_8] : memref<4x128x147xbf16, #tpu.memory_space<vmem>>, vector<1x128x147xbf16>
    %9 = vector.shape_cast %8 : vector<1x128x147xbf16> to vector<128x147xbf16>
    %cst_9 = arith.constant dense<0.000000e+00> : vector<128x64xf32>
    %10 = tpu.matmul %9, %0, %cst_9 {dimension_numbers = #tpu.dot_dimension_numbers<[1], [0], [0], [1], [0, 0, 1, 1], [], []>} : vector<128x147xbf16>, vector<147x64xbf16>, vector<128x64xf32> -> vector<128x64xf32>
    %11 = arith.maximumf %7, %10 : vector<128x64xf32>
    %c3 = arith.constant 3 : index
    %c0_10 = arith.constant 0 : index
    %c0_11 = arith.constant 0 : index
    %12 = vector.load %arg1[%c3, %c0_10, %c0_11] : memref<4x128x147xbf16, #tpu.memory_space<vmem>>, vector<1x128x147xbf16>
    %13 = vector.shape_cast %12 : vector<1x128x147xbf16> to vector<128x147xbf16>
    %cst_12 = arith.constant dense<0.000000e+00> : vector<128x64xf32>
    %14 = tpu.matmul %13, %0, %cst_12 {dimension_numbers = #tpu.dot_dimension_numbers<[1], [0], [0], [1], [0, 0, 1, 1], [], []>} : vector<128x147xbf16>, vector<147x64xbf16>, vector<128x64xf32> -> vector<128x64xf32>
    %15 = arith.maximumf %11, %14 : vector<128x64xf32>
    %c0_13 = arith.constant 0 : index
    %c0_14 = arith.constant 0 : index
    %16 = vector.load %arg4[%c0_13, %c0_14] : memref<1x64xf32, #tpu.memory_space<vmem>>, vector<1x64xf32>
    %17 = vector.broadcast %16 : vector<1x64xf32> to vector<128x64xf32>
    %18 = arith.addf %15, %17 : vector<128x64xf32>
    %cst_15 = arith.constant 0.000000e+00 : f32
    %19 = vector.broadcast %cst_15 : f32 to vector<128x64xf32>
    %20 = arith.maximumf %18, %19 : vector<128x64xf32>
    %21 = tpu.iota {dimensions = array<i32: 1>} : vector<128x64xi32>
    %c63_i32 = arith.constant 63 : i32
    %22 = vector.broadcast %c63_i32 : i32 to vector<128x64xi32>
    %23 = arith.cmpi eq, %21, %22 : vector<128x64xi32>
    %c0_16 = arith.constant 0 : index
    %c0_17 = arith.constant 0 : index
    %24 = vector.load %arg2[%c0_16, %c0_17] : memref<128x1xf32, #tpu.memory_space<vmem>>, vector<128x1xf32>
    %25 = vector.shape_cast %24 : vector<128x1xf32> to vector<128x1xf32>
    %26 = vector.broadcast %25 : vector<128x1xf32> to vector<128x64xf32>
    %27 = arith.select %23, %26, %20 : vector<128x64xi1>, vector<128x64xf32>
    %28 = arith.truncf %27 : vector<128x64xf32> to vector<128x64xbf16>
    %c0_18 = arith.constant 0 : index
    %c0_19 = arith.constant 0 : index
    %29 = vector.load %arg5[%c0_18, %c0_19] : memref<128x64xbf16, #tpu.memory_space<vmem>>, vector<128x64xbf16>
    tpu.vector_store %arg5[%c0_18, %c0_19], %28 {strides = array<i32>} : memref<128x64xbf16, #tpu.memory_space<vmem>>, vector<128x64xbf16>,
    return
  }
  func.func @transform_0(%arg0: i32) -> (i32, i32, i32) {
    %c0_i32 = arith.constant 0 : i32
    %c0_i32_0 = arith.constant 0 : i32
    %c0_i32_1 = arith.constant 0 : i32
    return %c0_i32, %arg0, %c0_i32_0 : i32, i32, i32
  }
  func.func @transform_1(%arg0: i32) -> (i32, i32) {
    %c0_i32 = arith.constant 0 : i32
    %c0_i32_0 = arith.constant 0 : i32
    return %arg0, %c0_i32 : i32, i32
  }
  func.func @transform_2(%arg0: i32) -> (i32, i32) {
    %c0_i32 = arith.constant 0 : i32
    %c0_i32_0 = arith.constant 0 : i32
    %c0_i32_1 = arith.constant 0 : i32
    return %c0_i32, %c0_i32_0 : i32, i32
  }
  func.func @transform_3(%arg0: i32) -> (i32, i32) {
    %c0_i32 = arith.constant 0 : i32
    %c0_i32_0 = arith.constant 0 : i32
    %c0_i32_1 = arith.constant 0 : i32
    return %c0_i32, %c0_i32_0 : i32, i32
  }
  func.func @transform_4(%arg0: i32) -> (i32, i32) {
    %c0_i32 = arith.constant 0 : i32
    %c0_i32_0 = arith.constant 0 : i32
    return %arg0, %c0_i32 : i32, i32
  }
}

module attributes {stable_mosaic.version = 11 : i64} {
  func.func @_conv23_kernel(%arg0: i32, %arg1: memref<1x208x64xbf16, #tpu.memory_space<vmem>>, %arg2: memref<5x320x64xbf16, #tpu.memory_space<vmem>>, %arg3: memref<1x64xf32, #tpu.memory_space<vmem>>, %arg4: memref<25x64xf32, #tpu.memory_space<vmem>>, %arg5: memref<1x1xf32, #tpu.memory_space<vmem>>, %arg6: memref<1x128x1xf32, #tpu.memory_space<vmem>>, %arg7: memref<192x320xbf16, #tpu.memory_space<vmem>>, %arg8: memref<208x64xf32, #tpu.memory_space<vmem>>) attributes {dimension_semantics = [#tpu.dimension_semantics<parallel>], iteration_bounds = array<i64: 2>, scalar_prefetch = 0 : i64, scratch_operands = 2 : i64, tpu.core_type = #tpu.core_type<tc>, window_params = [{transform_indices = @transform_0, window_bounds = array<i64: 1, 208, 64>}, {pipeline_mode = #tpu.pipeline_mode<synchronous>, transform_indices = @transform_1, window_bounds = array<i64: 5, 320, 64>}, {pipeline_mode = #tpu.pipeline_mode<synchronous>, transform_indices = @transform_2, window_bounds = array<i64: 1, 64>}, {pipeline_mode = #tpu.pipeline_mode<synchronous>, transform_indices = @transform_3, window_bounds = array<i64: 25, 64>}, {pipeline_mode = #tpu.pipeline_mode<synchronous>, transform_indices = @transform_4, window_bounds = array<i64: 1, 1>}, {transform_indices = @transform_5, window_bounds = array<i64: 1, 128, 1>}]} {
    %c0 = arith.constant 0 : index
    %c0_0 = arith.constant 0 : index
    %c0_1 = arith.constant 0 : index
    %0 = vector.load %arg1[%c0, %c0_0, %c0_1] : memref<1x208x64xbf16, #tpu.memory_space<vmem>>, vector<1x192x64xbf16>
    %1 = vector.shape_cast %0 : vector<1x192x64xbf16> to vector<192x64xbf16>
    %c0_2 = arith.constant 0 : index
    %c1 = arith.constant 1 : index
    %c0_3 = arith.constant 0 : index
    %2 = vector.load %arg1[%c0_2, %c1, %c0_3] : memref<1x208x64xbf16, #tpu.memory_space<vmem>>, vector<1x192x64xbf16>
    %3 = vector.shape_cast %2 : vector<1x192x64xbf16> to vector<192x64xbf16>
    %c0_4 = arith.constant 0 : index
    %c2 = arith.constant 2 : index
    %c0_5 = arith.constant 0 : index
    %4 = vector.load %arg1[%c0_4, %c2, %c0_5] : memref<1x208x64xbf16, #tpu.memory_space<vmem>>, vector<1x192x64xbf16>
    %5 = vector.shape_cast %4 : vector<1x192x64xbf16> to vector<192x64xbf16>
    %c0_6 = arith.constant 0 : index
    %c3 = arith.constant 3 : index
    %c0_7 = arith.constant 0 : index
    %6 = vector.load %arg1[%c0_6, %c3, %c0_7] : memref<1x208x64xbf16, #tpu.memory_space<vmem>>, vector<1x192x64xbf16>
    %7 = vector.shape_cast %6 : vector<1x192x64xbf16> to vector<192x64xbf16>
    %c0_8 = arith.constant 0 : index
    %c4 = arith.constant 4 : index
    %c0_9 = arith.constant 0 : index
    %8 = vector.load %arg1[%c0_8, %c4, %c0_9] : memref<1x208x64xbf16, #tpu.memory_space<vmem>>, vector<1x192x64xbf16>
    %9 = vector.shape_cast %8 : vector<1x192x64xbf16> to vector<192x64xbf16>
    %10 = tpu.concatenate %1, %3, %5, %7, %9 in 1 : vector<192x64xbf16>, vector<192x64xbf16>, vector<192x64xbf16>, vector<192x64xbf16>, vector<192x64xbf16> -> vector<192x320xbf16>
    %c0_10 = arith.constant 0 : index
    %c0_11 = arith.constant 0 : index
    %11 = vector.load %arg7[%c0_10, %c0_11] : memref<192x320xbf16, #tpu.memory_space<vmem>>, vector<192x320xbf16>
    tpu.vector_store %arg7[%c0_10, %c0_11], %10 {strides = array<i32>} : memref<192x320xbf16, #tpu.memory_space<vmem>>, vector<192x320xbf16>,
    %cst = arith.constant 0.000000e+00 : f32
    %12 = vector.broadcast %cst : f32 to vector<40x64xf32>
    %c0_12 = arith.constant 0 : index
    %c0_13 = arith.constant 0 : index
    %13 = vector.load %arg8[%c0_12, %c0_13] : memref<208x64xf32, #tpu.memory_space<vmem>>, vector<40x64xf32>
    tpu.vector_store %arg8[%c0_12, %c0_13], %12 {strides = array<i32>} : memref<208x64xf32, #tpu.memory_space<vmem>>, vector<40x64xf32>,
    %cst_14 = arith.constant 0.000000e+00 : f32
    %14 = vector.broadcast %cst_14 : f32 to vector<40x64xf32>
    %c168 = arith.constant 168 : index
    %c0_15 = arith.constant 0 : index
    %15 = vector.load %arg8[%c168, %c0_15] : memref<208x64xf32, #tpu.memory_space<vmem>>, vector<40x64xf32>
    tpu.vector_store %arg8[%c168, %c0_15], %14 {strides = array<i32>} : memref<208x64xf32, #tpu.memory_space<vmem>>, vector<40x64xf32>,
    %c0_16 = arith.constant 0 : index
    %c0_17 = arith.constant 0 : index
    %c0_18 = arith.constant 0 : index
    %16 = vector.load %arg2[%c0_16, %c0_17, %c0_18] : memref<5x320x64xbf16, #tpu.memory_space<vmem>>, vector<5x320x64xbf16>
    %c0_19 = arith.constant 0 : index
    %c0_20 = arith.constant 0 : index
    %17 = vector.load %arg3[%c0_19, %c0_20] : memref<1x64xf32, #tpu.memory_space<vmem>>, vector<1x64xf32>
    %c0_21 = arith.constant 0 : index
    %c0_22 = arith.constant 0 : index
    %18 = vector.load %arg4[%c0_21, %c0_22] : memref<25x64xf32, #tpu.memory_space<vmem>>, vector<25x64xf32>
    %19 = vector.extract_strided_slice %18 {offsets = [0, 0], sizes = [1, 64], strides = [1, 1]} : vector<25x64xf32> to vector<1x64xf32>
    %20 = vector.shape_cast %19 : vector<1x64xf32> to vector<64xf32>
    %21 = vector.shape_cast %20 : vector<64xf32> to vector<1x64xf32>
    %22 = vector.extract_strided_slice %18 {offsets = [1, 0], sizes = [1, 64], strides = [1, 1]} : vector<25x64xf32> to vector<1x64xf32>
    %23 = vector.shape_cast %22 : vector<1x64xf32> to vector<64xf32>
    %24 = vector.shape_cast %23 : vector<64xf32> to vector<1x64xf32>
    %25 = vector.extract_strided_slice %18 {offsets = [2, 0], sizes = [1, 64], strides = [1, 1]} : vector<25x64xf32> to vector<1x64xf32>
    %26 = vector.shape_cast %25 : vector<1x64xf32> to vector<64xf32>
    %27 = vector.shape_cast %26 : vector<64xf32> to vector<1x64xf32>
    %28 = vector.extract_strided_slice %18 {offsets = [3, 0], sizes = [1, 64], strides = [1, 1]} : vector<25x64xf32> to vector<1x64xf32>
    %29 = vector.shape_cast %28 : vector<1x64xf32> to vector<64xf32>
    %30 = vector.shape_cast %29 : vector<64xf32> to vector<1x64xf32>
    %31 = vector.extract_strided_slice %18 {offsets = [4, 0], sizes = [1, 64], strides = [1, 1]} : vector<25x64xf32> to vector<1x64xf32>
    %32 = vector.shape_cast %31 : vector<1x64xf32> to vector<64xf32>
    %33 = vector.shape_cast %32 : vector<64xf32> to vector<1x64xf32>
    %34 = vector.extract_strided_slice %18 {offsets = [5, 0], sizes = [1, 64], strides = [1, 1]} : vector<25x64xf32> to vector<1x64xf32>
    %35 = vector.shape_cast %34 : vector<1x64xf32> to vector<64xf32>
    %36 = vector.shape_cast %35 : vector<64xf32> to vector<1x64xf32>
    %37 = vector.extract_strided_slice %18 {offsets = [6, 0], sizes = [1, 64], strides = [1, 1]} : vector<25x64xf32> to vector<1x64xf32>
    %38 = vector.shape_cast %37 : vector<1x64xf32> to vector<64xf32>
    %39 = vector.shape_cast %38 : vector<64xf32> to vector<1x64xf32>
    %40 = vector.extract_strided_slice %18 {offsets = [7, 0], sizes = [1, 64], strides = [1, 1]} : vector<25x64xf32> to vector<1x64xf32>
    %41 = vector.shape_cast %40 : vector<1x64xf32> to vector<64xf32>
    %42 = vector.shape_cast %41 : vector<64xf32> to vector<1x64xf32>
    %43 = vector.extract_strided_slice %18 {offsets = [8, 0], sizes = [1, 64], strides = [1, 1]} : vector<25x64xf32> to vector<1x64xf32>
    %44 = vector.shape_cast %43 : vector<1x64xf32> to vector<64xf32>
    %45 = vector.shape_cast %44 : vector<64xf32> to vector<1x64xf32>
    %46 = vector.extract_strided_slice %18 {offsets = [9, 0], sizes = [1, 64], strides = [1, 1]} : vector<25x64xf32> to vector<1x64xf32>
    %47 = vector.shape_cast %46 : vector<1x64xf32> to vector<64xf32>
    %48 = vector.shape_cast %47 : vector<64xf32> to vector<1x64xf32>
    %49 = vector.extract_strided_slice %18 {offsets = [10, 0], sizes = [1, 64], strides = [1, 1]} : vector<25x64xf32> to vector<1x64xf32>
    %50 = vector.shape_cast %49 : vector<1x64xf32> to vector<64xf32>
    %51 = vector.shape_cast %50 : vector<64xf32> to vector<1x64xf32>
    %52 = vector.extract_strided_slice %18 {offsets = [11, 0], sizes = [1, 64], strides = [1, 1]} : vector<25x64xf32> to vector<1x64xf32>
    %53 = vector.shape_cast %52 : vector<1x64xf32> to vector<64xf32>
    %54 = vector.shape_cast %53 : vector<64xf32> to vector<1x64xf32>
    %55 = vector.extract_strided_slice %18 {offsets = [12, 0], sizes = [1, 64], strides = [1, 1]} : vector<25x64xf32> to vector<1x64xf32>
    %56 = vector.shape_cast %55 : vector<1x64xf32> to vector<64xf32>
    %57 = vector.shape_cast %56 : vector<64xf32> to vector<1x64xf32>
    %58 = vector.extract_strided_slice %18 {offsets = [13, 0], sizes = [1, 64], strides = [1, 1]} : vector<25x64xf32> to vector<1x64xf32>
    %59 = vector.shape_cast %58 : vector<1x64xf32> to vector<64xf32>
    %60 = vector.shape_cast %59 : vector<64xf32> to vector<1x64xf32>
    %61 = vector.extract_strided_slice %18 {offsets = [14, 0], sizes = [1, 64], strides = [1, 1]} : vector<25x64xf32> to vector<1x64xf32>
    %62 = vector.shape_cast %61 : vector<1x64xf32> to vector<64xf32>
    %63 = vector.shape_cast %62 : vector<64xf32> to vector<1x64xf32>
    %64 = vector.extract_strided_slice %18 {offsets = [15, 0], sizes = [1, 64], strides = [1, 1]} : vector<25x64xf32> to vector<1x64xf32>
    %65 = vector.shape_cast %64 : vector<1x64xf32> to vector<64xf32>
    %66 = vector.shape_cast %65 : vector<64xf32> to vector<1x64xf32>
    %67 = vector.extract_strided_slice %18 {offsets = [16, 0], sizes = [1, 64], strides = [1, 1]} : vector<25x64xf32> to vector<1x64xf32>
    %68 = vector.shape_cast %67 : vector<1x64xf32> to vector<64xf32>
    %69 = vector.shape_cast %68 : vector<64xf32> to vector<1x64xf32>
    %70 = vector.extract_strided_slice %18 {offsets = [17, 0], sizes = [1, 64], strides = [1, 1]} : vector<25x64xf32> to vector<1x64xf32>
    %71 = vector.shape_cast %70 : vector<1x64xf32> to vector<64xf32>
    %72 = vector.shape_cast %71 : vector<64xf32> to vector<1x64xf32>
    %73 = vector.extract_strided_slice %18 {offsets = [18, 0], sizes = [1, 64], strides = [1, 1]} : vector<25x64xf32> to vector<1x64xf32>
    %74 = vector.shape_cast %73 : vector<1x64xf32> to vector<64xf32>
    %75 = vector.shape_cast %74 : vector<64xf32> to vector<1x64xf32>
    %76 = vector.extract_strided_slice %18 {offsets = [19, 0], sizes = [1, 64], strides = [1, 1]} : vector<25x64xf32> to vector<1x64xf32>
    %77 = vector.shape_cast %76 : vector<1x64xf32> to vector<64xf32>
    %78 = vector.shape_cast %77 : vector<64xf32> to vector<1x64xf32>
    %79 = vector.extract_strided_slice %18 {offsets = [20, 0], sizes = [1, 64], strides = [1, 1]} : vector<25x64xf32> to vector<1x64xf32>
    %80 = vector.shape_cast %79 : vector<1x64xf32> to vector<64xf32>
    %81 = vector.shape_cast %80 : vector<64xf32> to vector<1x64xf32>
    %82 = vector.extract_strided_slice %18 {offsets = [21, 0], sizes = [1, 64], strides = [1, 1]} : vector<25x64xf32> to vector<1x64xf32>
    %83 = vector.shape_cast %82 : vector<1x64xf32> to vector<64xf32>
    %84 = vector.shape_cast %83 : vector<64xf32> to vector<1x64xf32>
    %85 = vector.extract_strided_slice %18 {offsets = [22, 0], sizes = [1, 64], strides = [1, 1]} : vector<25x64xf32> to vector<1x64xf32>
    %86 = vector.shape_cast %85 : vector<1x64xf32> to vector<64xf32>
    %87 = vector.shape_cast %86 : vector<64xf32> to vector<1x64xf32>
    %88 = vector.extract_strided_slice %18 {offsets = [23, 0], sizes = [1, 64], strides = [1, 1]} : vector<25x64xf32> to vector<1x64xf32>
    %89 = vector.shape_cast %88 : vector<1x64xf32> to vector<64xf32>
    %90 = vector.shape_cast %89 : vector<64xf32> to vector<1x64xf32>
    %91 = vector.extract_strided_slice %18 {offsets = [24, 0], sizes = [1, 64], strides = [1, 1]} : vector<25x64xf32> to vector<1x64xf32>
    %92 = vector.shape_cast %91 : vector<1x64xf32> to vector<64xf32>
    %93 = vector.shape_cast %92 : vector<64xf32> to vector<1x64xf32>
    %c0_23 = arith.constant 0 : index
    %c0_24 = arith.constant 0 : index
    %94 = vector.load %arg5[%c0_23, %c0_24] : memref<1x1xf32, #tpu.memory_space<vmem>>, vector<1x1xf32>
    %95 = tpu.iota {dimensions = array<i32: 0>} : vector<128x64xi32>
    %c16_i32 = arith.constant 16 : i32
    %c0_i32 = arith.constant 0 : i32
    %96 = arith.cmpi eq, %c16_i32, %c0_i32 : i32
    %c1_i32 = arith.constant 1 : i32
    %97 = arith.select %96, %c1_i32, %c16_i32 : i32
    %98 = vector.broadcast %97 : i32 to vector<128x64xi32>
    %99 = arith.remsi %95, %98 : vector<128x64xi32>
    %c0_i32_25 = arith.constant 0 : i32
    %100 = vector.broadcast %c0_i32_25 : i32 to vector<128x64xi32>
    %101 = arith.cmpi ne, %99, %100 : vector<128x64xi32>
    %c0_i32_26 = arith.constant 0 : i32
    %102 = vector.broadcast %c0_i32_26 : i32 to vector<128x64xi32>
    %103 = arith.cmpi slt, %99, %102 : vector<128x64xi32>
    %c0_i32_27 = arith.constant 0 : i32
    %104 = arith.cmpi slt, %97, %c0_i32_27 : i32
    %105 = vector.broadcast %104 : i1 to vector<128x64xi1>
    %106 = vector.broadcast %105 : vector<128x64xi1> to vector<128x64xi1>
    %107 = arith.xori %103, %106 : vector<128x64xi1>
    %108 = arith.andi %107, %101 : vector<128x64xi1>
    %109 = vector.broadcast %97 : i32 to vector<128x64xi32>
    %110 = arith.addi %99, %109 : vector<128x64xi32>
    %111 = arith.select %108, %110, %99 : vector<128x64xi1>, vector<128x64xi32>
    %c8_i32 = arith.constant 8 : i32
    %112 = vector.broadcast %c8_i32 : i32 to vector<128x64xi32>
    %113 = arith.cmpi slt, %111, %112 : vector<128x64xi32>
    %c0_i32_28 = arith.constant 0 : i32
    %c128_i32 = arith.constant 128 : i32
    %114 = arith.muli %c0_i32_28, %c128_i32 : i32
    %115 = tpu.assume_multiple %114, 16 : i32
    %cst_29 = arith.constant 0.000000e+00 : f32
    %116 = vector.broadcast %cst_29 : f32 to vector<128x64xf32>
    %c0_i32_30 = arith.constant 0 : i32
    %117 = arith.addi %115, %c0_i32_30 : i32
    %118 = arith.index_cast %117 : i32 to index
    %c0_31 = arith.constant 0 : index
    %119 = vector.load %arg7[%118, %c0_31] : memref<192x320xbf16, #tpu.memory_space<vmem>>, vector<128x320xbf16>
    %120 = vector.extract_strided_slice %16 {offsets = [0, 0, 0], sizes = [1, 320, 64], strides = [1, 1, 1]} : vector<5x320x64xbf16> to vector<1x320x64xbf16>
    %121 = vector.shape_cast %120 : vector<1x320x64xbf16> to vector<320x64xbf16>
    %cst_32 = arith.constant dense<0.000000e+00> : vector<128x64xf32>
    %122 = tpu.matmul %119, %121, %cst_32 {dimension_numbers = #tpu.dot_dimension_numbers<[1], [0], [0], [1], [0, 0, 1, 1], [], []>} : vector<128x320xbf16>, vector<320x64xbf16>, vector<128x64xf32> -> vector<128x64xf32>
    %123 = arith.addf %116, %122 : vector<128x64xf32>
    %c16_i32_33 = arith.constant 16 : i32
    %124 = arith.addi %115, %c16_i32_33 : i32
    %125 = arith.index_cast %124 : i32 to index
    %c0_34 = arith.constant 0 : index
    %126 = vector.load %arg7[%125, %c0_34] : memref<192x320xbf16, #tpu.memory_space<vmem>>, vector<128x320xbf16>
    %127 = vector.extract_strided_slice %16 {offsets = [1, 0, 0], sizes = [1, 320, 64], strides = [1, 1, 1]} : vector<5x320x64xbf16> to vector<1x320x64xbf16>
    %128 = vector.shape_cast %127 : vector<1x320x64xbf16> to vector<320x64xbf16>
    %cst_35 = arith.constant dense<0.000000e+00> : vector<128x64xf32>
    %129 = tpu.matmul %126, %128, %cst_35 {dimension_numbers = #tpu.dot_dimension_numbers<[1], [0], [0], [1], [0, 0, 1, 1], [], []>} : vector<128x320xbf16>, vector<320x64xbf16>, vector<128x64xf32> -> vector<128x64xf32>
    %130 = arith.addf %123, %129 : vector<128x64xf32>
    %c32_i32 = arith.constant 32 : i32
    %131 = arith.addi %115, %c32_i32 : i32
    %132 = arith.index_cast %131 : i32 to index
    %c0_36 = arith.constant 0 : index
    %133 = vector.load %arg7[%132, %c0_36] : memref<192x320xbf16, #tpu.memory_space<vmem>>, vector<128x320xbf16>
    %134 = vector.extract_strided_slice %16 {offsets = [2, 0, 0], sizes = [1, 320, 64], strides = [1, 1, 1]} : vector<5x320x64xbf16> to vector<1x320x64xbf16>
    %135 = vector.shape_cast %134 : vector<1x320x64xbf16> to vector<320x64xbf16>
    %cst_37 = arith.constant dense<0.000000e+00> : vector<128x64xf32>
    %136 = tpu.matmul %133, %135, %cst_37 {dimension_numbers = #tpu.dot_dimension_numbers<[1], [0], [0], [1], [0, 0, 1, 1], [], []>} : vector<128x320xbf16>, vector<320x64xbf16>, vector<128x64xf32> -> vector<128x64xf32>
    %137 = arith.addf %130, %136 : vector<128x64xf32>
    %c48_i32 = arith.constant 48 : i32
    %138 = arith.addi %115, %c48_i32 : i32
    %139 = arith.index_cast %138 : i32 to index
    %c0_38 = arith.constant 0 : index
    %140 = vector.load %arg7[%139, %c0_38] : memref<192x320xbf16, #tpu.memory_space<vmem>>, vector<128x320xbf16>
    %141 = vector.extract_strided_slice %16 {offsets = [3, 0, 0], sizes = [1, 320, 64], strides = [1, 1, 1]} : vector<5x320x64xbf16> to vector<1x320x64xbf16>
    %142 = vector.shape_cast %141 : vector<1x320x64xbf16> to vector<320x64xbf16>
    %cst_39 = arith.constant dense<0.000000e+00> : vector<128x64xf32>
    %143 = tpu.matmul %140, %142, %cst_39 {dimension_numbers = #tpu.dot_dimension_numbers<[1], [0], [0], [1], [0, 0, 1, 1], [], []>} : vector<128x320xbf16>, vector<320x64xbf16>, vector<128x64xf32> -> vector<128x64xf32>
    %144 = arith.addf %137, %143 : vector<128x64xf32>
    %c64_i32 = arith.constant 64 : i32
    %145 = arith.addi %115, %c64_i32 : i32
    %146 = arith.index_cast %145 : i32 to index
    %c0_40 = arith.constant 0 : index
    %147 = vector.load %arg7[%146, %c0_40] : memref<192x320xbf16, #tpu.memory_space<vmem>>, vector<128x320xbf16>
    %148 = vector.extract_strided_slice %16 {offsets = [4, 0, 0], sizes = [1, 320, 64], strides = [1, 1, 1]} : vector<5x320x64xbf16> to vector<1x320x64xbf16>
    %149 = vector.shape_cast %148 : vector<1x320x64xbf16> to vector<320x64xbf16>
    %cst_41 = arith.constant dense<0.000000e+00> : vector<128x64xf32>
    %150 = tpu.matmul %147, %149, %cst_41 {dimension_numbers = #tpu.dot_dimension_numbers<[1], [0], [0], [1], [0, 0, 1, 1], [], []>} : vector<128x320xbf16>, vector<320x64xbf16>, vector<128x64xf32> -> vector<128x64xf32>
    %151 = arith.addf %144, %150 : vector<128x64xf32>
    %152 = vector.broadcast %17 : vector<1x64xf32> to vector<128x64xf32>
    %153 = arith.addf %151, %152 : vector<128x64xf32>
    %cst_42 = arith.constant 0.000000e+00 : f32
    %154 = vector.broadcast %cst_42 : f32 to vector<128x64xf32>
    %155 = arith.maximumf %153, %154 : vector<128x64xf32>
    %cst_43 = arith.constant 0.000000e+00 : f32
    %156 = vector.broadcast %cst_43 : f32 to vector<128x64xf32>
    %157 = arith.select %113, %155, %156 : vector<128x64xi1>, vector<128x64xf32>
    %c40_i32 = arith.constant 40 : i32
    %158 = arith.addi %115, %c40_i32 : i32
    %159 = arith.index_cast %158 : i32 to index
    %c0_44 = arith.constant 0 : index
    %160 = vector.load %arg8[%159, %c0_44] : memref<208x64xf32, #tpu.memory_space<vmem>>, vector<128x64xf32>
    tpu.vector_store %arg8[%159, %c0_44], %157 {strides = array<i32>} : memref<208x64xf32, #tpu.memory_space<vmem>>, vector<128x64xf32>,
    %c1_i32_45 = arith.constant 1 : i32
    %c0_i32_46 = arith.constant 0 : i32
    %c128_i32_47 = arith.constant 128 : i32
    %161 = arith.muli %c0_i32_46, %c128_i32_47 : i32
    %162 = tpu.assume_multiple %161, 16 : i32
    %cst_48 = arith.constant 0.000000e+00 : f32
    %163 = vector.broadcast %cst_48 : f32 to vector<128x64xf32>
    %c0_i32_49 = arith.constant 0 : i32
    %164 = arith.addi %162, %c0_i32_49 : i32
    %c0_i32_50 = arith.constant 0 : i32
    %165 = arith.addi %164, %c0_i32_50 : i32
    %c6_i32 = arith.constant 6 : i32
    %166 = arith.addi %165, %c6_i32 : i32
    %167 = arith.index_cast %166 : i32 to index
    %c0_51 = arith.constant 0 : index
    %168 = vector.load %arg8[%167, %c0_51] : memref<208x64xf32, #tpu.memory_space<vmem>>, vector<128x64xf32>
    %169 = vector.broadcast %21 : vector<1x64xf32> to vector<128x64xf32>
    %170 = arith.mulf %168, %169 : vector<128x64xf32>
    %171 = arith.addf %163, %170 : vector<128x64xf32>
    %c0_i32_52 = arith.constant 0 : i32
    %172 = arith.addi %162, %c0_i32_52 : i32
    %c1_i32_53 = arith.constant 1 : i32
    %173 = arith.addi %172, %c1_i32_53 : i32
    %c6_i32_54 = arith.constant 6 : i32
    %174 = arith.addi %173, %c6_i32_54 : i32
    %175 = arith.index_cast %174 : i32 to index
    %c0_55 = arith.constant 0 : index
    %176 = vector.load %arg8[%175, %c0_55] : memref<208x64xf32, #tpu.memory_space<vmem>>, vector<128x64xf32>
    %177 = vector.broadcast %24 : vector<1x64xf32> to vector<128x64xf32>
    %178 = arith.mulf %176, %177 : vector<128x64xf32>
    %179 = arith.addf %171, %178 : vector<128x64xf32>
    %c0_i32_56 = arith.constant 0 : i32
    %180 = arith.addi %162, %c0_i32_56 : i32
    %c2_i32 = arith.constant 2 : i32
    %181 = arith.addi %180, %c2_i32 : i32
    %c6_i32_57 = arith.constant 6 : i32
    %182 = arith.addi %181, %c6_i32_57 : i32
    %183 = arith.index_cast %182 : i32 to index
    %c0_58 = arith.constant 0 : index
    %184 = vector.load %arg8[%183, %c0_58] : memref<208x64xf32, #tpu.memory_space<vmem>>, vector<128x64xf32>
    %185 = vector.broadcast %27 : vector<1x64xf32> to vector<128x64xf32>
    %186 = arith.mulf %184, %185 : vector<128x64xf32>
    %187 = arith.addf %179, %186 : vector<128x64xf32>
    %c0_i32_59 = arith.constant 0 : i32
    %188 = arith.addi %162, %c0_i32_59 : i32
    %c3_i32 = arith.constant 3 : i32
    %189 = arith.addi %188, %c3_i32 : i32
    %c6_i32_60 = arith.constant 6 : i32
    %190 = arith.addi %189, %c6_i32_60 : i32
    %191 = arith.index_cast %190 : i32 to index
    %c0_61 = arith.constant 0 : index
    %192 = vector.load %arg8[%191, %c0_61] : memref<208x64xf32, #tpu.memory_space<vmem>>, vector<128x64xf32>
    %193 = vector.broadcast %30 : vector<1x64xf32> to vector<128x64xf32>
    %194 = arith.mulf %192, %193 : vector<128x64xf32>
    %195 = arith.addf %187, %194 : vector<128x64xf32>
    %c0_i32_62 = arith.constant 0 : i32
    %196 = arith.addi %162, %c0_i32_62 : i32
    %c4_i32 = arith.constant 4 : i32
    %197 = arith.addi %196, %c4_i32 : i32
    %c6_i32_63 = arith.constant 6 : i32
    %198 = arith.addi %197, %c6_i32_63 : i32
    %199 = arith.index_cast %198 : i32 to index
    %c0_64 = arith.constant 0 : index
    %200 = vector.load %arg8[%199, %c0_64] : memref<208x64xf32, #tpu.memory_space<vmem>>, vector<128x64xf32>
    %201 = vector.broadcast %33 : vector<1x64xf32> to vector<128x64xf32>
    %202 = arith.mulf %200, %201 : vector<128x64xf32>
    %203 = arith.addf %195, %202 : vector<128x64xf32>
    %c16_i32_65 = arith.constant 16 : i32
    %204 = arith.addi %162, %c16_i32_65 : i32
    %c0_i32_66 = arith.constant 0 : i32
    %205 = arith.addi %204, %c0_i32_66 : i32
    %c6_i32_67 = arith.constant 6 : i32
    %206 = arith.addi %205, %c6_i32_67 : i32
    %207 = arith.index_cast %206 : i32 to index
    %c0_68 = arith.constant 0 : index
    %208 = vector.load %arg8[%207, %c0_68] : memref<208x64xf32, #tpu.memory_space<vmem>>, vector<128x64xf32>
    %209 = vector.broadcast %36 : vector<1x64xf32> to vector<128x64xf32>
    %210 = arith.mulf %208, %209 : vector<128x64xf32>
    %211 = arith.addf %203, %210 : vector<128x64xf32>
    %c16_i32_69 = arith.constant 16 : i32
    %212 = arith.addi %162, %c16_i32_69 : i32
    %c1_i32_70 = arith.constant 1 : i32
    %213 = arith.addi %212, %c1_i32_70 : i32
    %c6_i32_71 = arith.constant 6 : i32
    %214 = arith.addi %213, %c6_i32_71 : i32
    %215 = arith.index_cast %214 : i32 to index
    %c0_72 = arith.constant 0 : index
    %216 = vector.load %arg8[%215, %c0_72] : memref<208x64xf32, #tpu.memory_space<vmem>>, vector<128x64xf32>
    %217 = vector.broadcast %39 : vector<1x64xf32> to vector<128x64xf32>
    %218 = arith.mulf %216, %217 : vector<128x64xf32>
    %219 = arith.addf %211, %218 : vector<128x64xf32>
    %c16_i32_73 = arith.constant 16 : i32
    %220 = arith.addi %162, %c16_i32_73 : i32
    %c2_i32_74 = arith.constant 2 : i32
    %221 = arith.addi %220, %c2_i32_74 : i32
    %c6_i32_75 = arith.constant 6 : i32
    %222 = arith.addi %221, %c6_i32_75 : i32
    %223 = arith.index_cast %222 : i32 to index
    %c0_76 = arith.constant 0 : index
    %224 = vector.load %arg8[%223, %c0_76] : memref<208x64xf32, #tpu.memory_space<vmem>>, vector<128x64xf32>
    %225 = vector.broadcast %42 : vector<1x64xf32> to vector<128x64xf32>
    %226 = arith.mulf %224, %225 : vector<128x64xf32>
    %227 = arith.addf %219, %226 : vector<128x64xf32>
    %c16_i32_77 = arith.constant 16 : i32
    %228 = arith.addi %162, %c16_i32_77 : i32
    %c3_i32_78 = arith.constant 3 : i32
    %229 = arith.addi %228, %c3_i32_78 : i32
    %c6_i32_79 = arith.constant 6 : i32
    %230 = arith.addi %229, %c6_i32_79 : i32
    %231 = arith.index_cast %230 : i32 to index
    %c0_80 = arith.constant 0 : index
    %232 = vector.load %arg8[%231, %c0_80] : memref<208x64xf32, #tpu.memory_space<vmem>>, vector<128x64xf32>
    %233 = vector.broadcast %45 : vector<1x64xf32> to vector<128x64xf32>
    %234 = arith.mulf %232, %233 : vector<128x64xf32>
    %235 = arith.addf %227, %234 : vector<128x64xf32>
    %c16_i32_81 = arith.constant 16 : i32
    %236 = arith.addi %162, %c16_i32_81 : i32
    %c4_i32_82 = arith.constant 4 : i32
    %237 = arith.addi %236, %c4_i32_82 : i32
    %c6_i32_83 = arith.constant 6 : i32
    %238 = arith.addi %237, %c6_i32_83 : i32
    %239 = arith.index_cast %238 : i32 to index
    %c0_84 = arith.constant 0 : index
    %240 = vector.load %arg8[%239, %c0_84] : memref<208x64xf32, #tpu.memory_space<vmem>>, vector<128x64xf32>
    %241 = vector.broadcast %48 : vector<1x64xf32> to vector<128x64xf32>
    %242 = arith.mulf %240, %241 : vector<128x64xf32>
    %243 = arith.addf %235, %242 : vector<128x64xf32>
    %c32_i32_85 = arith.constant 32 : i32
    %244 = arith.addi %162, %c32_i32_85 : i32
    %c0_i32_86 = arith.constant 0 : i32
    %245 = arith.addi %244, %c0_i32_86 : i32
    %c6_i32_87 = arith.constant 6 : i32
    %246 = arith.addi %245, %c6_i32_87 : i32
    %247 = arith.index_cast %246 : i32 to index
    %c0_88 = arith.constant 0 : index
    %248 = vector.load %arg8[%247, %c0_88] : memref<208x64xf32, #tpu.memory_space<vmem>>, vector<128x64xf32>
    %249 = vector.broadcast %51 : vector<1x64xf32> to vector<128x64xf32>
    %250 = arith.mulf %248, %249 : vector<128x64xf32>
    %251 = arith.addf %243, %250 : vector<128x64xf32>
    %c32_i32_89 = arith.constant 32 : i32
    %252 = arith.addi %162, %c32_i32_89 : i32
    %c1_i32_90 = arith.constant 1 : i32
    %253 = arith.addi %252, %c1_i32_90 : i32
    %c6_i32_91 = arith.constant 6 : i32
    %254 = arith.addi %253, %c6_i32_91 : i32
    %255 = arith.index_cast %254 : i32 to index
    %c0_92 = arith.constant 0 : index
    %256 = vector.load %arg8[%255, %c0_92] : memref<208x64xf32, #tpu.memory_space<vmem>>, vector<128x64xf32>
    %257 = vector.broadcast %54 : vector<1x64xf32> to vector<128x64xf32>
    %258 = arith.mulf %256, %257 : vector<128x64xf32>
    %259 = arith.addf %251, %258 : vector<128x64xf32>
    %c32_i32_93 = arith.constant 32 : i32
    %260 = arith.addi %162, %c32_i32_93 : i32
    %c2_i32_94 = arith.constant 2 : i32
    %261 = arith.addi %260, %c2_i32_94 : i32
    %c6_i32_95 = arith.constant 6 : i32
    %262 = arith.addi %261, %c6_i32_95 : i32
    %263 = arith.index_cast %262 : i32 to index
    %c0_96 = arith.constant 0 : index
    %264 = vector.load %arg8[%263, %c0_96] : memref<208x64xf32, #tpu.memory_space<vmem>>, vector<128x64xf32>
    %265 = vector.broadcast %57 : vector<1x64xf32> to vector<128x64xf32>
    %266 = arith.mulf %264, %265 : vector<128x64xf32>
    %267 = arith.addf %259, %266 : vector<128x64xf32>
    %c32_i32_97 = arith.constant 32 : i32
    %268 = arith.addi %162, %c32_i32_97 : i32
    %c3_i32_98 = arith.constant 3 : i32
    %269 = arith.addi %268, %c3_i32_98 : i32
    %c6_i32_99 = arith.constant 6 : i32
    %270 = arith.addi %269, %c6_i32_99 : i32
    %271 = arith.index_cast %270 : i32 to index
    %c0_100 = arith.constant 0 : index
    %272 = vector.load %arg8[%271, %c0_100] : memref<208x64xf32, #tpu.memory_space<vmem>>, vector<128x64xf32>
    %273 = vector.broadcast %60 : vector<1x64xf32> to vector<128x64xf32>
    %274 = arith.mulf %272, %273 : vector<128x64xf32>
    %275 = arith.addf %267, %274 : vector<128x64xf32>
    %c32_i32_101 = arith.constant 32 : i32
    %276 = arith.addi %162, %c32_i32_101 : i32
    %c4_i32_102 = arith.constant 4 : i32
    %277 = arith.addi %276, %c4_i32_102 : i32
    %c6_i32_103 = arith.constant 6 : i32
    %278 = arith.addi %277, %c6_i32_103 : i32
    %279 = arith.index_cast %278 : i32 to index
    %c0_104 = arith.constant 0 : index
    %280 = vector.load %arg8[%279, %c0_104] : memref<208x64xf32, #tpu.memory_space<vmem>>, vector<128x64xf32>
    %281 = vector.broadcast %63 : vector<1x64xf32> to vector<128x64xf32>
    %282 = arith.mulf %280, %281 : vector<128x64xf32>
    %283 = arith.addf %275, %282 : vector<128x64xf32>
    %c48_i32_105 = arith.constant 48 : i32
    %284 = arith.addi %162, %c48_i32_105 : i32
    %c0_i32_106 = arith.constant 0 : i32
    %285 = arith.addi %284, %c0_i32_106 : i32
    %c6_i32_107 = arith.constant 6 : i32
    %286 = arith.addi %285, %c6_i32_107 : i32
    %287 = arith.index_cast %286 : i32 to index
    %c0_108 = arith.constant 0 : index
    %288 = vector.load %arg8[%287, %c0_108] : memref<208x64xf32, #tpu.memory_space<vmem>>, vector<128x64xf32>
    %289 = vector.broadcast %66 : vector<1x64xf32> to vector<128x64xf32>
    %290 = arith.mulf %288, %289 : vector<128x64xf32>
    %291 = arith.addf %283, %290 : vector<128x64xf32>
    %c48_i32_109 = arith.constant 48 : i32
    %292 = arith.addi %162, %c48_i32_109 : i32
    %c1_i32_110 = arith.constant 1 : i32
    %293 = arith.addi %292, %c1_i32_110 : i32
    %c6_i32_111 = arith.constant 6 : i32
    %294 = arith.addi %293, %c6_i32_111 : i32
    %295 = arith.index_cast %294 : i32 to index
    %c0_112 = arith.constant 0 : index
    %296 = vector.load %arg8[%295, %c0_112] : memref<208x64xf32, #tpu.memory_space<vmem>>, vector<128x64xf32>
    %297 = vector.broadcast %69 : vector<1x64xf32> to vector<128x64xf32>
    %298 = arith.mulf %296, %297 : vector<128x64xf32>
    %299 = arith.addf %291, %298 : vector<128x64xf32>
    %c48_i32_113 = arith.constant 48 : i32
    %300 = arith.addi %162, %c48_i32_113 : i32
    %c2_i32_114 = arith.constant 2 : i32
    %301 = arith.addi %300, %c2_i32_114 : i32
    %c6_i32_115 = arith.constant 6 : i32
    %302 = arith.addi %301, %c6_i32_115 : i32
    %303 = arith.index_cast %302 : i32 to index
    %c0_116 = arith.constant 0 : index
    %304 = vector.load %arg8[%303, %c0_116] : memref<208x64xf32, #tpu.memory_space<vmem>>, vector<128x64xf32>
    %305 = vector.broadcast %72 : vector<1x64xf32> to vector<128x64xf32>
    %306 = arith.mulf %304, %305 : vector<128x64xf32>
    %307 = arith.addf %299, %306 : vector<128x64xf32>
    %c48_i32_117 = arith.constant 48 : i32
    %308 = arith.addi %162, %c48_i32_117 : i32
    %c3_i32_118 = arith.constant 3 : i32
    %309 = arith.addi %308, %c3_i32_118 : i32
    %c6_i32_119 = arith.constant 6 : i32
    %310 = arith.addi %309, %c6_i32_119 : i32
    %311 = arith.index_cast %310 : i32 to index
    %c0_120 = arith.constant 0 : index
    %312 = vector.load %arg8[%311, %c0_120] : memref<208x64xf32, #tpu.memory_space<vmem>>, vector<128x64xf32>
    %313 = vector.broadcast %75 : vector<1x64xf32> to vector<128x64xf32>
    %314 = arith.mulf %312, %313 : vector<128x64xf32>
    %315 = arith.addf %307, %314 : vector<128x64xf32>
    %c48_i32_121 = arith.constant 48 : i32
    %316 = arith.addi %162, %c48_i32_121 : i32
    %c4_i32_122 = arith.constant 4 : i32
    %317 = arith.addi %316, %c4_i32_122 : i32
    %c6_i32_123 = arith.constant 6 : i32
    %318 = arith.addi %317, %c6_i32_123 : i32
    %319 = arith.index_cast %318 : i32 to index
    %c0_124 = arith.constant 0 : index
    %320 = vector.load %arg8[%319, %c0_124] : memref<208x64xf32, #tpu.memory_space<vmem>>, vector<128x64xf32>
    %321 = vector.broadcast %78 : vector<1x64xf32> to vector<128x64xf32>
    %322 = arith.mulf %320, %321 : vector<128x64xf32>
    %323 = arith.addf %315, %322 : vector<128x64xf32>
    %c64_i32_125 = arith.constant 64 : i32
    %324 = arith.addi %162, %c64_i32_125 : i32
    %c0_i32_126 = arith.constant 0 : i32
    %325 = arith.addi %324, %c0_i32_126 : i32
    %c6_i32_127 = arith.constant 6 : i32
    %326 = arith.addi %325, %c6_i32_127 : i32
    %327 = arith.index_cast %326 : i32 to index
    %c0_128 = arith.constant 0 : index
    %328 = vector.load %arg8[%327, %c0_128] : memref<208x64xf32, #tpu.memory_space<vmem>>, vector<128x64xf32>
    %329 = vector.broadcast %81 : vector<1x64xf32> to vector<128x64xf32>
    %330 = arith.mulf %328, %329 : vector<128x64xf32>
    %331 = arith.addf %323, %330 : vector<128x64xf32>
    %c64_i32_129 = arith.constant 64 : i32
    %332 = arith.addi %162, %c64_i32_129 : i32
    %c1_i32_130 = arith.constant 1 : i32
    %333 = arith.addi %332, %c1_i32_130 : i32
    %c6_i32_131 = arith.constant 6 : i32
    %334 = arith.addi %333, %c6_i32_131 : i32
    %335 = arith.index_cast %334 : i32 to index
    %c0_132 = arith.constant 0 : index
    %336 = vector.load %arg8[%335, %c0_132] : memref<208x64xf32, #tpu.memory_space<vmem>>, vector<128x64xf32>
    %337 = vector.broadcast %84 : vector<1x64xf32> to vector<128x64xf32>
    %338 = arith.mulf %336, %337 : vector<128x64xf32>
    %339 = arith.addf %331, %338 : vector<128x64xf32>
    %c64_i32_133 = arith.constant 64 : i32
    %340 = arith.addi %162, %c64_i32_133 : i32
    %c2_i32_134 = arith.constant 2 : i32
    %341 = arith.addi %340, %c2_i32_134 : i32
    %c6_i32_135 = arith.constant 6 : i32
    %342 = arith.addi %341, %c6_i32_135 : i32
    %343 = arith.index_cast %342 : i32 to index
    %c0_136 = arith.constant 0 : index
    %344 = vector.load %arg8[%343, %c0_136] : memref<208x64xf32, #tpu.memory_space<vmem>>, vector<128x64xf32>
    %345 = vector.broadcast %87 : vector<1x64xf32> to vector<128x64xf32>
    %346 = arith.mulf %344, %345 : vector<128x64xf32>
    %347 = arith.addf %339, %346 : vector<128x64xf32>
    %c64_i32_137 = arith.constant 64 : i32
    %348 = arith.addi %162, %c64_i32_137 : i32
    %c3_i32_138 = arith.constant 3 : i32
    %349 = arith.addi %348, %c3_i32_138 : i32
    %c6_i32_139 = arith.constant 6 : i32
    %350 = arith.addi %349, %c6_i32_139 : i32
    %351 = arith.index_cast %350 : i32 to index
    %c0_140 = arith.constant 0 : index
    %352 = vector.load %arg8[%351, %c0_140] : memref<208x64xf32, #tpu.memory_space<vmem>>, vector<128x64xf32>
    %353 = vector.broadcast %90 : vector<1x64xf32> to vector<128x64xf32>
    %354 = arith.mulf %352, %353 : vector<128x64xf32>
    %355 = arith.addf %347, %354 : vector<128x64xf32>
    %c64_i32_141 = arith.constant 64 : i32
    %356 = arith.addi %162, %c64_i32_141 : i32
    %c4_i32_142 = arith.constant 4 : i32
    %357 = arith.addi %356, %c4_i32_142 : i32
    %c6_i32_143 = arith.constant 6 : i32
    %358 = arith.addi %357, %c6_i32_143 : i32
    %359 = arith.index_cast %358 : i32 to index
    %c0_144 = arith.constant 0 : index
    %360 = vector.load %arg8[%359, %c0_144] : memref<208x64xf32, #tpu.memory_space<vmem>>, vector<128x64xf32>
    %361 = vector.broadcast %93 : vector<1x64xf32> to vector<128x64xf32>
    %362 = arith.mulf %360, %361 : vector<128x64xf32>
    %363 = arith.addf %355, %362 : vector<128x64xf32>
    %cst_145 = arith.constant dense<0.000000e+00> : vector<128xf32>
    %364 = vector.multi_reduction <add>, %363, %cst_145 [1] : vector<128x64xf32> to vector<128xf32>
    %365 = vector.shape_cast %364 : vector<128xf32> to vector<128x1xf32>
    %366 = vector.broadcast %94 : vector<1x1xf32> to vector<128x1xf32>
    %367 = arith.addf %365, %366 : vector<128x1xf32>
    %c0_146 = arith.constant 0 : index
    %368 = arith.index_cast %162 : i32 to index
    %c0_147 = arith.constant 0 : index
    %369 = vector.load %arg6[%c0_146, %368, %c0_147] : memref<1x128x1xf32, #tpu.memory_space<vmem>>, vector<1x128x1xf32>
    %370 = vector.shape_cast %369 : vector<1x128x1xf32> to vector<128x1xf32>
    %371 = vector.shape_cast %367 : vector<128x1xf32> to vector<1x128x1xf32>
    tpu.vector_store %arg6[%c0_146, %368, %c0_147], %371 {strides = array<i32>} : memref<1x128x1xf32, #tpu.memory_space<vmem>>, vector<1x128x1xf32>,
    %c1_i32_148 = arith.constant 1 : i32
    return
  }
  func.func @transform_0(%arg0: i32) -> (i32, i32, i32) {
    %c0_i32 = arith.constant 0 : i32
    %c0_i32_0 = arith.constant 0 : i32
    %c0_i32_1 = arith.constant 0 : i32
    return %arg0, %c0_i32, %c0_i32_0 : i32, i32, i32
  }
  func.func @transform_1(%arg0: i32) -> (i32, i32, i32) {
    %c0_i32 = arith.constant 0 : i32
    %c0_i32_0 = arith.constant 0 : i32
    %c0_i32_1 = arith.constant 0 : i32
    %c0_i32_2 = arith.constant 0 : i32
    return %c0_i32, %c0_i32_0, %c0_i32_1 : i32, i32, i32
  }
  func.func @transform_2(%arg0: i32) -> (i32, i32) {
    %c0_i32 = arith.constant 0 : i32
    %c0_i32_0 = arith.constant 0 : i32
    %c0_i32_1 = arith.constant 0 : i32
    return %c0_i32, %c0_i32_0 : i32, i32
  }
  func.func @transform_3(%arg0: i32) -> (i32, i32) {
    %c0_i32 = arith.constant 0 : i32
    %c0_i32_0 = arith.constant 0 : i32
    %c0_i32_1 = arith.constant 0 : i32
    return %c0_i32, %c0_i32_0 : i32, i32
  }
  func.func @transform_4(%arg0: i32) -> (i32, i32) {
    %c0_i32 = arith.constant 0 : i32
    %c0_i32_0 = arith.constant 0 : i32
    %c0_i32_1 = arith.constant 0 : i32
    return %c0_i32, %c0_i32_0 : i32, i32
  }
  func.func @transform_5(%arg0: i32) -> (i32, i32, i32) {
    %c0_i32 = arith.constant 0 : i32
    %c0_i32_0 = arith.constant 0 : i32
    %c0_i32_1 = arith.constant 0 : i32
    return %arg0, %c0_i32, %c0_i32_0 : i32, i32, i32
  }
}

</mosaic_0001>

<bundles_post_ra>
// kernel: fine_net_forward.2
= control target key start
LH: loop header
LB: loop body
LE: loop exit
PB: predicated region body
PF: predicated region fallthrough
CT: control target
= control target key end

     0   :  { %v1565_v0 = vmov 0   ;;  %vm182_vm0 = vcmask 154624   ;;  %vm207_vm1 = vcmask 1040384   ;;  %vm208_vm2 = vcmask 1041408   ;;  %s2260_s2 = inlined_call_operand.vmem [shape: bf16[147,64], index: 2, kind: input, shape index: {}]   ;;  %s2261_s0 = inlined_call_operand.vmem [shape: bf16[4,128,147], index: 0, kind: input, shape index: {}]   ;;  %s2262_s1 = inlined_call_operand.vmem [shape: f32[128,1], index: 1, kind: input, shape index: {}]   ;;  %s2263_s3 = inlined_call_operand.vmem [shape: f32[1,64], index: 3, kind: input, shape index: {}]   ;;  %s2264_s4 = inlined_call_operand.vmem [shape: bf16[128,64], index: 4, kind: output, shape index: {}]  }
   0x1   :  { %214 = vmatprep.subr.bf16.mxu0 %v1565_v0  ;;  %424 = vmatprep.subr.bf16.mxu1 %v1565_v0  ;;  %v1597_v1 = vld [vmem:[%s2260_s2] sm:$0xff]   ;;  %v1606_v2 = vld [vmem:[%s2260_s2 + $0x8] sm:$0xff]   ;;  %v1615_v3 = vld [vmem:[%s2260_s2 + $0x10] sm:$0xff]   ;;  %v1566_v11 = vmov 65535   ;;  %vm1207_vm4 = vcmask 519168  }
   0x2   :  { %1417 = vset.pattern.permute.xlu0 %v1565_v0  ;;  %1428 = vset.pattern.permute.xlu1 %v1565_v0  ;;  %v1624_v4 = vld [vmem:[%s2260_s2 + $0x18] sm:$0xff]   ;;  %v1471_v5 = vld [vmem:[%s2261_s0 + $0x4] ss:$8 sps:$4 sm:$0xff]   ;;  %v1659_v9 = vld [vmem:[%s2260_s2 + $0x30] sm:$0xff]   ;;  %v209_v12 = vsel %vm207_vm1, 4294967295, %v1566_v11 }
   0x3   :  { %215 = vmatpush1.bf16.msra.mxu0 %v1597_v1  ;;  %425 = vmatpush1.bf16.msra.mxu1 %v1597_v1  ;;  %v1474_v6 = vld [vmem:[%s2261_s0 + $0x84] ss:$8 sps:$4 sm:$0xff]   ;;  %v1668_v10 = vld [vmem:[%s2260_s2 + $0x38] sm:$0xff]   ;;  %v1468_v14 = vld [vmem:[%s2260_s2 + $0x48] ss:$0 sps:$4 sm:$0x33]  }
   0x4   :  { %216 = vmatprep.subr.bf16.mxu0 %v1565_v0  ;;  %426 = vmatprep.subr.bf16.mxu1 %v1565_v0  ;;  %v1640_v7 = vld [vmem:[%s2260_s2 + $0x20] sm:$0xff]   ;;  %v1650_v8 = vld [vmem:[%s2260_s2 + $0x28] sm:$0xff]   ;;  %v210_v15 = vsel %vm208_vm2, %v209_v12, 0  ;;  %v1475_v19 = vld [vmem:[%s2261_s0 + $0x14] ss:$8 sps:$4 sm:$0xff]  }
   0x5   :  { %1254 = vmatprep.mubr.msk.bf16.mxu0 %vm182_vm0, %v1471_v5  ;;  %1294 = vmatprep.mubr.msk.bf16.mxu1 %vm182_vm0, %v1474_v6  ;;  %v1677_v13 = vld [vmem:[%s2260_s2 + $0x40] sm:$0xff]   ;;  %v1686_v16 = vand.u32 %v1468_v14, %v210_v15  ;;  %v1477_v20 = vld [vmem:[%s2261_s0 + $0x94] ss:$8 sps:$4 sm:$0xff]   ;;  %v1479_v21 = vld [vmem:[%s2261_s0 + $0x10] ss:$8 sps:$4 sm:$0xff]  }
   0x6   :  { %v1469_v17 = vld [vmem:[%s2261_s0] ss:$8 sps:$4 sm:$0xff]   ;;  %v1480_v22 = vld [vmem:[%s2261_s0 + $0x90] ss:$8 sps:$4 sm:$0xff]   ;;  %v1481_v23 = vld [vmem:[%s2261_s0 + $0x24] ss:$8 sps:$4 sm:$0xff]  }
   0x7   :  { %217 = vmatpush1.bf16.msra.mxu0 %v1606_v2  ;;  %427 = vmatpush1.bf16.msra.mxu1 %v1606_v2  ;;  %v1472_v18 = vld [vmem:[%s2261_s0 + $0x80] ss:$8 sps:$4 sm:$0xff]   ;;  %v1483_v24 = vld [vmem:[%s2261_s0 + $0xa4] ss:$8 sps:$4 sm:$0xff]   ;;  %v1487_v29 = vld [vmem:[%s2261_s0 + $0x34] ss:$8 sps:$4 sm:$0xff]  }
   0x8   :  { %218 = vmatprep.subr.bf16.mxu0 %v1565_v0  ;;  %428 = vmatprep.subr.bf16.mxu1 %v1565_v0  ;;  %v1485_v25 = vld [vmem:[%s2261_s0 + $0x20] ss:$8 sps:$4 sm:$0xff]   ;;  %v1489_v30 = vld [vmem:[%s2261_s0 + $0xb4] ss:$8 sps:$4 sm:$0xff]   ;;  %v1491_v38 = vld [vmem:[%s2261_s0 + $0x30] ss:$8 sps:$4 sm:$0xff]  }
   0x9   :  { %v1486_v26 = vld [vmem:[%s2261_s0 + $0xa0] ss:$8 sps:$4 sm:$0xff]   ;;  %v1033_v32 = vld [vmem:[%s2262_s1 + $0x10] sm:$0xff]  ;;  %v1034_v33 = vld [vmem:[%s2262_s1 + $0x18] sm:$0xff] }
   0xa   :  { %v1031_v27 = vld [vmem:[%s2262_s1] sm:$0xff]  ;;  %v1032_v28 = vld [vmem:[%s2262_s1 + $0x8] sm:$0xff]  ;;  %v1423_v36 = vpack.i.bf16 %v1034_v33, %v1033_v32  ;;  %v1492_v39 = vld [vmem:[%s2261_s0 + $0xb0] ss:$8 sps:$4 sm:$0xff]  }
   0xb   :  { %219 = vmatpush1.bf16.msra.mxu0 %v1615_v3  ;;  %429 = vmatpush1.bf16.msra.mxu1 %v1615_v3  ;;  %v1418_v31 = vpack.i.bf16 %v1032_v28, %v1031_v27  ;;  %v1035_v34 = vld [vmem:[%s2262_s1 + $0x20] sm:$0xff]  ;;  %v1036_v35 = vld [vmem:[%s2262_s1 + $0x28] sm:$0xff]  ;;  %v1037_v42 = vld [vmem:[%s2262_s1 + $0x30] sm:$0xff] }
   0xc   :  { %220 = vmatprep.subr.bf16.mxu0 %v1565_v0  ;;  %430 = vmatprep.subr.bf16.mxu1 %v1565_v0  ;;  %v1429_v37 = vpack.i.bf16 %v1036_v35, %v1035_v34  ;;  %v1493_v40 = vld [vmem:[%s2261_s0 + $0x44] ss:$8 sps:$4 sm:$0xff]   ;;  %v1038_v43 = vld [vmem:[%s2262_s1 + $0x38] sm:$0xff]  ;;  %v1497_v48 = vld [vmem:[%s2261_s0 + $0x40] ss:$8 sps:$4 sm:$0xff]  }
   0xd   :  { %1419 = vperm.xlu0 %1417, %v1418_v31   ;;  %v1495_v41 = vld [vmem:[%s2261_s0 + $0xc4] ss:$8 sps:$4 sm:$0xff]   ;;  %v1434_v46 = vpack.i.bf16 %v1038_v43, %v1037_v42  ;;  %v1498_v49 = vld [vmem:[%s2261_s0 + $0xc0] ss:$8 sps:$4 sm:$0xff]   ;;  %v1499_v50 = vld [vmem:[%s2261_s0 + $0x54] ss:$8 sps:$4 sm:$0xff]  }
   0xe   :  { %1430 = vperm.xlu1 %1428, %v1429_v37   ;;  %v1039_v44 = vld [vmem:[%s2262_s1 + $0x40] sm:$0xff]  ;;  %v1040_v45 = vld [vmem:[%s2262_s1 + $0x48] sm:$0xff]  ;;  %v1501_v51 = vld [vmem:[%s2261_s0 + $0xd4] ss:$8 sps:$4 sm:$0xff]  }
   0xf   :  { %221 = vmatpush1.bf16.msra.mxu0 %v1624_v4  ;;  %431 = vmatpush1.bf16.msra.mxu1 %v1624_v4  ;;  %v1439_v47 = vpack.i.bf16 %v1040_v45, %v1039_v44  ;;  %v1041_v52 = vld [vmem:[%s2262_s1 + $0x50] sm:$0xff]  ;;  %v1042_v53 = vld [vmem:[%s2262_s1 + $0x58] sm:$0xff]  ;;  %v1043_v54 = vld [vmem:[%s2262_s1 + $0x60] sm:$0xff] }
  0x10   :  { %222 = vmatprep.subr.bf16.mxu0 %v1565_v0  ;;  %432 = vmatprep.subr.bf16.mxu1 %v1565_v0  ;;  %v1044_v55 = vld [vmem:[%s2262_s1 + $0x68] sm:$0xff]  ;;  %v1444_v56 = vpack.i.bf16 %v1042_v53, %v1041_v52  ;;  %v1045_v58 = vld [vmem:[%s2262_s1 + $0x70] sm:$0xff]  ;;  %v1046_v59 = vld [vmem:[%s2262_s1 + $0x78] sm:$0xff] }
  0x11   :  { %1424 = vperm.xlu0 %1417, %v1423_v36   ;;  %v1449_v57 = vpack.i.bf16 %v1044_v55, %v1043_v54  ;;  %v1503_v60 = vld [vmem:[%s2261_s0 + $0x50] ss:$8 sps:$4 sm:$0xff]   ;;  %v1505_v62 = vld [vmem:[%s2261_s0 + $0x64] ss:$8 sps:$4 sm:$0xff]   ;;  %v1523_v11 = vld [vmem:[%s2261_s0 + $0x114] ss:$8 sps:$4 sm:$0xff]  }
  0x12   :  { %1435 = vperm.xlu1 %1428, %v1434_v46   ;;  %v1504_v61 = vld [vmem:[%s2261_s0 + $0xd0] ss:$8 sps:$4 sm:$0xff]   ;;  %v1507_v63 = vld [vmem:[%s2261_s0 + $0xe4] ss:$8 sps:$4 sm:$0xff]   ;;  %v1525_v12 = vld [vmem:[%s2261_s0 + $0x194] ss:$8 sps:$4 sm:$0xff]  }
  0x13   :  { %223 = vmatpush1.bf16.msra.mxu0 %v1640_v7  ;;  %433 = vmatpush1.bf16.msra.mxu1 %v1640_v7  ;;  %v1515_v5 = vld [vmem:[%s2261_s0 + $0x70] ss:$8 sps:$4 sm:$0xff]   ;;  %v1529_v15 = vld [vmem:[%s2261_s0 + $0x124] ss:$8 sps:$4 sm:$0xff]   ;;  %v1547_v27 = vld [vmem:[%s2261_s0 + $0x154] ss:$8 sps:$4 sm:$0xff]  }
  0x14   :  { %224 = vmatprep.subr.bf16.mxu0 %v1565_v0  ;;  %434 = vmatprep.subr.bf16.mxu1 %v1565_v0  ;;  %v1516_v6 = vld [vmem:[%s2261_s0 + $0xf0] ss:$8 sps:$4 sm:$0xff]   ;;  %v1549_v28 = vld [vmem:[%s2261_s0 + $0x1d4] ss:$8 sps:$4 sm:$0xff]   ;;  %v1553_v31 = vld [vmem:[%s2261_s0 + $0x164] ss:$8 sps:$4 sm:$0xff]  }
  0x15   :  { %1440 = vperm.xlu0 %1417, %v1439_v47   ;;  %v1528_v14 = vld [vmem:[%s2261_s0 + $0x190] ss:$8 sps:$4 sm:$0xff]   ;;  %v1555_v32 = vld [vmem:[%s2261_s0 + $0x1e4] ss:$8 sps:$4 sm:$0xff]   ;;  %v1557_v33 = vld [vmem:[%s2261_s0 + $0x160] ss:$8 sps:$4 sm:$0xff]  }
  0x16   :  { %1445 = vperm.xlu1 %1428, %v1444_v56   ;;  %v1558_v34 = vld [vmem:[%s2261_s0 + $0x1e0] ss:$8 sps:$4 sm:$0xff]   ;;  %v1559_v35 = vld [vmem:[%s2261_s0 + $0x174] ss:$8 sps:$4 sm:$0xff]   ;;  %v1563_v37 = vld [vmem:[%s2261_s0 + $0x170] ss:$8 sps:$4 sm:$0xff]  }
  0x17   :  { %225 = vmatpush1.bf16.msra.mxu0 %v1650_v8  ;;  %435 = vmatpush1.bf16.msra.mxu1 %v1650_v8  ;;  %v1561_v36 = vld [vmem:[%s2261_s0 + $0x1f4] ss:$8 sps:$4 sm:$0xff]  }
  0x18   :  { %226 = vmatprep.subr.bf16.mxu0 %v1565_v0  ;;  %436 = vmatprep.subr.bf16.mxu1 %v1565_v0 }
  0x19   :  { %1450 = vperm.xlu0 %1417, %v1449_v57  }
  0x1b   :  { %227 = vmatpush1.bf16.msra.mxu0 %v1659_v9  ;;  %437 = vmatpush1.bf16.msra.mxu1 %v1659_v9 }
  0x1c   :  { %228 = vmatprep.subr.bf16.mxu0 %v1565_v0  ;;  %438 = vmatprep.subr.bf16.mxu1 %v1565_v0 }
  0x1f   :  { %229 = vmatpush1.bf16.msra.mxu0 %v1668_v10  ;;  %439 = vmatpush1.bf16.msra.mxu1 %v1668_v10 }
  0x20   :  { %230 = vmatprep.subr.bf16.mxu0 %v1565_v0  ;;  %440 = vmatprep.subr.bf16.mxu1 %v1565_v0 }
  0x23   :  { %231 = vmatpush1.bf16.msra.mxu0 %v1677_v13  ;;  %441 = vmatpush1.bf16.msra.mxu1 %v1677_v13 }
  0x24   :  { %232 = vmatprep.subr.bf16.mxu0 %v1565_v0  ;;  %442 = vmatprep.subr.bf16.mxu1 %v1565_v0 }
  0x27   :  { %233 = vmatpush1.bf16.msra.mxu0 %v1686_v16  ;;  %443 = vmatpush1.bf16.msra.mxu1 %v1686_v16 }
  0x28   :  { %650 = vmatprep.subr.bf16.mxu0 %v1565_v0  ;;  %876 = vmatprep.subr.bf16.mxu1 %v1565_v0 }
  0x2a   :  { %247 = vmatmul.mubr.bf16.vlgmr.msra.gmra.mrb[0].mxu0 %v1469_v17  ;;  %457 = vmatmul.mubr.bf16.vlgmr.msra.gmra.mrb[0].mxu1 %v1472_v18  ;;  %v1533_v17 = vld [vmem:[%s2261_s0 + $0x120] ss:$8 sps:$4 sm:$0xff]  }
  0x2b   :  { %651 = vmatpush1.bf16.msra.mxu0 %v1597_v1  ;;  %877 = vmatpush1.bf16.msra.mxu1 %v1597_v1  ;;  %v1509_v1 = vld [vmem:[%s2261_s0 + $0x60] ss:$8 sps:$4 sm:$0xff]  }
  0x2c   :  { %1255 = vmatprep.mubr.msk.bf16.mxu0 %vm182_vm0, %v1475_v19  ;;  %1295 = vmatprep.mubr.msk.bf16.mxu1 %vm182_vm0, %v1477_v20  ;;  %v1534_v18 = vld [vmem:[%s2261_s0 + $0x1a0] ss:$8 sps:$4 sm:$0xff]   ;;  %v1535_v19 = vld [vmem:[%s2261_s0 + $0x134] ss:$8 sps:$4 sm:$0xff]  }
  0x2d   :  { %652 = vmatprep.subr.bf16.mxu0 %v1565_v0  ;;  %878 = vmatprep.subr.bf16.mxu1 %v1565_v0  ;;  %v1537_v20 = vld [vmem:[%s2261_s0 + $0x1b4] ss:$8 sps:$4 sm:$0xff]  }
  0x2f   :  { %653 = vmatpush1.bf16.msra.mxu0 %v1606_v2  ;;  %879 = vmatpush1.bf16.msra.mxu1 %v1606_v2  ;;  %v1510_v2 = vld [vmem:[%s2261_s0 + $0xe0] ss:$8 sps:$4 sm:$0xff]  }
  0x30   :  { %654 = vmatprep.subr.bf16.mxu0 %v1565_v0  ;;  %880 = vmatprep.subr.bf16.mxu1 %v1565_v0 }
  0x32   :  { %255 = vmatmul.mubr.bf16.gmra.mrb[4].mxu0 %v1479_v21  ;;  %465 = vmatmul.mubr.bf16.gmra.mrb[4].mxu1 %v1480_v22  ;;  %v1539_v21 = vld [vmem:[%s2261_s0 + $0x130] ss:$8 sps:$4 sm:$0xff]  }
  0x33   :  { %655 = vmatpush1.bf16.msra.mxu0 %v1615_v3  ;;  %1256 = vmatprep.mubr.msk.bf16.mxu0 %vm182_vm0, %v1481_v23  ;;  %v1540_v22 = vld [vmem:[%s2261_s0 + $0x1b0] ss:$8 sps:$4 sm:$0xff]   ;;  %v1541_v23 = vld [vmem:[%s2261_s0 + $0x144] ss:$8 sps:$4 sm:$0xff]  }
  0x34   :  { %1296 = vmatprep.mubr.msk.bf16.mxu1 %vm182_vm0, %v1483_v24  ;;  %881 = vmatpush1.bf16.msra.mxu1 %v1615_v3  ;;  %v1511_v3 = vld [vmem:[%s2261_s0 + $0x74] ss:$8 sps:$4 sm:$0xff]   ;;  %v1543_v24 = vld [vmem:[%s2261_s0 + $0x1c4] ss:$8 sps:$4 sm:$0xff]  }
  0x35   :  { %656 = vmatprep.subr.bf16.mxu0 %v1565_v0  ;;  %882 = vmatprep.subr.bf16.mxu1 %v1565_v0 }
  0x37   :  { %657 = vmatpush1.bf16.msra.mxu0 %v1624_v4 }
  0x38   :  { %883 = vmatpush1.bf16.msra.mxu1 %v1624_v4  ;;  %658 = vmatprep.subr.bf16.mxu0 %v1565_v0  ;;  %v1513_v4 = vld [vmem:[%s2261_s0 + $0xf4] ss:$8 sps:$4 sm:$0xff]  }
  0x39   :  { %884 = vmatprep.subr.bf16.mxu1 %v1565_v0 }
  0x3a   :  { %263 = vmatmul.mubr.bf16.gmra.mrb[8].mxu0 %v1485_v25  ;;  %473 = vmatmul.mubr.bf16.gmra.mrb[8].mxu1 %v1486_v26  ;;  %v1545_v25 = vld [vmem:[%s2261_s0 + $0x140] ss:$8 sps:$4 sm:$0xff]  }
  0x3b   :  { %1257 = vmatprep.mubr.msk.bf16.mxu0 %vm182_vm0, %v1487_v29  ;;  %1297 = vmatprep.mubr.msk.bf16.mxu1 %vm182_vm0, %v1489_v30  ;;  %v1546_v26 = vld [vmem:[%s2261_s0 + $0x1c0] ss:$8 sps:$4 sm:$0xff]   ;;  %v1551_v29 = vld [vmem:[%s2261_s0 + $0x150] ss:$8 sps:$4 sm:$0xff]  }
  0x3c   :  { %659 = vmatpush1.bf16.msra.mxu0 %v1640_v7  ;;  %885 = vmatpush1.bf16.msra.mxu1 %v1640_v7  ;;  %v1519_v7 = vld [vmem:[%s2261_s0 + $0x104] ss:$8 sps:$4 sm:$0xff]   ;;  %v1552_v30 = vld [vmem:[%s2261_s0 + $0x1d0] ss:$8 sps:$4 sm:$0xff]  }
  0x3d   :  { %660 = vmatprep.subr.bf16.mxu0 %v1565_v0  ;;  %886 = vmatprep.subr.bf16.mxu1 %v1565_v0 }
  0x40   :  { %661 = vmatpush1.bf16.msra.mxu0 %v1650_v8  ;;  %887 = vmatpush1.bf16.msra.mxu1 %v1650_v8  ;;  %v1522_v8 = vld [vmem:[%s2261_s0 + $0x184] ss:$8 sps:$4 sm:$0xff]  }
  0x41   :  { %662 = vmatprep.subr.bf16.mxu0 %v1565_v0  ;;  %888 = vmatprep.subr.bf16.mxu1 %v1565_v0 }
  0x42   :  { %271 = vmatmul.mubr.bf16.gmra.mrb[12].mxu0 %v1491_v38  ;;  %481 = vmatmul.mubr.bf16.gmra.mrb[12].mxu1 %v1492_v39  ;;  %v1564_v38 = vld [vmem:[%s2261_s0 + $0x1f0] ss:$8 sps:$4 sm:$0xff]  }
  0x43   :  { %1258 = vmatprep.mubr.msk.bf16.mxu0 %vm182_vm0, %v1493_v40  ;;  %1298 = vmatprep.mubr.msk.bf16.mxu1 %vm182_vm0, %v1495_v41 }
  0x44   :  { %663 = vmatpush1.bf16.msra.mxu0 %v1659_v9  ;;  %889 = vmatpush1.bf16.msra.mxu1 %v1659_v9  ;;  %v1517_v9 = vld [vmem:[%s2261_s0 + $0x100] ss:$8 sps:$4 sm:$0xff]  }
  0x45   :  { %664 = vmatprep.subr.bf16.mxu0 %v1565_v0  ;;  %890 = vmatprep.subr.bf16.mxu1 %v1565_v0 }
  0x48   :  { %665 = vmatpush1.bf16.msra.mxu0 %v1668_v10  ;;  %891 = vmatpush1.bf16.msra.mxu1 %v1668_v10  ;;  %v1520_v10 = vld [vmem:[%s2261_s0 + $0x180] ss:$8 sps:$4 sm:$0xff]  }
  0x49   :  { %666 = vmatprep.subr.bf16.mxu0 %v1565_v0  ;;  %892 = vmatprep.subr.bf16.mxu1 %v1565_v0 }
  0x4a   :  { %279 = vmatmul.mubr.bf16.gmra.mrb[16].mxu0 %v1497_v48  ;;  %489 = vmatmul.mubr.bf16.gmra.mrb[16].mxu1 %v1498_v49 }
  0x4b   :  { %1259 = vmatprep.mubr.msk.bf16.mxu0 %vm182_vm0, %v1499_v50  ;;  %1299 = vmatprep.mubr.msk.bf16.mxu1 %vm182_vm0, %v1501_v51 }
  0x4c   :  { %667 = vmatpush1.bf16.msra.mxu0 %v1677_v13  ;;  %893 = vmatpush1.bf16.msra.mxu1 %v1677_v13  ;;  %v1527_v13 = vld [vmem:[%s2261_s0 + $0x110] ss:$8 sps:$4 sm:$0xff]  }
  0x4d   :  { %668 = vmatprep.subr.bf16.mxu0 %v1565_v0  ;;  %894 = vmatprep.subr.bf16.mxu1 %v1565_v0  ;;  %v1454_v0 = vpack.i.bf16 %v1046_v59, %v1045_v58 }
  0x4f   :  { %1455 = vperm.xlu1 %1428, %v1454_v0  }
  0x50   :  { %669 = vmatpush1.bf16.msra.mxu0 %v1686_v16  ;;  %895 = vmatpush1.bf16.msra.mxu1 %v1686_v16  ;;  %v1531_v16 = vld [vmem:[%s2261_s0 + $0x1a4] ss:$8 sps:$4 sm:$0xff]  }
  0x52   :  { %287 = vmatmul.mubr.bf16.gmra.mrb[20].mxu0 %v1503_v60  ;;  %497 = vmatmul.mubr.bf16.gmra.mrb[20].mxu1 %v1504_v61 }
  0x53   :  { %1260 = vmatprep.mubr.msk.bf16.mxu0 %vm182_vm0, %v1505_v62  ;;  %1300 = vmatprep.mubr.msk.bf16.mxu1 %vm182_vm0, %v1507_v63 }
  0x5a   :  { %295 = vmatmul.mubr.bf16.gmra.mrb[24].mxu0 %v1509_v1  ;;  %505 = vmatmul.mubr.bf16.gmra.mrb[24].mxu1 %v1510_v2 }
  0x5b   :  { %1261 = vmatprep.mubr.msk.bf16.mxu0 %vm182_vm0, %v1511_v3  ;;  %1301 = vmatprep.mubr.msk.bf16.mxu1 %vm182_vm0, %v1513_v4 }
  0x62   :  { %303 = vmatmul.mubr.bf16.gmra.mrb[28].mxu0 %v1515_v5  ;;  %513 = vmatmul.mubr.bf16.gmra.mrb[28].mxu1 %v1516_v6 }
  0x63   :  { %1334 = vmatprep.mubr.msk.bf16.mxu0 %vm182_vm0, %v1519_v7  ;;  %1374 = vmatprep.mubr.msk.bf16.mxu1 %vm182_vm0, %v1522_v8 }
  0x6a   :  { %683 = vmatmul.mubr.bf16.vlgmr.msra.gmra.mrb[32].mxu0 %v1517_v9  ;;  %909 = vmatmul.mubr.bf16.vlgmr.msra.gmra.mrb[32].mxu1 %v1520_v10 }
  0x6b   :  { %1335 = vmatprep.mubr.msk.bf16.mxu0 %vm182_vm0, %v1523_v11  ;;  %1375 = vmatprep.mubr.msk.bf16.mxu1 %vm182_vm0, %v1525_v12 }
  0x72   :  { %691 = vmatmul.mubr.bf16.gmra.mrb[36].mxu0 %v1527_v13  ;;  %917 = vmatmul.mubr.bf16.gmra.mrb[36].mxu1 %v1528_v14 }
  0x73   :  { %1336 = vmatprep.mubr.msk.bf16.mxu0 %vm182_vm0, %v1529_v15  ;;  %1376 = vmatprep.mubr.msk.bf16.mxu1 %vm182_vm0, %v1531_v16 }
  0x7a   :  { %699 = vmatmul.mubr.bf16.gmra.mrb[40].mxu0 %v1533_v17  ;;  %925 = vmatmul.mubr.bf16.gmra.mrb[40].mxu1 %v1534_v18 }
  0x7b   :  { %1337 = vmatprep.mubr.msk.bf16.mxu0 %vm182_vm0, %v1535_v19  ;;  %1377 = vmatprep.mubr.msk.bf16.mxu1 %vm182_vm0, %v1537_v20 }
  0x82   :  { %707 = vmatmul.mubr.bf16.gmra.mrb[44].mxu0 %v1539_v21  ;;  %933 = vmatmul.mubr.bf16.gmra.mrb[44].mxu1 %v1540_v22 }
  0x83   :  { %1338 = vmatprep.mubr.msk.bf16.mxu0 %vm182_vm0, %v1541_v23  ;;  %1378 = vmatprep.mubr.msk.bf16.mxu1 %vm182_vm0, %v1543_v24 }
  0x8a   :  { %715 = vmatmul.mubr.bf16.gmra.mrb[48].mxu0 %v1545_v25  ;;  %941 = vmatmul.mubr.bf16.gmra.mrb[48].mxu1 %v1546_v26 }
  0x8b   :  { %1339 = vmatprep.mubr.msk.bf16.mxu0 %vm182_vm0, %v1547_v27  ;;  %1379 = vmatprep.mubr.msk.bf16.mxu1 %vm182_vm0, %v1549_v28 }
  0x92   :  { %723 = vmatmul.mubr.bf16.gmra.mrb[52].mxu0 %v1551_v29  ;;  %949 = vmatmul.mubr.bf16.gmra.mrb[52].mxu1 %v1552_v30 }
  0x93   :  { %1340 = vmatprep.mubr.msk.bf16.mxu0 %vm182_vm0, %v1553_v31  ;;  %1380 = vmatprep.mubr.msk.bf16.mxu1 %vm182_vm0, %v1555_v32 }
  0x9a   :  { %731 = vmatmul.mubr.bf16.gmra.mrb[56].mxu0 %v1557_v33  ;;  %957 = vmatmul.mubr.bf16.gmra.mrb[56].mxu1 %v1558_v34 }
  0x9b   :  { %1341 = vmatprep.mubr.msk.bf16.mxu0 %vm182_vm0, %v1559_v35  ;;  %1381 = vmatprep.mubr.msk.bf16.mxu1 %vm182_vm0, %v1561_v36 }
  0xa2   :  { %739 = vmatmul.mubr.bf16.gmra.mrb[60].mxu0 %v1563_v37  ;;  %965 = vmatmul.mubr.bf16.gmra.mrb[60].mxu1 %v1564_v38 }
  0xfd   :  { %v1996_v39 = vpop.f32.mrb[0].mxu0  ;;  %v1998_v40 = vpop.f32.mrb[0].mxu1 }
  0xfe   :  { %v521_v41 = vmax.f32 %v1996_v39, %v1998_v40  ;;  %v250_v42 = vpop.f32.mrb[1].mxu0  ;;  %v460_v43 = vpop.f32.mrb[1].mxu1 }
  0xff   :  { %v2002_v44 = vpop.f32.mrb[2].mxu0  ;;  %v2004_v45 = vpop.f32.mrb[2].mxu1 }
 0x100   :  { %v522_v46 = vmax.f32 %v2002_v44, %v2004_v45  ;;  %v253_v47 = vpop.f32.mrb[3].mxu0  ;;  %v463_v48 = vpop.f32.mrb[3].mxu1 }
 0x105   :  { %v2008_v49 = vpop.f32.mrb[4].mxu0  ;;  %v2010_v50 = vpop.f32.mrb[4].mxu1 }
 0x106   :  { %v523_v51 = vmax.f32 %v2008_v49, %v2010_v50  ;;  %v258_v52 = vpop.f32.mrb[5].mxu0  ;;  %v468_v53 = vpop.f32.mrb[5].mxu1 }
 0x107   :  { %v2014_v54 = vpop.f32.mrb[6].mxu0  ;;  %v2016_v55 = vpop.f32.mrb[6].mxu1 }
 0x108   :  { %v524_v56 = vmax.f32 %v2014_v54, %v2016_v55  ;;  %v261_v57 = vpop.f32.mrb[7].mxu0  ;;  %v471_v58 = vpop.f32.mrb[7].mxu1 }
 0x10d   :  { %v2020_v59 = vpop.f32.mrb[8].mxu0  ;;  %v2022_v60 = vpop.f32.mrb[8].mxu1 }
 0x10e   :  { %v525_v61 = vmax.f32 %v2020_v59, %v2022_v60  ;;  %v266_v62 = vpop.f32.mrb[9].mxu0  ;;  %v476_v63 = vpop.f32.mrb[9].mxu1 }
 0x10f   :  { %v2026_v0 = vpop.f32.mrb[10].mxu0  ;;  %v2028_v1 = vpop.f32.mrb[10].mxu1 }
 0x110   :  { %v526_v2 = vmax.f32 %v2026_v0, %v2028_v1  ;;  %v269_v3 = vpop.f32.mrb[11].mxu0  ;;  %v479_v4 = vpop.f32.mrb[11].mxu1 }
 0x115   :  { %v2032_v5 = vpop.f32.mrb[12].mxu0  ;;  %v2034_v6 = vpop.f32.mrb[12].mxu1 }
 0x116   :  { %v527_v7 = vmax.f32 %v2032_v5, %v2034_v6  ;;  %v274_v8 = vpop.f32.mrb[13].mxu0  ;;  %v484_v9 = vpop.f32.mrb[13].mxu1 }
 0x117   :  { %v2038_v10 = vpop.f32.mrb[14].mxu0  ;;  %v2040_v11 = vpop.f32.mrb[14].mxu1 }
 0x118   :  { %v528_v12 = vmax.f32 %v2038_v10, %v2040_v11  ;;  %v277_v13 = vpop.f32.mrb[15].mxu0  ;;  %v487_v14 = vpop.f32.mrb[15].mxu1 }
 0x11d   :  { %v2044_v15 = vpop.f32.mrb[16].mxu0  ;;  %v2046_v16 = vpop.f32.mrb[16].mxu1 }
 0x11e   :  { %v529_v17 = vmax.f32 %v2044_v15, %v2046_v16  ;;  %v282_v18 = vpop.f32.mrb[17].mxu0  ;;  %v492_v19 = vpop.f32.mrb[17].mxu1 }
 0x11f   :  { %v2050_v20 = vpop.f32.mrb[18].mxu0  ;;  %v2052_v21 = vpop.f32.mrb[18].mxu1  ;;  %v1028_v18 = vlaneseq }
 0x120   :  { %v530_v22 = vmax.f32 %v2050_v20, %v2052_v21  ;;  %v285_v23 = vpop.f32.mrb[19].mxu0  ;;  %v495_v24 = vpop.f32.mrb[19].mxu1 }
 0x121   :  { %v1420_v19 = vpop.permute.xlu0 %1419 }
 0x125   :  { %v2056_v25 = vpop.f32.mrb[20].mxu0  ;;  %v2058_v26 = vpop.f32.mrb[20].mxu1 }
 0x126   :  { %v531_v27 = vmax.f32 %v2056_v25, %v2058_v26  ;;  %v290_v28 = vpop.f32.mrb[21].mxu0  ;;  %v500_v29 = vpop.f32.mrb[21].mxu1 }
 0x127   :  { %v2062_v30 = vpop.f32.mrb[22].mxu0  ;;  %v2064_v31 = vpop.f32.mrb[22].mxu1 }
 0x128   :  { %v532_v32 = vmax.f32 %v2062_v30, %v2064_v31  ;;  %v293_v33 = vpop.f32.mrb[23].mxu0  ;;  %v503_v34 = vpop.f32.mrb[23].mxu1 }
 0x129   :  { %v2098_v34 = vld [vmem:[%s2263_s3] ss:$0 sm:$0xff] }
 0x12d   :  { %v2068_v35 = vpop.f32.mrb[24].mxu0  ;;  %v2070_v36 = vpop.f32.mrb[24].mxu1 }
 0x12e   :  { %v533_v37 = vmax.f32 %v2068_v35, %v2070_v36  ;;  %v298_v38 = vpop.f32.mrb[25].mxu0  ;;  %v508_v42 = vpop.f32.mrb[25].mxu1 }
 0x12f   :  { %v2074_v43 = vpop.f32.mrb[26].mxu0  ;;  %v2076_v47 = vpop.f32.mrb[26].mxu1 }
 0x130   :  { %v534_v48 = vmax.f32 %v2074_v43, %v2076_v47  ;;  %v301_v52 = vpop.f32.mrb[27].mxu0  ;;  %v511_v53 = vpop.f32.mrb[27].mxu1 }
 0x131   :  { %v2100_v52 = vand.u32 127, %v1028_v18 }
 0x133   :  { %vm1030_vm3 = vcmp.eq.s32.totalorder %v2100_v52, 63 }
 0x135   :  { %v2080_v57 = vpop.f32.mrb[28].mxu0  ;;  %v2082_v58 = vpop.f32.mrb[28].mxu1 }
 0x136   :  { %v535_v62 = vmax.f32 %v2080_v57, %v2082_v58  ;;  %v306_v63 = vpop.f32.mrb[29].mxu0  ;;  %v516_v3 = vpop.f32.mrb[29].mxu1 }
 0x137   :  { %v2086_v4 = vpop.f32.mrb[30].mxu0  ;;  %v2088_v8 = vpop.f32.mrb[30].mxu1 }
 0x138   :  { %v309_v13 = vpop.f32.mrb[31].mxu0  ;;  %v519_v14 = vpop.f32.mrb[31].mxu1 }
 0x13d   :  { %v684_v23 = vpop.f32.mrb[32].mxu0  ;;  %v910_v24 = vpop.f32.mrb[32].mxu1 }
 0x13e   :  { %v747_v28 = vmax.f32 %v521_v41, %v684_v23  ;;  %v686_v29 = vpop.f32.mrb[33].mxu0  ;;  %v912_v33 = vpop.f32.mrb[33].mxu1  ;;  %v1421_v41 = vunpack.i.l.bf16 %v1420_v19 }
 0x13f   :  { %v687_v38 = vpop.f32.mrb[34].mxu0  ;;  %v913_v42 = vpop.f32.mrb[34].mxu1  ;;  %v1422_v29 = vunpack.i.h.bf16 %v1420_v19 }
 0x140   :  { %v973_v53 = vmax.f32 %v747_v28, %v910_v24  ;;  %v748_v63 = vmax.f32 %v522_v46, %v687_v38  ;;  %v689_v3 = vpop.f32.mrb[35].mxu0  ;;  %v915_v13 = vpop.f32.mrb[35].mxu1 }
 0x141   :  { %v1425_v33 = vpop.permute.xlu0 %1424 }
 0x142   :  { %v996_v39 = vadd.f32 %v2098_v34, %v973_v53  ;;  %v974_v40 = vmax.f32 %v748_v63, %v913_v42  ;;  %v1427_v55 = vunpack.i.h.bf16 %v1425_v33 }
 0x144   :  { %v1012_v14 = vmax.f32 %v996_v39, 0.0  ;;  %v997_v23 = vadd.f32 %v2098_v34, %v974_v40 }
 0x145   :  { %v692_v18 = vpop.f32.mrb[36].mxu0  ;;  %v918_v9 = vpop.f32.mrb[36].mxu1 }
 0x146   :  { %v1013_v24 = vmax.f32 %v997_v23, 0.0  ;;  %v1127_v44 = vsel %vm1030_vm3, %v1421_v41, %v1012_v14  ;;  %v749_v45 = vmax.f32 %v523_v51, %v692_v18  ;;  %v694_v46 = vpop.f32.mrb[37].mxu0  ;;  %v920_v28 = vpop.f32.mrb[37].mxu1  ;;  %v1426_v51 = vunpack.i.l.bf16 %v1425_v33 }
 0x147   :  { %v1399_v38 = vpack.c.bf16 %v1127_v44, %v1127_v44  ;;  %v695_v42 = vpop.f32.mrb[38].mxu0  ;;  %v921_v53 = vpop.f32.mrb[38].mxu1 }
 0x148   :  { %v1128_v19 = vsel %vm1030_vm3, %v1422_v29, %v1013_v24  ;;  %v975_v63 = vmax.f32 %v749_v45, %v918_v9  ;;  %v750_v3 = vmax.f32 %v524_v56, %v695_v42  ;;  %v697_v13 = vpop.f32.mrb[39].mxu0  ;;  %v923_v39 = vpop.f32.mrb[39].mxu1 }
 0x149   :  { %v1400_v40 = vpack.c.bf16 %v1128_v19, %v1128_v19  ;;  %1208 = vst.msk [vmem:[%s2264_s4] sm:$0xf] %vm1207_vm4, %v1399_v38  ;;  %v1431_v56 = vpop.permute.xlu1 %1430 }
 0x14a   :  { %v998_v49 = vadd.f32 %v2098_v34, %v975_v63  ;;  %v976_v50 = vmax.f32 %v750_v3, %v921_v53  ;;  %v1433_v1 = vunpack.i.h.bf16 %v1431_v56 }
 0x14b   :  { %1209 = vst.msk [vmem:[%s2264_s4 + $0x4] sm:$0xf] %vm1207_vm4, %v1400_v40 }
 0x14c   :  { %v1014_v9 = vmax.f32 %v998_v49, 0.0  ;;  %v999_v54 = vadd.f32 %v2098_v34, %v976_v50 }
 0x14d   :  { %v700_v41 = vpop.f32.mrb[40].mxu0  ;;  %v926_v14 = vpop.f32.mrb[40].mxu1 }
 0x14e   :  { %v1015_v23 = vmax.f32 %v999_v54, 0.0  ;;  %v1129_v29 = vsel %vm1030_vm3, %v1426_v51, %v1014_v9  ;;  %v751_v18 = vmax.f32 %v525_v61, %v700_v41  ;;  %v702_v24 = vpop.f32.mrb[41].mxu0  ;;  %v928_v44 = vpop.f32.mrb[41].mxu1  ;;  %v1432_v61 = vunpack.i.l.bf16 %v1431_v56 }
 0x14f   :  { %v1401_v45 = vpack.c.bf16 %v1129_v29, %v1129_v29  ;;  %v703_v46 = vpop.f32.mrb[42].mxu0  ;;  %v929_v28 = vpop.f32.mrb[42].mxu1 }
 0x150   :  { %v1130_v38 = vsel %vm1030_vm3, %v1427_v55, %v1015_v23  ;;  %v977_v33 = vmax.f32 %v751_v18, %v926_v14  ;;  %v752_v42 = vmax.f32 %v526_v2, %v703_v46  ;;  %v705_v53 = vpop.f32.mrb[43].mxu0  ;;  %v931_v19 = vpop.f32.mrb[43].mxu1 }
 0x151   :  { %v1402_v63 = vpack.c.bf16 %v1130_v38, %v1130_v38  ;;  %1210 = vst.msk [vmem:[%s2264_s4 + $0x8] sm:$0xf] %vm1207_vm4, %v1401_v45  ;;  %v1436_v2 = vpop.permute.xlu1 %1435 }
 0x152   :  { %v1000_v59 = vadd.f32 %v2098_v34, %v977_v33  ;;  %v978_v60 = vmax.f32 %v752_v42, %v929_v28  ;;  %v1438_v11 = vunpack.i.h.bf16 %v1436_v2 }
 0x153   :  { %1211 = vst.msk [vmem:[%s2264_s4 + $0xc] sm:$0xf] %vm1207_vm4, %v1402_v63 }
 0x154   :  { %v1016_v3 = vmax.f32 %v1000_v59, 0.0  ;;  %v1001_v0 = vadd.f32 %v2098_v34, %v978_v60 }
 0x155   :  { %v708_v13 = vpop.f32.mrb[44].mxu0  ;;  %v934_v39 = vpop.f32.mrb[44].mxu1 }
 0x156   :  { %v1017_v40 = vmax.f32 %v1001_v0, 0.0  ;;  %v1131_v49 = vsel %vm1030_vm3, %v1432_v61, %v1016_v3  ;;  %v753_v50 = vmax.f32 %v527_v7, %v708_v13  ;;  %v710_v51 = vpop.f32.mrb[45].mxu0  ;;  %v936_v9 = vpop.f32.mrb[45].mxu1  ;;  %v1437_v7 = vunpack.i.l.bf16 %v1436_v2 }
 0x157   :  { %v1403_v54 = vpack.c.bf16 %v1131_v49, %v1131_v49  ;;  %v711_v55 = vpop.f32.mrb[46].mxu0  ;;  %v937_v41 = vpop.f32.mrb[46].mxu1 }
 0x158   :  { %v1132_v14 = vsel %vm1030_vm3, %v1433_v1, %v1017_v40  ;;  %v979_v56 = vmax.f32 %v753_v50, %v934_v39  ;;  %v754_v23 = vmax.f32 %v528_v12, %v711_v55  ;;  %v713_v29 = vpop.f32.mrb[47].mxu0  ;;  %v939_v18 = vpop.f32.mrb[47].mxu1 }
 0x159   :  { %v1404_v24 = vpack.c.bf16 %v1132_v14, %v1132_v14  ;;  %1212 = vst.msk [vmem:[%s2264_s4 + $0x10] sm:$0xf] %vm1207_vm4, %v1403_v54  ;;  %v1441_v12 = vpop.permute.xlu0 %1440 }
 0x15a   :  { %v1002_v5 = vadd.f32 %v2098_v34, %v979_v56  ;;  %v980_v6 = vmax.f32 %v754_v23, %v937_v41  ;;  %v1443_v21 = vunpack.i.h.bf16 %v1441_v12 }
 0x15b   :  { %1213 = vst.msk [vmem:[%s2264_s4 + $0x14] sm:$0xf] %vm1207_vm4, %v1404_v24 }
 0x15c   :  { %v1018_v44 = vmax.f32 %v1002_v5, 0.0  ;;  %v1003_v10 = vadd.f32 %v2098_v34, %v980_v6 }
 0x15d   :  { %v716_v45 = vpop.f32.mrb[48].mxu0  ;;  %v942_v46 = vpop.f32.mrb[48].mxu1 }
 0x15e   :  { %v1019_v28 = vmax.f32 %v1003_v10, 0.0  ;;  %v1133_v38 = vsel %vm1030_vm3, %v1437_v7, %v1018_v44  ;;  %v755_v33 = vmax.f32 %v529_v17, %v716_v45  ;;  %v718_v42 = vpop.f32.mrb[49].mxu0  ;;  %v944_v53 = vpop.f32.mrb[49].mxu1  ;;  %v1442_v17 = vunpack.i.l.bf16 %v1441_v12 }
 0x15f   :  { %v1405_v19 = vpack.c.bf16 %v1133_v38, %v1133_v38  ;;  %v719_v63 = vpop.f32.mrb[50].mxu0  ;;  %v945_v59 = vpop.f32.mrb[50].mxu1 }
 0x160   :  { %v1134_v60 = vsel %vm1030_vm3, %v1438_v11, %v1019_v28  ;;  %v981_v61 = vmax.f32 %v755_v33, %v942_v46  ;;  %v756_v3 = vmax.f32 %v530_v22, %v719_v63  ;;  %v721_v0 = vpop.f32.mrb[51].mxu0  ;;  %v947_v1 = vpop.f32.mrb[51].mxu1 }
 0x161   :  { %v1406_v2 = vpack.c.bf16 %v1134_v60, %v1134_v60  ;;  %1214 = vst.msk [vmem:[%s2264_s4 + $0x18] sm:$0xf] %vm1207_vm4, %v1405_v19  ;;  %v1446_v22 = vpop.permute.xlu1 %1445  ;;  %v1451_v35 = vpop.permute.xlu0 %1450 }
 0x162   :  { %v1004_v15 = vadd.f32 %v2098_v34, %v981_v61  ;;  %v982_v16 = vmax.f32 %v756_v3, %v945_v59  ;;  %v1448_v31 = vunpack.i.h.bf16 %v1446_v22  ;;  %v1452_v47 = vunpack.i.l.bf16 %v1451_v35 }
 0x163   :  { %1215 = vst.msk [vmem:[%s2264_s4 + $0x1c] sm:$0xf] %vm1207_vm4, %v1406_v2  ;;  %v1453_v0 = vunpack.i.h.bf16 %v1451_v35 }
 0x164   :  { %v1020_v13 = vmax.f32 %v1004_v15, 0.0  ;;  %v1005_v20 = vadd.f32 %v2098_v34, %v982_v16 }
 0x165   :  { %v724_v39 = vpop.f32.mrb[52].mxu0  ;;  %v950_v40 = vpop.f32.mrb[52].mxu1 }
 0x166   :  { %v1021_v49 = vmax.f32 %v1005_v20, 0.0  ;;  %v1135_v50 = vsel %vm1030_vm3, %v1442_v17, %v1020_v13  ;;  %v757_v51 = vmax.f32 %v531_v27, %v724_v39  ;;  %v726_v9 = vpop.f32.mrb[53].mxu0  ;;  %v952_v54 = vpop.f32.mrb[53].mxu1  ;;  %v1447_v27 = vunpack.i.l.bf16 %v1446_v22 }
 0x167   :  { %v1407_v55 = vpack.c.bf16 %v1135_v50, %v1135_v50  ;;  %v727_v41 = vpop.f32.mrb[54].mxu0  ;;  %v953_v14 = vpop.f32.mrb[54].mxu1  ;;  %v2265_v39 = vmax.f32 %v2086_v4, %v2088_v8 }
 0x168   :  { %v1136_v56 = vsel %vm1030_vm3, %v1443_v21, %v1021_v49  ;;  %v983_v23 = vmax.f32 %v757_v51, %v950_v40  ;;  %v758_v29 = vmax.f32 %v532_v32, %v727_v41  ;;  %v729_v18 = vpop.f32.mrb[55].mxu0  ;;  %v955_v24 = vpop.f32.mrb[55].mxu1 }
 0x169   :  { %v1408_v5 = vpack.c.bf16 %v1136_v56, %v1136_v56  ;;  %1216 = vst.msk [vmem:[%s2264_s4 + $0x20] sm:$0xf] %vm1207_vm4, %v1407_v55  ;;  %v1456_v51 = vpop.permute.xlu1 %1455 }
 0x16a   :  { %v1006_v25 = vadd.f32 %v2098_v34, %v983_v23  ;;  %v984_v26 = vmax.f32 %v758_v29, %v953_v14  ;;  %v1458_v54 = vunpack.i.h.bf16 %v1456_v51 }
 0x16b   :  { %1217 = vst.msk [vmem:[%s2264_s4 + $0x24] sm:$0xf] %vm1207_vm4, %v1408_v5 }
 0x16c   :  { %v1022_v6 = vmax.f32 %v1006_v25, 0.0  ;;  %v1007_v30 = vadd.f32 %v2098_v34, %v984_v26 }
 0x16d   :  { %v732_v32 = vpop.f32.mrb[56].mxu0  ;;  %v958_v7 = vpop.f32.mrb[56].mxu1 }
 0x16e   :  { %v1023_v44 = vmax.f32 %v1007_v30, 0.0  ;;  %v1137_v10 = vsel %vm1030_vm3, %v1447_v27, %v1022_v6  ;;  %v759_v11 = vmax.f32 %v533_v37, %v732_v32  ;;  %v734_v12 = vpop.f32.mrb[57].mxu0  ;;  %v960_v45 = vpop.f32.mrb[57].mxu1 }
 0x16f   :  { %v1409_v46 = vpack.c.bf16 %v1137_v10, %v1137_v10  ;;  %v735_v28 = vpop.f32.mrb[58].mxu0  ;;  %v961_v38 = vpop.f32.mrb[58].mxu1 }
 0x170   :  { %v1138_v33 = vsel %vm1030_vm3, %v1448_v31, %v1023_v44  ;;  %v985_v42 = vmax.f32 %v759_v11, %v958_v7  ;;  %v760_v53 = vmax.f32 %v534_v48, %v735_v28  ;;  %v737_v19 = vpop.f32.mrb[59].mxu0  ;;  %v963_v63 = vpop.f32.mrb[59].mxu1 }
 0x171   :  { %v1410_v59 = vpack.c.bf16 %v1138_v33, %v1138_v33  ;;  %1218 = vst.msk [vmem:[%s2264_s4 + $0x28] sm:$0xf] %vm1207_vm4, %v1409_v46 }
 0x172   :  { %v1008_v36 = vadd.f32 %v2098_v34, %v985_v42  ;;  %v986_v37 = vmax.f32 %v760_v53, %v961_v38 }
 0x173   :  { %1219 = vst.msk [vmem:[%s2264_s4 + $0x2c] sm:$0xf] %vm1207_vm4, %v1410_v59 }
 0x174   :  { %v1024_v60 = vmax.f32 %v1008_v36, 0.0  ;;  %v1009_v43 = vadd.f32 %v2098_v34, %v986_v37 }
 0x175   :  { %v740_v48 = vpop.f32.mrb[60].mxu0  ;;  %v966_v61 = vpop.f32.mrb[60].mxu1 }
 0x176   :  { %v1025_v3 = vmax.f32 %v1009_v43, 0.0  ;;  %v1139_v1 = vsel %vm1030_vm3, %v1452_v47, %v1024_v60  ;;  %v761_v2 = vmax.f32 %v535_v62, %v740_v48  ;;  %v742_v15 = vpop.f32.mrb[61].mxu0  ;;  %v968_v16 = vpop.f32.mrb[61].mxu1  ;;  %v1457_v62 = vunpack.i.l.bf16 %v1456_v51 }
 0x177   :  { %v1411_v17 = vpack.c.bf16 %v1139_v1, %v1139_v1  ;;  %v743_v13 = vpop.f32.mrb[62].mxu0  ;;  %v969_v20 = vpop.f32.mrb[62].mxu1 }
 0x178   :  { %v1140_v21 = vsel %vm1030_vm3, %v1453_v0, %v1025_v3  ;;  %v987_v22 = vmax.f32 %v761_v2, %v966_v61  ;;  %v762_v40 = vmax.f32 %v2265_v39, %v743_v13  ;;  %v745_v49 = vpop.f32.mrb[63].mxu0  ;;  %v971_v50 = vpop.f32.mrb[63].mxu1 }
 0x179   :  { %v1412_v9 = vpack.c.bf16 %v1140_v21, %v1140_v21  ;;  %1220 = vst.msk [vmem:[%s2264_s4 + $0x30] sm:$0xf] %vm1207_vm4, %v1411_v17 }
 0x17a   :  { %v1010_v57 = vadd.f32 %v2098_v34, %v987_v22  ;;  %v988_v58 = vmax.f32 %v762_v40, %v969_v20 }
 0x17b   :  { %1221 = vst.msk [vmem:[%s2264_s4 + $0x34] sm:$0xf] %vm1207_vm4, %v1412_v9 }
 0x17c   :  { %v1026_v4 = vmax.f32 %v1010_v57, 0.0  ;;  %v1011_v8 = vadd.f32 %v2098_v34, %v988_v58 }
 0x17e   :  { %v1141_v55 = vsel %vm1030_vm3, %v1457_v62, %v1026_v4  ;;  %v1027_v41 = vmax.f32 %v1011_v8, 0.0 }
 0x17f   :  { %v1413_v14 = vpack.c.bf16 %v1141_v55, %v1141_v55 }
 0x180   :  { %v1142_v56 = vsel %vm1030_vm3, %v1458_v54, %v1027_v41 }
 0x181   :  { %1222 = vst.msk [vmem:[%s2264_s4 + $0x38] sm:$0xf] %vm1207_vm4, %v1413_v14  ;;  %v1414_v23 = vpack.c.bf16 %v1142_v56, %v1142_v56 }
 0x183   :  { %1223 = vst.msk [vmem:[%s2264_s4 + $0x3c] sm:$0xf] %vm1207_vm4, %v1414_v23 }

// kernel: fine_net_forward.3
= control target key start
LH: loop header
LB: loop body
LE: loop exit
PB: predicated region body
PF: predicated region fallthrough
CT: control target
= control target key end

     0   :  { %s5496_s20 = smov 0   ;;  %s7599_s0 = inlined_call_operand.vmem [shape: bf16[2,208,64], index: 0, kind: input, shape index: {}]   ;;  %s7600_s1 = inlined_call_operand.vmem [shape: bf16[5,320,64], index: 1, kind: input, shape index: {}]   ;;  %s7601_s2 = inlined_call_operand.vmem [shape: f32[1,64], index: 2, kind: input, shape index: {}]   ;;  %s7602_s3 = inlined_call_operand.vmem [shape: f32[25,64], index: 3, kind: input, shape index: {}]   ;;  %s7603_s4 = inlined_call_operand.<no memory space> [shape: f32[1,1], index: 4, kind: input, shape index: {}]   ;;  %s7604_s5 = inlined_call_operand.vmem [shape: f32[2,128,1], index: 5, kind: output, shape index: {}]  }
   0x1   :  { %v10_v0 = vstv %s7603_s4 }
   0x2   :  { %11 = vst [vmem:[#allocation4] sm:$0x1] %v10_v0 }
   0x3 LB: > { %s4645_s21 = sadd.s32 4294967295, %s5459_s20   ;;  %p4649_p0 = scmp.ge.s32.totalorder %s5459_s20, 1  ;;  %s5459_s20 = sphi %s5496_s20, %s17_s20  }
   0x4   : > { %p189_p1 = scmp.lt.s32.totalorder %s5459_s20, 3 }
   0x6   : > { %p190_p2 = pnand %p4649_p0, %p189_p1 }
   0x8   : > { %193 = sbr.rel (%p190_p2) target bundleno = 929 (0x3a1), region = 40 }
   0xf   : > { %p217_p3 = scmp.lt.s32.totalorder %s4645_s21, 1  ;;  %v5337_v1 = vld [vmem:[%s7600_s1 + $0x120] sm:$0xff]   ;;  %v5338_v2 = vld [vmem:[%s7600_s1 + $0x128] sm:$0xff]   ;;  %vm476_vm0 = vsmask.f32 6400  ;;  %vm565_vm1 = vcmask 1045504  }
  0x10   : > { %5195 = vmatprep.subr.bf16.mxu1 %v5337_v1  ;;  %v5339_v3 = vld [vmem:[%s7600_s1 + $0x130] sm:$0xff]   ;;  %vm603_vm2 = vcmask 523264   ;;  %v5341_v4 = vld [vmem:[%s7600_s1 + $0xe0] sm:$0xff]   ;;  %vm319_vm3 = vsmask.f32 7424  ;;  %v5340_v7 = vld [vmem:[%s7600_s1 + $0x138] sm:$0xff]  }
  0x11   : > { %s7835_s21 = smov (!%p217_p3, %s4645_s21), 1  ;;  %5196 = vmatpush3.bf16.msra.mxu1 %v5337_v1  ;;  %4815 = vmatprep.subr.bf16.mxu0 %v5341_v4  ;;  %s5461_s10 = smov 64   ;;  %v5342_v58 = vld [vmem:[%s7600_s1 + $0xa0] sm:$0xff]   ;;  %vm447_vm4 = vcmask 1046528   ;;  %vm4540_vm5 = vcmask 7168  }
  0x12   : > { %s5315_s25 = smul.u32 104, %s7835_s21  ;;  %5197 = vmatprep.subr.bf16.mxu1 %v5338_v2  ;;  %4816 = vmatpush3.bf16.msra.mxu0 %v5342_v58  ;;  %v5353_v58 = vld [vmem:[%s7600_s1 + $0xf8] sm:$0xff]  }
  0x14   : > { %s5519_s30 = scalar_lea.vmem %s7599_s0, %s5315_s25 }
  0x15   : > { %v5525_v5 = vld [vmem:[%s5519_s30 + $0x8] sm:$0xff]   ;;  %v5528_v6 = vld [vmem:[%s5519_s30 + $0x10] sm:$0xff]   ;;  %v229_v8 = vld [vmem:[%s5519_s30 + $0x4] sm:$0xf]  ;;  %5198 = vmatpush3.bf16.msra.mxu1 %v5338_v2 }
  0x16   : > { %v253_v9 = vld [vmem:[%s5519_s30] sm:$0xe]  ;;  %v328_v11 = vshll.u32 %v5525_v5, 16  ;;  %v332_v12 = vshrl.u32 %v5525_v5, 16  ;;  %v336_v13 = vshll.u32 %v5528_v6, 16  ;;  %v340_v14 = vshrl.u32 %v5528_v6, 16  ;;  %5199 = vmatprep.subr.bf16.mxu1 %v5339_v3 }
  0x17   : > { %v255_v10 = vld [vmem:[%s5519_s30] sm:$0xc]  ;;  %v569_v16 = vrot.slane %v5528_v6, 2  ;;  %v5542_v17 = vcombine.low %v253_v9, %v229_v8  ;;  %v567_v19 = vrot.slane %v5525_v5, 2  ;;  %v5546_v24 = vld [vmem:[%s5519_s30 + $0x18] sm:$0xff]   ;;  %v5565_v42 = vld [vmem:[%s5519_s30 + $0x28] sm:$0xff]  }
  0x18   : > { %v228_v15 = vld [vmem:[%s5519_s30] sm:$0xf]  ;;  %v4668_v18 = vcombine.low %v255_v10, %v229_v8  ;;  %v485_v20 = vrot.slane %v332_v12, 1  ;;  %v486_v21 = vrot.slane %v328_v11, 2  ;;  %v489_v22 = vrot.slane %v340_v14, 1  ;;  %v5574_v53 = vld [vmem:[%s5519_s30 + $0x30] sm:$0xff]  }
  0x19   : > { %v490_v23 = vrot.slane %v336_v13, 2  ;;  %v478_v25 = vshrl.u32 %v5542_v17, 16  ;;  %v481_v26 = vshll.u32 %v5542_v17, 16  ;;  %v570_v28 = vsel %vm565_vm1, %v567_v19, %v569_v16  ;;  %v5554_v29 = vld [vmem:[%s5519_s30 + $0x20] sm:$0xff]   ;;  %5200 = vmatpush3.bf16.msra.mxu1 %v5339_v3  ;;  %v5586_v1 = vld [vmem:[%s5519_s30 + $0x38] sm:$0xff]   ;;  %v5345_v10 = vld [vmem:[%s7600_s1 + $0xe8] sm:$0xff]  }
  0x1a   : > { %v566_v27 = vrot.slane %v4668_v18, 2  ;;  %v487_v30 = vor.u32 %v486_v21, %v485_v20  ;;  %693 = vst.msk [vmem:[#allocation2 + $0x28] sm:$0xff] %vm603_vm2, %v570_v28  ;;  %v330_v32 = vrot.slane %v328_v11, 1  ;;  %v338_v33 = vrot.slane %v336_v13, 1  ;;  %5201 = vmatprep.subr.bf16.mxu1 %v5340_v7  ;;  %v5343_v2 = vld [vmem:[%s7600_s1 + $0x40] sm:$0xff]   ;;  %4817 = vmatprep.subr.bf16.mxu0 %v5345_v10 }
  0x1b   : > { %v491_v31 = vor.u32 %v490_v23, %v489_v22  ;;  %v480_v34 = vrot.slane %v478_v25, 1  ;;  %v483_v35 = vrot.slane %v481_v26, 2  ;;  %v5558_v37 = vcombine.low %v228_v15, %v229_v8  ;;  %v5346_v15 = vld [vmem:[%s7600_s1 + $0xa8] sm:$0xff]   ;;  %v5607_v21 = vld [vmem:[%s5519_s30 + $0x40] sm:$0xff]  }
  0x1c   : > { %v568_v36 = vsel %vm565_vm1, %v566_v27, %v567_v19  ;;  %v334_v39 = vor.u32 %v332_v12, %v330_v32  ;;  %v344_v40 = vshll.u32 %v5546_v24, 16  ;;  %v348_v41 = vshrl.u32 %v5546_v24, 16  ;;  %4818 = vmatpush3.bf16.msra.mxu0 %v5346_v15 }
  0x1d   : > { %v492_v38 = vsel %vm476_vm0, %v487_v30, %v491_v31  ;;  %690 = vst.msk [vmem:[#allocation2 + $0x10] sm:$0xff] %vm603_vm2, %v568_v36  ;;  %v484_v43 = vor.u32 %v483_v35, %v480_v34  ;;  %v321_v44 = vshrl.u32 %v5558_v37, 16  ;;  %v323_v45 = vshll.u32 %v5558_v37, 16  ;;  %5202 = vmatpush3.bf16.msra.mxu1 %v5340_v7  ;;  %v5349_v35 = vld [vmem:[%s7600_s1 + $0xf0] sm:$0xff]  }
  0x1e   : > { %540 = vrot.lane.b32.xlu0 %v492_v38, %s5461_s10  ;;  %v339_v46 = vsel %vm319_vm3, %v334_v39, %v338_v33  ;;  %v493_v47 = vrot.slane %v348_v41, 1  ;;  %v494_v48 = vrot.slane %v344_v40, 2  ;;  %v342_v51 = vor.u32 %v340_v14, %v338_v33  ;;  %4891 = vmatprep.subr.bf16.mxu1 %v5343_v2 }
  0x1f   : > { %v488_v49 = vsel %vm476_vm0, %v484_v43, %v487_v30  ;;  %v325_v50 = vrot.slane %v323_v45, 1  ;;  %v352_v52 = vshll.u32 %v5554_v29, 16  ;;  %v346_v55 = vrot.slane %v344_v40, 1  ;;  %4819 = vmatprep.subr.bf16.mxu0 %v5349_v35 }
  0x20   : > { %538 = vrot.lane.b32.xlu1 %v488_v49, %s5461_s10  ;;  %v495_v54 = vor.u32 %v494_v48, %v493_v47  ;;  %v356_v56 = vshrl.u32 %v5554_v29, 16  ;;  %v360_v57 = vshll.u32 %v5565_v42, 16  ;;  %v364_v0 = vshrl.u32 %v5565_v42, 16 }
  0x21   : > { %v326_v59 = vor.u32 %v325_v50, %v321_v44  ;;  %v498_v60 = vrot.slane %v352_v52, 2  ;;  %v1200_v61 = vld [vmem:[#allocation2 + $0x28] sm:$0xff]  ;;  %v347_v7 = vsel %vm319_vm3, %v342_v51, %v346_v55  ;;  %v350_v11 = vor.u32 %v348_v41, %v346_v55  ;;  %v5350_v41 = vld [vmem:[%s7600_s1 + $0xb0] sm:$0xff]  }
  0x22   : > { %422 = vrot.lane.b32.xlu0 %v339_v46, %s5461_s10  ;;  %v496_v62 = vsel %vm476_vm0, %v491_v31, %v495_v54  ;;  %v497_v63 = vrot.slane %v356_v56, 1  ;;  %5203 = vmatprep.mubr.msk.bf16.mxu1 %vm603_vm2, %v1200_v61  ;;  %v502_v4 = vrot.slane %v360_v57, 2  ;;  %v501_v9 = vrot.slane %v364_v0, 1  ;;  %v5614_v31 = vld [vmem:[%s5519_s30 + $0x48] sm:$0xff]  }
  0x23   : > { %v331_v3 = vsel %vm319_vm3, %v326_v59, %v330_v32  ;;  %v354_v12 = vrot.slane %v352_v52, 1  ;;  %v368_v13 = vshll.u32 %v5574_v53, 16  ;;  %v372_v14 = vshrl.u32 %v5574_v53, 16  ;;  %4820 = vmatpush3.bf16.msra.mxu0 %v5350_v41 }
  0x24   : > { %420 = vrot.lane.b32.xlu1 %v331_v3, %s5461_s10  ;;  %v499_v8 = vor.u32 %v498_v60, %v497_v63  ;;  %v503_v19 = vor.u32 %v502_v4, %v501_v9  ;;  %v376_v20 = vshll.u32 %v5586_v1, 16  ;;  %v380_v25 = vshrl.u32 %v5586_v1, 16  ;;  %4821 = vmatprep.subr.bf16.mxu0 %v5353_v58 }
  0x25   : > { %v505_v22 = vrot.slane %v372_v14, 1  ;;  %v506_v23 = vrot.slane %v368_v13, 2  ;;  %v571_v26 = vrot.slane %v5546_v24, 2  ;;  %v573_v27 = vrot.slane %v5554_v29, 2 }
  0x26   : > { %542 = vrot.lane.b32.xlu0 %v496_v62, %s5461_s10  ;;  %v500_v18 = vsel %vm476_vm0, %v495_v54, %v499_v8  ;;  %v358_v28 = vor.u32 %v356_v56, %v354_v12  ;;  %v362_v30 = vrot.slane %v360_v57, 1  ;;  %v355_v32 = vsel %vm319_vm3, %v350_v11, %v354_v12  ;;  %v5357_v12 = vld [vmem:[%s7600_s1 + $0x100] sm:$0xff]  }
  0x27   : > { %v504_v33 = vsel %vm476_vm0, %v499_v8, %v503_v19  ;;  %v510_v34 = vrot.slane %v376_v20, 2  ;;  %v507_v36 = vor.u32 %v506_v23, %v505_v22  ;;  %v509_v38 = vrot.slane %v380_v25, 1  ;;  %v5347_v23 = vld [vmem:[%s7600_s1 + $0x48] sm:$0xff]  }
  0x28   : > { %424 = vrot.lane.b32.xlu1 %v347_v7, %s5461_s10  ;;  %v384_v39 = vshll.u32 %v5607_v21, 16  ;;  %v388_v40 = vshrl.u32 %v5607_v21, 16  ;;  %v575_v43 = vrot.slane %v5565_v42, 2  ;;  %v577_v44 = vrot.slane %v5574_v53, 2 }
  0x29   : > { %v366_v45 = vor.u32 %v364_v0, %v362_v30  ;;  %v363_v46 = vsel %vm319_vm3, %v358_v28, %v362_v30  ;;  %v370_v47 = vrot.slane %v368_v13, 1  ;;  %v579_v48 = vrot.slane %v5586_v1, 2  ;;  %v5358_v13 = vld [vmem:[%s7600_s1 + $0xc0] sm:$0xff]  }
  0x2a   : > { %544 = vrot.lane.b32.xlu0 %v500_v18, %s5461_s10  ;;  %v581_v49 = vrot.slane %v5607_v21, 2  ;;  %v513_v50 = vrot.slane %v388_v40, 1  ;;  %v514_v51 = vrot.slane %v384_v39, 2  ;;  %v392_v52 = vshll.u32 %v5614_v31, 16 }
  0x2b   : > { %v583_v54 = vrot.slane %v5614_v31, 2  ;;  %v508_v55 = vsel %vm476_vm0, %v503_v19, %v507_v36  ;;  %v511_v56 = vor.u32 %v510_v34, %v509_v38  ;;  %v396_v57 = vshrl.u32 %v5614_v31, 16  ;;  %v5344_v19 = vld [vmem:[%s7600_s1] sm:$0xff]   ;;  %v5361_v34 = vld [vmem:[%s7600_s1 + $0x108] sm:$0xff]   ;;  %v5352_v38 = vld [vmem:[%s7600_s1 + $0x10] sm:$0xff]  }
  0x2c   : > { %426 = vrot.lane.b32.xlu1 %v355_v32, %s5461_s10  ;;  %v572_v59 = vsel %vm565_vm1, %v569_v16, %v571_v26  ;;  %v574_v60 = vsel %vm565_vm1, %v571_v26, %v573_v27  ;;  %v576_v61 = vsel %vm565_vm1, %v573_v27, %v575_v43  ;;  %v578_v62 = vsel %vm565_vm1, %v575_v43, %v577_v44  ;;  %v5354_v16 = vld [vmem:[%s7600_s1 + $0xb8] sm:$0xff]  }
  0x2d   : > { %v371_v63 = vsel %vm319_vm3, %v366_v45, %v370_v47  ;;  %v378_v0 = vrot.slane %v376_v20, 1  ;;  %696 = vst.msk [vmem:[#allocation2 + $0x40] sm:$0xff] %vm603_vm2, %v572_v59  ;;  %699 = vst.msk [vmem:[#allocation2 + $0x58] sm:$0xff] %vm603_vm2, %v574_v60  ;;  %v374_v2 = vor.u32 %v372_v14, %v370_v47  ;;  %v580_v3 = vsel %vm565_vm1, %v577_v44, %v579_v48  ;;  %v5365_v44 = vld [vmem:[%s7600_s1 + $0x110] sm:$0xff]   ;;  %v5359_v47 = vld [vmem:[%s7600_s1 + $0x60] sm:$0xff]  }
  0x2e   : > { %546 = vrot.lane.b32.xlu0 %v504_v33, %s5461_s10  ;;  %702 = vst.msk [vmem:[#allocation2 + $0x70] sm:$0xff] %vm603_vm2, %v576_v61  ;;  %705 = vst.msk [vmem:[#allocation2 + $0x88] sm:$0xff] %vm603_vm2, %v578_v62  ;;  %v582_v4 = vsel %vm565_vm1, %v579_v48, %v581_v49  ;;  %v584_v7 = vsel %vm565_vm1, %v581_v49, %v583_v54  ;;  %v512_v8 = vsel %vm476_vm0, %v507_v36, %v511_v56  ;;  %v5351_v33 = vld [vmem:[%s7600_s1 + $0x50] sm:$0xff]   ;;  %v5362_v36 = vld [vmem:[%s7600_s1 + $0xc8] sm:$0xff]  }
  0x2f   : > { %v515_v9 = vor.u32 %v514_v51, %v513_v50  ;;  %v517_v10 = vrot.slane %v396_v57, 1  ;;  %v518_v11 = vrot.slane %v392_v52, 2  ;;  %4822 = vmatpush3.bf16.msra.mxu0 %v5354_v16  ;;  %708 = vst.msk [vmem:[#allocation2 + $0xa0] sm:$0xff] %vm603_vm2, %v580_v3  ;;  %711 = vst.msk [vmem:[#allocation2 + $0xb8] sm:$0xff] %vm603_vm2, %v582_v4  ;;  %v379_v14 = vsel %vm319_vm3, %v374_v2, %v378_v0  ;;  %v5366_v45 = vld [vmem:[%s7600_s1 + $0xd0] sm:$0xff]   ;;  %v5369_v48 = vld [vmem:[%s7600_s1 + $0x118] sm:$0xff]  }
  0x30   : > { %428 = vrot.lane.b32.xlu1 %v363_v46, %s5461_s10  ;;  %714 = vst.msk [vmem:[#allocation2 + $0xd0] sm:$0xff] %vm603_vm2, %v584_v7  ;;  %v382_v15 = vor.u32 %v380_v25, %v378_v0  ;;  %v386_v18 = vrot.slane %v384_v39, 1  ;;  %4823 = vmatprep.subr.bf16.mxu0 %v5357_v12  ;;  %v5348_v25 = vld [vmem:[%s7600_s1 + $0x8] sm:$0xff]   ;;  %v394_v32 = vrot.slane %v392_v52, 1  ;;  %v5356_v46 = vld [vmem:[%s7600_s1 + $0x18] sm:$0xff]   ;;  %v5360_v49 = vld [vmem:[%s7600_s1 + $0x20] sm:$0xff]  }
  0x31   : > { %v516_v20 = vsel %vm476_vm0, %v511_v56, %v515_v9  ;;  %v5687_v22 = vor.u32 %v518_v11, %v517_v10  ;;  %v5756_v50 = vld [vmem:[%s5519_s30 + $0x50] sm:$0xff]   ;;  %v5371_v51 = vld [vmem:[%s7600_s1 + $0xd8] sm:$0xff]   ;;  %v5775_v0 = vld [vmem:[%s7600_s1 + $0x80] sm:$0xff]  }
  0x32   : > { %548 = vrot.lane.b32.xlu0 %v508_v55, %s5461_s10  ;;  %v387_v28 = vsel %vm319_vm3, %v382_v15, %v386_v18  ;;  %v390_v30 = vor.u32 %v388_v40, %v386_v18  ;;  %v5355_v40 = vld [vmem:[%s7600_s1 + $0x58] sm:$0xff]   ;;  %v5363_v55 = vld [vmem:[%s7600_s1 + $0x68] sm:$0xff]   ;;  %v400_v56 = vshll.u32 %v5756_v50, 16  ;;  %v404_v58 = vshrl.u32 %v5756_v50, 16  ;;  %v5367_v3 = vld [vmem:[%s7600_s1 + $0x70] sm:$0xff]  }
  0x33   : > { %4824 = vmatpush3.bf16.msra.mxu0 %v5358_v13  ;;  %v520_v35 = vsel %vm476_vm0, %v515_v9, %v5687_v22  ;;  %v398_v59 = vor.u32 %v396_v57, %v394_v32  ;;  %v5364_v57 = vld [vmem:[%s7600_s1 + $0x28] sm:$0xff]   ;;  %v5372_v9 = vld [vmem:[%s7600_s1 + $0x78] sm:$0xff]   ;;  %v5375_v11 = vld [vmem:[%s7600_s1 + $0x180] sm:$0xff]  }
  0x34   : > { %430 = vrot.lane.b32.xlu1 %v371_v63, %s5461_s10  ;;  %v5692_v26 = vld [vmem:[#allocation2 + $0x40] sm:$0xff]  ;;  %v5694_v27 = vld [vmem:[#allocation2 + $0x58] sm:$0xff]  ;;  %4825 = vmatprep.subr.bf16.mxu0 %v5361_v34  ;;  %v395_v41 = vsel %vm319_vm3, %v390_v30, %v394_v32  ;;  %v521_v61 = vrot.slane %v404_v58, 1  ;;  %v522_v62 = vrot.slane %v400_v56, 2  ;;  %v402_v63 = vrot.slane %v400_v56, 1 }
  0x35   : > { %5204 = vmatmul.mubr.msk.bf16.vlgmr.msra.gmra.mrb[0].mxu1 %vm603_vm2, %v5692_v26  ;;  %v5723_v39 = vld [vmem:[#allocation2 + $0x70] sm:$0xff]  ;;  %v5730_v43 = vld [vmem:[#allocation2 + $0x88] sm:$0xff]  ;;  %v5373_v10 = vld [vmem:[%s7600_s1 + $0x38] sm:$0xff]   ;;  %v449_v56 = vrot.slane %v5525_v5, 1 }
  0x36   : > { %550 = vrot.lane.b32.xlu0 %v512_v8, %s5461_s10  ;;  %4892 = vmatpush3.bf16.msra.mxu1 %v5344_v19  ;;  %v5761_v52 = vld [vmem:[#allocation2 + $0xa0] sm:$0xff]  ;;  %v5770_v60 = vld [vmem:[#allocation2 + $0xb8] sm:$0xff]  ;;  %v523_v16 = vor.u32 %v522_v62, %v521_v61  ;;  %v403_v2 = vsel %vm319_vm3, %v398_v59, %v402_v63  ;;  %v5368_v8 = vld [vmem:[%s7600_s1 + $0x30] sm:$0xff]   ;;  %v406_v15 = vor.u32 %v404_v58, %v402_v63  ;;  %v451_v58 = vrot.slane %v5528_v6, 1 }
  0x37   : > { %4893 = vmatprep.subr.bf16.mxu1 %v5347_v23  ;;  %5207 = vmatprep.mubr.msk.bf16.mxu1 %vm603_vm2, %v5694_v27  ;;  %v5792_v7 = vld [vmem:[#allocation2 + $0xd0] sm:$0xff]  ;;  %v5810_v12 = vld [vmem:[%s5519_s30 + $0x58] sm:$0xff]   ;;  %v5401_v30 = vld [vmem:[%s5519_s30 + $0x60] ss:$0 sps:$4 sm:$0x33]   ;;  %v448_v59 = vrot.slane %v5542_v17, 1 }
  0x38   : > { %432 = vrot.lane.b32.xlu1 %v379_v14, %s5461_s10  ;;  %4826 = vmatpush3.bf16.msra.mxu0 %v5362_v36  ;;  %v524_v4 = vsel %vm476_vm0, %v5687_v22, %v523_v16  ;;  %v408_v13 = vshll.u32 %v5810_v12, 16  ;;  %v412_v14 = vshrl.u32 %v5810_v12, 16  ;;  %v587_v32 = vrot.slane %v5810_v12, 2  ;;  %v5379_v5 = vld [vmem:[%s7600_s1 + $0x88] sm:$0xff]  }
  0x39   : > { %4827 = vmatprep.subr.bf16.mxu0 %v5365_v44  ;;  %v530_v34 = vshrl.u32 %v5401_v30, 16  ;;  %v452_v61 = vsel %vm447_vm4, %v449_v56, %v451_v58  ;;  %v5441_v6 = vld [vmem:[%s5519_s30 + $0x8] sm:$0xff]  }
  0x3a   : > { %552 = vrot.lane.b32.xlu0 %v516_v20, %s5461_s10  ;;  %4894 = vmatpush3.bf16.msra.mxu1 %v5348_v25  ;;  %v525_v18 = vrot.slane %v412_v14, 1  ;;  %v526_v19 = vrot.slane %v408_v13, 2  ;;  %v410_v20 = vrot.slane %v408_v13, 1 }
  0x3b   : > { %4895 = vmatprep.subr.bf16.mxu1 %v5351_v33  ;;  %v5822_v33 = vld [vmem:[%s5519_s30 + $0x60] ss:$0 sps:$4 sm:$0x11]   ;;  %v532_v44 = vrot.slane %v530_v34, 1 }
  0x3c   : > { %434 = vrot.lane.b32.xlu1 %v387_v28, %s5461_s10  ;;  %4828 = vmatpush3.bf16.msra.mxu0 %v5366_v45  ;;  %v527_v22 = vor.u32 %v526_v19, %v525_v18  ;;  %v411_v23 = vsel %vm319_vm3, %v406_v15, %v410_v20  ;;  %v585_v28 = vrot.slane %v5756_v50, 2  ;;  %v457_v15 = vrot.slane %v5565_v42, 1  ;;  %v5380_v19 = vld [vmem:[%s7600_s1 + $0x190] sm:$0xff]  }
  0x3d   : > { %5208 = vmatmul.mubr.msk.bf16.gmra.mrb[4].mxu1 %vm603_vm2, %v5723_v39  ;;  %4829 = vmatprep.subr.bf16.mxu0 %v5369_v48 }
  0x3e   : > { %554 = vrot.lane.b32.xlu0 %v520_v35, %s5461_s10  ;;  %4896 = vmatpush3.bf16.msra.mxu1 %v5352_v38  ;;  %v528_v25 = vsel %vm476_vm0, %v523_v16, %v527_v22  ;;  %v533_v35 = vshll.u32 %v5401_v30, 16  ;;  %v588_v36 = vsel %vm565_vm1, %v585_v28, %v587_v32  ;;  %v589_v38 = vrot.slane %v5401_v30, 2 }
  0x3f   : > { %5211 = vmatprep.mubr.msk.bf16.mxu1 %vm603_vm2, %v5730_v43  ;;  %4897 = vmatprep.subr.bf16.mxu1 %v5355_v40  ;;  %720 = vst.msk [vmem:[#allocation2 + $0x100] sm:$0xff] %vm603_vm2, %v588_v36  ;;  %v414_v40 = vor.u32 %v412_v14, %v410_v20  ;;  %v5442_v20 = vld [vmem:[%s5519_s30 + $0x10] sm:$0xff]   ;;  %v459_v30 = vrot.slane %v5574_v53, 1  ;;  %v5443_v36 = vld [vmem:[%s5519_s30 + $0x18] sm:$0xff]  }
  0x40   : > { %436 = vrot.lane.b32.xlu1 %v395_v41, %s5461_s10  ;;  %4830 = vmatpush3.bf16.msra.mxu0 %v5371_v51  ;;  %v416_v41 = vshll.u32 %v5822_v33, 16  ;;  %v535_v45 = vrot.slane %v533_v35, 2  ;;  %v5382_v35 = vld [vmem:[%s7600_s1 + $0x198] sm:$0xff]  }
  0x41   : > { %5219 = vmatprep.subr.bf16.mxu0 %v5775_v0 }
  0x42   : > { %4898 = vmatpush3.bf16.msra.mxu1 %v5356_v46  ;;  %556 = vrot.lane.b32.xlu0 %v524_v4, %s5461_s10  ;;  %v590_v46 = vsel %vm565_vm1, %v587_v32, %v589_v38  ;;  %v536_v48 = vor.u32 %v535_v45, %v532_v44  ;;  %v5381_v32 = vld [vmem:[%s7600_s1 + $0x150] sm:$0xff]   ;;  %v460_v44 = vsel %vm447_vm4, %v457_v15, %v459_v30  ;;  %v461_v45 = vrot.slane %v5586_v1, 1 }
  0x43   : > { %4899 = vmatprep.subr.bf16.mxu1 %v5359_v47  ;;  %723 = vst.msk [vmem:[#allocation2 + $0x118] sm:$0xff] %vm603_vm2, %v590_v46  ;;  %v418_v47 = vrot.slane %v416_v41, 1  ;;  %v5906_v41 = vld [vmem:[%s7600_s1 + $0x1c0] sm:$0xff]   ;;  %v5383_v46 = vld [vmem:[%s7600_s1 + $0x158] sm:$0xff]  }
  0x44   : > { %438 = vrot.lane.b32.xlu1 %v403_v2, %s5461_s10  ;;  %v537_v51 = vsel %vm476_vm0, %v527_v22, %v536_v48  ;;  %v5385_v48 = vld [vmem:[%s7600_s1 + $0x1a0] sm:$0xff]   ;;  %v462_v1 = vsel %vm447_vm4, %v459_v30, %v461_v45 }
  0x45   : > { %5212 = vmatmul.mubr.msk.bf16.gmra.mrb[8].mxu1 %vm603_vm2, %v5761_v52 }
  0x46   : > { %4900 = vmatpush3.bf16.msra.mxu1 %v5360_v49  ;;  %5215 = vmatprep.mubr.msk.bf16.mxu1 %vm603_vm2, %v5770_v60  ;;  %v419_v49 = vsel %vm319_vm3, %v414_v40, %v418_v47 }
  0x47   : > { %4901 = vmatprep.subr.bf16.mxu1 %v5363_v55  ;;  %558 = vrot.lane.b32.xlu0 %v528_v25, %s5461_s10  ;;  %v586_v55 = vsel %vm565_vm1, %v583_v54, %v585_v28  ;;  %v453_v54 = vrot.slane %v5546_v24, 1  ;;  %v5376_v24 = vld [vmem:[%s7600_s1 + $0x140] sm:$0xff]   ;;  %v5389_v25 = vld [vmem:[%s7600_s1 + $0x98] sm:$0xff]  }
  0x48   : > { %440 = vrot.lane.b32.xlu1 %v411_v23, %s5461_s10  ;;  %717 = vst.msk [vmem:[#allocation2 + $0xe8] sm:$0xff] %vm603_vm2, %v586_v55 }
  0x49   : > { %v454_v4 = vsel %vm447_vm4, %v451_v58, %v453_v54  ;;  %v463_v58 = vrot.slane %v5607_v21, 1 }
  0x4a   : > { %4902 = vmatpush3.bf16.msra.mxu1 %v5364_v57  ;;  %v450_v57 = vsel %vm447_vm4, %v448_v59, %v449_v56  ;;  %v5386_v59 = vld [vmem:[%s7600_s1 + $0x160] sm:$0xff]  }
  0x4b   : > { %4903 = vmatprep.subr.bf16.mxu1 %v5367_v3  ;;  %560 = vrot.lane.b32.xlu0 %v537_v51, %s5461_s10 }
  0x4c   : > { %442 = vrot.lane.b32.xlu1 %v419_v49, %s5461_s10  ;;  %v5444_v49 = vld [vmem:[%s5519_s30 + $0x20] sm:$0xff]  }
  0x4d   : > { %5216 = vmatmul.mubr.msk.bf16.gmra.mrb[12].mxu1 %vm603_vm2, %v5792_v7 }
  0x4e   : > { %4904 = vmatpush3.bf16.msra.mxu1 %v5368_v8  ;;  %v455_v8 = vrot.slane %v5554_v29, 1  ;;  %v5384_v29 = vld [vmem:[%s7600_s1 + $0x90] sm:$0xff]  }
  0x4f   : > { %4905 = vmatprep.subr.bf16.mxu1 %v5372_v9 }
  0x50   : > { %v458_v28 = vsel %vm447_vm4, %v455_v8, %v457_v15 }
  0x52   : > { %4906 = vmatpush3.bf16.msra.mxu1 %v5373_v10  ;;  %v5377_v10 = vld [vmem:[%s7600_s1 + $0x188] sm:$0xff]  }
  0x53   : > { %4967 = vmatprep.subr.bf16.mxu1 %v5375_v11 }
  0x90   : > { %v541_v62 = vpop.permute.xlu0 %540 }
  0x91   : > { %v646_v63 = vsel %vm603_vm2, %v452_v61, %v541_v62  ;;  %v5387_v62 = vld [vmem:[%s7600_s1 + $0x1a8] sm:$0xff]  }
  0x92   : > { %1398 = vmatprep.mubr.bf16.mxu0 %v646_v63  ;;  %v539_v16 = vpop.permute.xlu1 %538 }
  0x93   : > { %v642_v2 = vsel %vm603_vm2, %v450_v57, %v539_v16  ;;  %v464_v16 = vsel %vm447_vm4, %v461_v45, %v463_v58 }
  0x94   : > { %v423_v3 = vpop.permute.xlu0 %422  ;;  %1736 = vmatprep.mubr.bf16.mxu1 %v642_v2  ;;  %v465_v2 = vrot.slane %v5614_v31, 1 }
  0x95   : > { %v608_v17 = vsel %vm603_vm2, %v5441_v6, %v423_v3  ;;  %v5388_v3 = vld [vmem:[%s7600_s1 + $0x168] sm:$0xff]   ;;  %v5390_v6 = vld [vmem:[%s7600_s1 + $0x1b0] sm:$0xff]  }
  0x96   : > { %1399 = vmatmul.mubr.bf16.vlgmr.msra.gmra.mrb[0].mxu0 %v608_v17  ;;  %v421_v9 = vpop.permute.xlu1 %420  ;;  %v466_v31 = vsel %vm447_vm4, %v463_v58, %v465_v2  ;;  %v5407_v58 = vld [vmem:[%s7600_s1 + $0x270] sm:$0xff]  }
  0x97   : > { %5220 = vmatpush3.bf16.msra.mxu0 %v5775_v0  ;;  %v605_v11 = vsel %vm603_vm2, %v5558_v37, %v421_v9  ;;  %v456_v0 = vsel %vm447_vm4, %v453_v54, %v455_v8  ;;  %v5378_v37 = vld [vmem:[%s7600_s1 + $0x148] sm:$0xff]   ;;  %v5391_v9 = vld [vmem:[%s7600_s1 + $0x170] sm:$0xff]  }
  0x98   : > { %v543_v13 = vpop.permute.xlu0 %542  ;;  %5221 = vmatprep.subr.bf16.mxu0 %v5379_v5  ;;  %1737 = vmatmul.mubr.bf16.vlgmr.msra.gmra.mrb[16].mxu1 %v605_v11  ;;  %v5393_v11 = vld [vmem:[%s7600_s1 + $0x1b8] sm:$0xff]  }
  0x99   : > { %v5862_v14 = vsel %vm603_vm2, %v454_v4, %v543_v13  ;;  %1744 = vmatprep.mubr.bf16.mxu1 %v646_v63  ;;  %4968 = vmatpush3.bf16.msra.mxu1 %v5376_v24  ;;  %v5445_v63 = vld [vmem:[%s5519_s30 + $0x28] sm:$0xff]   ;;  %v5447_v13 = vld [vmem:[%s5519_s30 + $0x38] sm:$0xff]  }
  0x9a   : > { %v425_v18 = vpop.permute.xlu1 %424  ;;  %1406 = vmatprep.mubr.bf16.mxu0 %v5862_v14  ;;  %4969 = vmatprep.subr.bf16.mxu1 %v5377_v10 }
  0x9b   : > { %v5878_v22 = vsel %vm603_vm2, %v5442_v20, %v425_v18  ;;  %5222 = vmatpush3.bf16.msra.mxu0 %v5379_v5  ;;  %v5448_v20 = vld [vmem:[%s5519_s30 + $0x40] sm:$0xff]  }
  0x9c   : > { %v545_v23 = vpop.permute.xlu0 %544  ;;  %5223 = vmatprep.subr.bf16.mxu0 %v5384_v29 }
  0x9d   : > { %v5881_v42 = vsel %vm603_vm2, %v456_v0, %v545_v23  ;;  %4970 = vmatpush3.bf16.msra.mxu1 %v5378_v37  ;;  %v5394_v37 = vld [vmem:[%s7600_s1 + $0x178] sm:$0xff]  }
  0x9e   : > { %1407 = vmatmul.mubr.bf16.gmra.mrb[4].mxu0 %v5878_v22  ;;  %v427_v34 = vpop.permute.xlu1 %426  ;;  %4971 = vmatprep.subr.bf16.mxu1 %v5380_v19  ;;  %v5396_v19 = vld [vmem:[%s7600_s1 + $0x260] sm:$0xff]  }
  0x9f   : > { %1414 = vmatprep.mubr.bf16.mxu0 %v5881_v42  ;;  %v5898_v38 = vsel %vm603_vm2, %v5443_v36, %v427_v34  ;;  %5224 = vmatpush3.bf16.msra.mxu0 %v5384_v29 }
  0xa0   : > { %v547_v40 = vpop.permute.xlu0 %546  ;;  %1745 = vmatmul.mubr.bf16.gmra.mrb[20].mxu1 %v608_v17  ;;  %5225 = vmatprep.subr.bf16.mxu0 %v5389_v25  ;;  %v5446_v17 = vld [vmem:[%s5519_s30 + $0x30] sm:$0xff]  }
  0xa1   : > { %v5901_v53 = vsel %vm603_vm2, %v458_v28, %v547_v40  ;;  %1752 = vmatprep.mubr.bf16.mxu1 %v5862_v14  ;;  %4972 = vmatpush3.bf16.msra.mxu1 %v5381_v32  ;;  %v5449_v32 = vld [vmem:[%s5519_s30 + $0x48] sm:$0xff]   ;;  %v1170_v40 = vld [vmem:[#allocation2 + $0x10] sm:$0xff]  ;;  %s4814_s30 = sshll.u32 %s7835_s21, 7 }
  0xa2   : > { %v429_v47 = vpop.permute.xlu1 %428  ;;  %4973 = vmatprep.subr.bf16.mxu1 %v5382_v35  ;;  %s7505_s29 = scalar_lea.vmem %s7604_s5, %s4814_s30 }
  0xa3   : > { %v5919_v51 = vsel %vm603_vm2, %v5444_v49, %v429_v47  ;;  %5226 = vmatpush3.bf16.msra.mxu0 %v5389_v25  ;;  %v467_v25 = vrot.slane %v5756_v50, 1  ;;  %v5397_v47 = vld [vmem:[%s7600_s1 + $0x1c8] sm:$0xff]  }
  0xa4   : > { %v549_v55 = vpop.permute.xlu0 %548  ;;  %5243 = vmatprep.subr.bf16.mxu0 %v5906_v41 }
  0xa5   : > { %v5922_v56 = vsel %vm603_vm2, %v460_v44, %v549_v55  ;;  %4974 = vmatpush3.bf16.msra.mxu1 %v5383_v46  ;;  %v468_v28 = vsel %vm447_vm4, %v465_v2, %v467_v25  ;;  %v469_v44 = vrot.slane %v5810_v12, 1  ;;  %v5450_v55 = vld [vmem:[#allocation2 + $0x28] sm:$0xff] }
  0xa6   : > { %1415 = vmatmul.mubr.bf16.gmra.mrb[8].mxu0 %v5898_v38  ;;  %v431_v61 = vpop.permute.xlu1 %430  ;;  %4975 = vmatprep.subr.bf16.mxu1 %v5385_v48 }
  0xa7   : > { %1422 = vmatprep.mubr.bf16.mxu0 %v5901_v53  ;;  %v5937_v57 = vsel %vm603_vm2, %v5445_v63, %v431_v61  ;;  %v470_v45 = vsel %vm447_vm4, %v467_v25, %v469_v44  ;;  %v5422_v61 = vld [vmem:[%s7600_s1 + $0x2c0] sm:$0xff]  }
  0xa8   : > { %v551_v54 = vpop.permute.xlu0 %550  ;;  %1753 = vmatmul.mubr.bf16.gmra.mrb[24].mxu1 %v5878_v22 }
  0xa9   : > { %v5941_v21 = vsel %vm603_vm2, %v462_v1, %v551_v54  ;;  %1760 = vmatprep.mubr.bf16.mxu1 %v5881_v42  ;;  %4976 = vmatpush3.bf16.msra.mxu1 %v5386_v59  ;;  %v5403_v59 = vld [vmem:[%s7600_s1 + $0x220] sm:$0xff]  }
  0xaa   : > { %v433_v5 = vpop.permute.xlu1 %432  ;;  %4977 = vmatprep.subr.bf16.mxu1 %v5387_v62  ;;  %v471_v62 = vrot.slane %v5822_v33, 1  ;;  %v5404_v33 = vld [vmem:[%s7600_s1 + $0x1e0] sm:$0xff]  }
  0xab   : > { %v5954_v4 = vsel %vm603_vm2, %v5446_v17, %v433_v5  ;;  %v5408_v5 = vld [vmem:[%s7600_s1 + $0x230] sm:$0xff]   ;;  %v5412_v17 = vld [vmem:[%s7600_s1 + $0x240] sm:$0xff]  }
  0xac   : > { %v553_v8 = vpop.permute.xlu0 %552  ;;  %v472_v63 = vsel %vm447_vm4, %v469_v44, %v471_v62  ;;  %v5431_v62 = vld [vmem:[%s7600_s1 + $0x2e0] sm:$0xff]  }
  0xad   : > { %v5957_v24 = vsel %vm603_vm2, %v464_v16, %v553_v8  ;;  %4978 = vmatpush3.bf16.msra.mxu1 %v5388_v3  ;;  %v5414_v8 = vld [vmem:[%s7600_s1 + $0x248] sm:$0xff]  }
  0xae   : > { %1423 = vmatmul.mubr.bf16.gmra.mrb[12].mxu0 %v5919_v51  ;;  %v435_v10 = vpop.permute.xlu1 %434  ;;  %4979 = vmatprep.subr.bf16.mxu1 %v5390_v6  ;;  %v5410_v6 = vld [vmem:[%s7600_s1 + $0x238] sm:$0xff]  }
  0xaf   : > { %1430 = vmatprep.mubr.bf16.mxu0 %v5922_v56  ;;  %v5970_v29 = vsel %vm603_vm2, %v5447_v13, %v435_v10 }
  0xb0   : > { %v555_v0 = vpop.permute.xlu0 %554  ;;  %1761 = vmatmul.mubr.bf16.gmra.mrb[28].mxu1 %v5898_v38 }
  0xb1   : > { %v5974_v15 = vsel %vm603_vm2, %v466_v31, %v555_v0  ;;  %1768 = vmatprep.mubr.bf16.mxu1 %v5901_v53  ;;  %4980 = vmatpush3.bf16.msra.mxu1 %v5391_v9  ;;  %v5417_v31 = vld [vmem:[%s7600_s1 + $0x250] sm:$0xff]   ;;  %v6132_v9 = vld [vmem:[#allocation2 + $0xe8] sm:$0xff]  ;;  %v5420_v0 = vld [vmem:[%s7600_s1 + $0x218] sm:$0xff]  }
  0xb2   : > { %v437_v18 = vpop.permute.xlu1 %436  ;;  %4981 = vmatprep.subr.bf16.mxu1 %v5393_v11 }
  0xb3   : > { %v5985_v23 = vsel %vm603_vm2, %v5448_v20, %v437_v18 }
  0xb4   : > { %v557_v35 = vpop.permute.xlu0 %556 }
  0xb5   : > { %4982 = vmatpush3.bf16.msra.mxu1 %v5394_v37  ;;  %v6000_v36 = vsel %vm603_vm2, %v468_v28, %v557_v35  ;;  %v2290_v37 = vld [vmem:[#allocation2 + $0x58] sm:$0xff]  ;;  %v6163_v28 = vld [vmem:[#allocation2 + $0x70] sm:$0xff]  ;;  %v5424_v35 = vld [vmem:[%s7600_s1 + $0x2c8] sm:$0xff]  }
  0xb6   : > { %1431 = vmatmul.mubr.bf16.gmra.mrb[16].mxu0 %v5937_v57  ;;  %5267 = vmatprep.subr.bf16.mxu1 %v5396_v19  ;;  %v439_v30 = vpop.permute.xlu1 %438 }
  0xb7   : > { %1438 = vmatprep.mubr.bf16.mxu0 %v5941_v21  ;;  %v5996_v34 = vsel %vm603_vm2, %v5449_v32, %v439_v30  ;;  %v5423_v30 = vld [vmem:[%s7600_s1 + $0x280] sm:$0xff]  }
  0xb8   : > { %1769 = vmatmul.mubr.bf16.gmra.mrb[32].mxu1 %v5919_v51 }
  0xb9   : > { %1776 = vmatprep.mubr.bf16.mxu1 %v5922_v56  ;;  %v559_v49 = vpop.permute.xlu0 %558 }
  0xba   : > { %v441_v46 = vpop.permute.xlu1 %440  ;;  %v6023_v1 = vsel %vm603_vm2, %v470_v45, %v559_v49  ;;  %v5425_v45 = vld [vmem:[%s7600_s1 + $0x288] sm:$0xff]   ;;  %v5440_v49 = vld [vmem:[%s7600_s1 + $0x318] sm:$0xff]  }
  0xbb   : > { %v6019_v48 = vsel %vm603_vm2, %v5756_v50, %v441_v46  ;;  %v5398_v50 = vld [vmem:[%s7600_s1 + $0x1d0] sm:$0xff]  }
  0xbc   : > { %v5426_v46 = vld [vmem:[%s7600_s1 + $0x2d0] sm:$0xff]  }
  0xbd   : > { %v561_v16 = vpop.permute.xlu0 %560 }
  0xbe   : > { %1439 = vmatmul.mubr.bf16.gmra.mrb[20].mxu0 %v5954_v4  ;;  %v443_v54 = vpop.permute.xlu1 %442  ;;  %v6072_v3 = vsel %vm603_vm2, %v472_v63, %v561_v16  ;;  %v2305_v16 = vld [vmem:[#allocation2 + $0xd0] sm:$0xff] }
  0xbf   : > { %1446 = vmatprep.mubr.bf16.mxu0 %v5957_v24  ;;  %v6067_v2 = vsel %vm603_vm2, %v5810_v12, %v443_v54  ;;  %v5405_v12 = vld [vmem:[%s7600_s1 + $0x228] sm:$0xff]  }
  0xc0   : > { %1777 = vmatmul.mubr.bf16.gmra.mrb[36].mxu1 %v5937_v57 }
  0xc1   : > { %1784 = vmatprep.mubr.bf16.mxu1 %v5941_v21 }
  0xc6   : > { %1447 = vmatmul.mubr.bf16.gmra.mrb[24].mxu0 %v5970_v29 }
  0xc7   : > { %1454 = vmatprep.mubr.bf16.mxu0 %v5974_v15 }
  0xc8   : > { %1785 = vmatmul.mubr.bf16.gmra.mrb[40].mxu1 %v5954_v4 }
  0xc9   : > { %1792 = vmatprep.mubr.bf16.mxu1 %v5957_v24 }
  0xce   : > { %1455 = vmatmul.mubr.bf16.gmra.mrb[28].mxu0 %v5985_v23 }
  0xcf   : > { %5227 = vmatprep.mubr.msk.bf16.mxu0 %vm603_vm2, %v1170_v40  ;;  %v6172_v40 = vld [vmem:[#allocation2 + $0x88] sm:$0xff] }
  0xd0   : > { %1793 = vmatmul.mubr.bf16.gmra.mrb[44].mxu1 %v5970_v29 }
  0xd1   : > { %2104 = vmatprep.mubr.bf16.mxu1 %v5862_v14  ;;  %v5399_v14 = vld [vmem:[%s7600_s1 + $0x268] sm:$0xff]  }
  0xd6   : > { %5228 = vmatmul.mubr.msk.bf16.vlgmr.msra.gmra.mrb[32].mxu0 %vm603_vm2, %v5450_v55 }
  0xd7   : > { %5244 = vmatpush3.bf16.msra.mxu0 %v5906_v41  ;;  %5231 = vmatprep.mubr.msk.bf16.mxu0 %vm603_vm2, %v5692_v26  ;;  %v5400_v41 = vld [vmem:[%s7600_s1 + $0x1d8] sm:$0xff]  }
  0xd8   : > { %5245 = vmatprep.subr.bf16.mxu0 %v5397_v47  ;;  %2105 = vmatmul.mubr.bf16.vlgmr.msra.gmra.mrb[48].mxu1 %v5878_v22  ;;  %v5416_v22 = vld [vmem:[%s7600_s1 + $0x278] sm:$0xff]  }
  0xd9   : > { %2112 = vmatprep.mubr.bf16.mxu1 %v5881_v42  ;;  %5268 = vmatpush3.bf16.msra.mxu1 %v5396_v19  ;;  %v5421_v19 = vld [vmem:[%s7600_s1 + $0x300] sm:$0xff]  }
  0xda   : > { %5269 = vmatprep.subr.bf16.mxu1 %v5399_v14 }
  0xdb   : > { %5246 = vmatpush3.bf16.msra.mxu0 %v5397_v47 }
  0xdc   : > { %5247 = vmatprep.subr.bf16.mxu0 %v5398_v50 }
  0xdd   : > { %5270 = vmatpush3.bf16.msra.mxu1 %v5399_v14  ;;  %v6195_v14 = vld [vmem:[#allocation2 + $0xa0] sm:$0xff] }
  0xde   : > { %5232 = vmatmul.mubr.msk.bf16.gmra.mrb[36].mxu0 %vm603_vm2, %v5694_v27  ;;  %5271 = vmatprep.subr.bf16.mxu1 %v5407_v58 }
  0xdf   : > { %5235 = vmatprep.mubr.msk.bf16.mxu0 %vm603_vm2, %v5723_v39  ;;  %5248 = vmatpush3.bf16.msra.mxu0 %v5398_v50  ;;  %v5427_v50 = vld [vmem:[%s7600_s1 + $0x290] sm:$0xff]  }
  0xe0   : > { %5249 = vmatprep.subr.bf16.mxu0 %v5400_v41  ;;  %2113 = vmatmul.mubr.bf16.gmra.mrb[52].mxu1 %v5898_v38 }
  0xe1   : > { %2120 = vmatprep.mubr.bf16.mxu1 %v5901_v53  ;;  %5272 = vmatpush3.bf16.msra.mxu1 %v5407_v58  ;;  %v5428_v58 = vld [vmem:[%s7600_s1 + $0x2d8] sm:$0xff]  }
  0xe2   : > { %5273 = vmatprep.subr.bf16.mxu1 %v5416_v22 }
  0xe3   : > { %5250 = vmatpush3.bf16.msra.mxu0 %v5400_v41 }
  0xe4   : > { %5043 = vmatprep.subr.bf16.mxu0 %v5403_v59 }
  0xe5   : > { %5274 = vmatpush3.bf16.msra.mxu1 %v5416_v22  ;;  %v2302_v22 = vld [vmem:[#allocation2 + $0xb8] sm:$0xff] }
  0xe6   : > { %5236 = vmatmul.mubr.msk.bf16.gmra.mrb[40].mxu0 %vm603_vm2, %v5730_v43  ;;  %5119 = vmatprep.subr.bf16.mxu1 %v5422_v61  ;;  %v5429_v61 = vld [vmem:[%s7600_s1 + $0x298] sm:$0xff]  }
  0xe7   : > { %5239 = vmatprep.mubr.msk.bf16.mxu0 %vm603_vm2, %v5761_v52 }
  0xe8   : > { %2121 = vmatmul.mubr.bf16.gmra.mrb[56].mxu1 %v5919_v51 }
  0xe9   : > { %2128 = vmatprep.mubr.bf16.mxu1 %v5922_v56 }
  0xee   : > { %5240 = vmatmul.mubr.msk.bf16.gmra.mrb[44].mxu0 %vm603_vm2, %v5770_v60 }
  0xef   : > { %5251 = vmatprep.mubr.msk.bf16.mxu0 %vm603_vm2, %v5692_v26  ;;  %v5406_v26 = vld [vmem:[%s7600_s1 + $0x1e8] sm:$0xff]  }
  0xf0   : > { %2129 = vmatmul.mubr.bf16.gmra.mrb[60].mxu1 %v5937_v57 }
  0xf1   : > { %2136 = vmatprep.mubr.bf16.mxu1 %v5941_v21 }
  0xf6   : > { %5252 = vmatmul.mubr.msk.bf16.vlgmr.msra.gmra.mrb[48].mxu0 %vm603_vm2, %v5694_v27  ;;  %v5409_v27 = vld [vmem:[%s7600_s1 + $0x1f0] sm:$0xff]  }
  0xf7   : > { %5044 = vmatpush3.bf16.msra.mxu0 %v5404_v33  ;;  %5255 = vmatprep.mubr.msk.bf16.mxu0 %vm603_vm2, %v5723_v39  ;;  %v5411_v39 = vld [vmem:[%s7600_s1 + $0x1f8] sm:$0xff]   ;;  %v5432_v33 = vld [vmem:[%s7600_s1 + $0x2a0] sm:$0xff]  }
  0xf8   : > { %5045 = vmatprep.subr.bf16.mxu0 %v5405_v12  ;;  %2137 = vmatmul.mubr.bf16.gmra.mrb[64].mxu1 %v5954_v4 }
  0xf9   : > { %2144 = vmatprep.mubr.bf16.mxu1 %v5957_v24 }
  0xfb   : > { %5046 = vmatpush3.bf16.msra.mxu0 %v5406_v26  ;;  %v5433_v26 = vld [vmem:[%s7600_s1 + $0x2e8] sm:$0xff]  }
  0xfc   : > { %5047 = vmatprep.subr.bf16.mxu0 %v5408_v5 }
  0xfe   : > { %5256 = vmatmul.mubr.msk.bf16.gmra.mrb[52].mxu0 %vm603_vm2, %v5730_v43  ;;  %v5413_v43 = vld [vmem:[%s7600_s1 + $0x200] sm:$0xff]  }
  0xff   : > { %5048 = vmatpush3.bf16.msra.mxu0 %v5409_v27  ;;  %5259 = vmatprep.mubr.msk.bf16.mxu0 %vm603_vm2, %v5761_v52  ;;  %v5415_v52 = vld [vmem:[%s7600_s1 + $0x208] sm:$0xff]  }
 0x100   : > { %5049 = vmatprep.subr.bf16.mxu0 %v5410_v6  ;;  %2145 = vmatmul.mubr.bf16.gmra.mrb[68].mxu1 %v5970_v29  ;;  %v5434_v27 = vld [vmem:[%s7600_s1 + $0x2a8] sm:$0xff]   ;;  %v5435_v6 = vld [vmem:[%s7600_s1 + $0x2f0] sm:$0xff]  }
 0x101   : > { %2152 = vmatprep.mubr.bf16.mxu1 %v5974_v15 }
 0x103   : > { %5050 = vmatpush3.bf16.msra.mxu0 %v5411_v39  ;;  %v2311_v39 = vld [vmem:[#allocation2 + $0x100] sm:$0xff] }
 0x104   : > { %5051 = vmatprep.subr.bf16.mxu0 %v5412_v17  ;;  %v5436_v17 = vld [vmem:[%s7600_s1 + $0x2b0] sm:$0xff]  }
 0x106   : > { %5260 = vmatmul.mubr.msk.bf16.gmra.mrb[56].mxu0 %vm603_vm2, %v5770_v60  ;;  %v5418_v60 = vld [vmem:[%s7600_s1 + $0x210] sm:$0xff]  }
 0x107   : > { %5052 = vmatpush3.bf16.msra.mxu0 %v5413_v43  ;;  %5263 = vmatprep.mubr.msk.bf16.mxu0 %vm603_vm2, %v5792_v7  ;;  %v5419_v7 = vld [vmem:[%s7600_s1 + $0x258] sm:$0xff]  }
 0x108   : > { %5053 = vmatprep.subr.bf16.mxu0 %v5414_v8  ;;  %2153 = vmatmul.mubr.bf16.gmra.mrb[72].mxu1 %v5985_v23  ;;  %v6140_v10 = vpop.f32.mrb[0].mxu1  ;;  %v5437_v43 = vld [vmem:[%s7600_s1 + $0x2f8] sm:$0xff]  }
 0x109   : > { %2160 = vmatprep.mubr.bf16.mxu1 %v6000_v36  ;;  %v6142_v11 = vpop.f32.mrb[1].mxu1  ;;  %v5438_v8 = vld [vmem:[%s7600_s1 + $0x2b8] sm:$0xff]  }
 0x10a   : > { %v5206_v13 = vpop.f32.mrb[2].mxu1 }
 0x10b   : > { %5054 = vmatpush3.bf16.msra.mxu0 %v5415_v52  ;;  %v1500_v18 = vpop.f32.mrb[3].mxu1 }
 0x10c   : > { %5055 = vmatprep.subr.bf16.mxu0 %v5417_v31 }
 0x10e   : > { %5264 = vmatmul.mubr.msk.bf16.gmra.mrb[60].mxu0 %vm603_vm2, %v6132_v9 }
 0x10f   : > { %5056 = vmatpush3.bf16.msra.mxu0 %v5418_v60  ;;  %2488 = vmatprep.mubr.bf16.mxu0 %v5881_v42  ;;  %v5430_v42 = vld [vmem:[%s7600_s1 + $0x308] sm:$0xff]  }
 0x110   : > { %5057 = vmatprep.subr.bf16.mxu0 %v5419_v7  ;;  %2161 = vmatmul.mubr.bf16.gmra.mrb[76].mxu1 %v5996_v34  ;;  %v6158_v20 = vpop.f32.mrb[4].mxu1 }
 0x111   : > { %5275 = vmatprep.mubr.msk.bf16.mxu1 %vm603_vm2, %v2290_v37  ;;  %v6160_v25 = vpop.f32.mrb[5].mxu1 }
 0x112   : > { %v5210_v32 = vpop.f32.mrb[6].mxu1 }
 0x113   : > { %5058 = vmatpush3.bf16.msra.mxu0 %v5420_v0  ;;  %v1516_v44 = vpop.f32.mrb[7].mxu1 }
 0x114   : > { %5291 = vmatprep.subr.bf16.mxu0 %v5421_v19 }
 0x116   : > { %2489 = vmatmul.mubr.bf16.vlgmr.msra.gmra.mrb[64].mxu0 %v5898_v38  ;;  %v5439_v38 = vld [vmem:[%s7600_s1 + $0x310] sm:$0xff]  }
 0x117   : > { %5292 = vmatpush3.bf16.msra.mxu0 %v5421_v19  ;;  %2496 = vmatprep.mubr.bf16.mxu0 %v5901_v53 }
 0x118   : > { %5293 = vmatprep.subr.bf16.mxu0 %v5430_v42  ;;  %5276 = vmatmul.mubr.msk.bf16.vlgmr.msra.gmra.mrb[80].mxu1 %vm603_vm2, %v6163_v28  ;;  %v6187_v47 = vpop.f32.mrb[8].mxu1 }
 0x119   : > { %5120 = vmatpush3.bf16.msra.mxu1 %v5423_v30  ;;  %5279 = vmatprep.mubr.msk.bf16.mxu1 %vm603_vm2, %v6172_v40  ;;  %v6192_v55 = vpop.f32.mrb[9].mxu1 }
 0x11a   : > { %5121 = vmatprep.subr.bf16.mxu1 %v5424_v35  ;;  %v5214_v41 = vpop.f32.mrb[10].mxu1 }
 0x11b   : > { %5294 = vmatpush3.bf16.msra.mxu0 %v5430_v42  ;;  %v1532_v59 = vpop.f32.mrb[11].mxu1 }
 0x11c   : > { %5295 = vmatprep.subr.bf16.mxu0 %v5439_v38 }
 0x11d   : > { %5122 = vmatpush3.bf16.msra.mxu1 %v5425_v45 }
 0x11e   : > { %2497 = vmatmul.mubr.bf16.gmra.mrb[68].mxu0 %v5919_v51  ;;  %5123 = vmatprep.subr.bf16.mxu1 %v5426_v46 }
 0x11f   : > { %2504 = vmatprep.mubr.bf16.mxu0 %v5922_v56  ;;  %5296 = vmatpush3.bf16.msra.mxu0 %v5439_v38 }
 0x120   : > { %5280 = vmatmul.mubr.msk.bf16.gmra.mrb[84].mxu1 %vm603_vm2, %v6195_v14  ;;  %5297 = vmatprep.subr.bf16.mxu0 %v5440_v49  ;;  %v6213_v63 = vpop.f32.mrb[12].mxu1 }
 0x121   : > { %5124 = vmatpush3.bf16.msra.mxu1 %v5427_v50  ;;  %5283 = vmatprep.mubr.msk.bf16.mxu1 %vm603_vm2, %v2302_v22  ;;  %v6215_v54 = vpop.f32.mrb[13].mxu1 }
 0x122   : > { %5125 = vmatprep.subr.bf16.mxu1 %v5428_v58  ;;  %v5218_v12 = vpop.f32.mrb[14].mxu1 }
 0x123   : > { %5298 = vmatpush3.bf16.msra.mxu0 %v5440_v49  ;;  %v1548_v5 = vpop.f32.mrb[15].mxu1 }
 0x125   : > { %5126 = vmatpush3.bf16.msra.mxu1 %v5429_v61 }
 0x126   : > { %2505 = vmatmul.mubr.bf16.gmra.mrb[72].mxu0 %v5937_v57  ;;  %5127 = vmatprep.subr.bf16.mxu1 %v5431_v62 }
 0x127   : > { %2512 = vmatprep.mubr.bf16.mxu0 %v5941_v21 }
 0x128   : > { %5284 = vmatmul.mubr.msk.bf16.gmra.mrb[88].mxu1 %vm603_vm2, %v2305_v16 }
 0x129   : > { %5128 = vmatpush3.bf16.msra.mxu1 %v5432_v33  ;;  %5287 = vmatprep.mubr.msk.bf16.mxu1 %vm603_vm2, %v6132_v9 }
 0x12a   : > { %5129 = vmatprep.subr.bf16.mxu1 %v5433_v26 }
 0x12d   : > { %5130 = vmatpush3.bf16.msra.mxu1 %v5434_v27 }
 0x12e   : > { %2513 = vmatmul.mubr.bf16.gmra.mrb[76].mxu0 %v5954_v4  ;;  %5131 = vmatprep.subr.bf16.mxu1 %v5435_v6 }
 0x12f   : > { %2520 = vmatprep.mubr.bf16.mxu0 %v5957_v24 }
 0x130   : > { %5288 = vmatmul.mubr.msk.bf16.gmra.mrb[92].mxu1 %vm603_vm2, %v2311_v39 }
 0x131   : > { %5132 = vmatpush3.bf16.msra.mxu1 %v5436_v17  ;;  %2872 = vmatprep.mubr.bf16.mxu1 %v5901_v53 }
 0x132   : > { %5133 = vmatprep.subr.bf16.mxu1 %v5437_v43 }
 0x135   : > { %5134 = vmatpush3.bf16.msra.mxu1 %v5438_v8 }
 0x136   : > { %2521 = vmatmul.mubr.bf16.gmra.mrb[80].mxu0 %v5970_v29 }
 0x137   : > { %2528 = vmatprep.mubr.bf16.mxu0 %v5974_v15 }
 0x138   : > { %2873 = vmatmul.mubr.bf16.vlgmr.msra.gmra.mrb[96].mxu1 %v5919_v51 }
 0x139   : > { %2880 = vmatprep.mubr.bf16.mxu1 %v5922_v56 }
 0x13e   : > { %2529 = vmatmul.mubr.bf16.gmra.mrb[84].mxu0 %v5985_v23 }
 0x13f   : > { %2536 = vmatprep.mubr.bf16.mxu0 %v6000_v36 }
 0x140   : > { %2881 = vmatmul.mubr.bf16.gmra.mrb[100].mxu1 %v5937_v57 }
 0x141   : > { %2888 = vmatprep.mubr.bf16.mxu1 %v5941_v21  ;;  %v2695_v21 = vld [vmem:[#allocation2 + $0x118] sm:$0xff] }
 0x146   : > { %2537 = vmatmul.mubr.bf16.gmra.mrb[88].mxu0 %v5996_v34 }
 0x147   : > { %2544 = vmatprep.mubr.bf16.mxu0 %v6023_v1 }
 0x148   : > { %2889 = vmatmul.mubr.bf16.gmra.mrb[104].mxu1 %v5954_v4 }
 0x149   : > { %2896 = vmatprep.mubr.bf16.mxu1 %v5957_v24 }
 0x14e   : > { %2545 = vmatmul.mubr.bf16.gmra.mrb[92].mxu0 %v6019_v48 }
 0x14f   : > { %5299 = vmatprep.mubr.msk.bf16.mxu0 %vm603_vm2, %v6163_v28 }
 0x150   : > { %2897 = vmatmul.mubr.bf16.gmra.mrb[108].mxu1 %v5970_v29 }
 0x151   : > { %2904 = vmatprep.mubr.bf16.mxu1 %v5974_v15 }
 0x156   : > { %5300 = vmatmul.mubr.msk.bf16.vlgmr.msra.gmra.mrb[96].mxu0 %vm603_vm2, %v6172_v40 }
 0x157   : > { %5303 = vmatprep.mubr.msk.bf16.mxu0 %vm603_vm2, %v6195_v14 }
 0x158   : > { %2905 = vmatmul.mubr.bf16.gmra.mrb[112].mxu1 %v5985_v23 }
 0x159   : > { %2912 = vmatprep.mubr.bf16.mxu1 %v6000_v36 }
 0x15e   : > { %5304 = vmatmul.mubr.msk.bf16.gmra.mrb[100].mxu0 %vm603_vm2, %v2302_v22 }
 0x15f   : > { %5307 = vmatprep.mubr.msk.bf16.mxu0 %vm603_vm2, %v2305_v16 }
 0x160   : > { %2913 = vmatmul.mubr.bf16.gmra.mrb[116].mxu1 %v5996_v34 }
 0x161   : > { %2920 = vmatprep.mubr.bf16.mxu1 %v6023_v1 }
 0x166   : > { %5308 = vmatmul.mubr.msk.bf16.gmra.mrb[104].mxu0 %vm603_vm2, %v6132_v9 }
 0x167   : > { %5311 = vmatprep.mubr.msk.bf16.mxu0 %vm603_vm2, %v2311_v39 }
 0x168   : > { %2921 = vmatmul.mubr.bf16.gmra.mrb[120].mxu1 %v6019_v48 }
 0x169   : > { %v4831_v53 = vpop.f32.mrb[0].mxu0  ;;  %2928 = vmatprep.mubr.bf16.mxu1 %v6072_v3 }
 0x16a   : > { %v4832_v51 = vpop.f32.mrb[1].mxu0 }
 0x16b   : > { %v4833_v56 = vadd.f32 %v4832_v51, %v4831_v53  ;;  %v4834_v57 = vpop.f32.mrb[2].mxu0  ;;  %v4907_v4 = vpop.f32.mrb[16].mxu1 }
 0x16c   : > { %v4835_v24 = vpop.f32.mrb[3].mxu0  ;;  %v4908_v15 = vpop.f32.mrb[17].mxu1 }
 0x16d   : > { %v1498_v29 = vadd.f32 %v4833_v56, %v6142_v11  ;;  %v4909_v23 = vadd.f32 %v4908_v15, %v4907_v4  ;;  %v4910_v34 = vpop.f32.mrb[18].mxu1 }
 0x16e   : > { %5312 = vmatmul.mubr.msk.bf16.gmra.mrb[108].mxu0 %vm603_vm2, %v2695_v21  ;;  %v4911_v36 = vpop.f32.mrb[19].mxu1 }
 0x16f   : > { %v6281_v1 = vadd.f32 %v4909_v23, %v1498_v29 }
 0x170   : > { %2929 = vmatmul.mubr.bf16.gmra.mrb[124].mxu1 %v6067_v2 }
 0x171   : > { %v4837_v48 = vpop.f32.mrb[4].mxu0 }
 0x172   : > { %v4838_v52 = vpop.f32.mrb[5].mxu0 }
 0x173   : > { %v4839_v3 = vadd.f32 %v4838_v52, %v4837_v48  ;;  %v4840_v31 = vpop.f32.mrb[6].mxu0  ;;  %v4913_v9 = vpop.f32.mrb[20].mxu1 }
 0x174   : > { %v4841_v60 = vpop.f32.mrb[7].mxu0  ;;  %v4914_v13 = vpop.f32.mrb[21].mxu1 }
 0x175   : > { %v1506_v7 = vadd.f32 %v6140_v10, %v4839_v3  ;;  %v4915_v11 = vadd.f32 %v4914_v13, %v4913_v9  ;;  %v4916_v0 = vpop.f32.mrb[22].mxu1 }
 0x176   : > { %v4917_v37 = vpop.f32.mrb[23].mxu1 }
 0x177   : > { %v6285_v18 = vadd.f32 %v4915_v11, %v1506_v7 }
 0x179   : > { %v4843_v19 = vpop.f32.mrb[8].mxu0 }
 0x17a   : > { %v4844_v42 = vpop.f32.mrb[9].mxu0 }
 0x17b   : > { %v4845_v28 = vadd.f32 %v4844_v42, %v4843_v19  ;;  %v4846_v30 = vpop.f32.mrb[10].mxu0  ;;  %v4919_v32 = vpop.f32.mrb[24].mxu1 }
 0x17c   : > { %v4847_v2 = vpop.f32.mrb[11].mxu0  ;;  %v4920_v40 = vpop.f32.mrb[25].mxu1 }
 0x17d   : > { %v1514_v35 = vadd.f32 %v4845_v28, %v6160_v25  ;;  %v4921_v44 = vadd.f32 %v4920_v40, %v4919_v32  ;;  %v4922_v38 = vpop.f32.mrb[26].mxu1  ;;  %v5462_v32 = vmov 0.0  }
 0x17e   : > { %v4923_v45 = vpop.f32.mrb[27].mxu1  ;;  %727 = vst.msk [vmem:[#allocation3 + $0x18] sm:$0xff] %vm603_vm2, %v5462_v32  ;;  %728 = vst.msk [vmem:[#allocation3 + $0x20] sm:$0xff] %vm603_vm2, %v5462_v32 }
 0x17f   : > { %v6288_v46 = vadd.f32 %v4921_v44, %v1514_v35  ;;  %3107 = vst.msk [vmem:[#allocation3 + $0x30] sm:$0xff] %vm603_vm2, %v5462_v32  ;;  %724 = vst.msk [vmem:[#allocation3] sm:$0xff] %vm603_vm2, %v5462_v32 }
 0x180   : > { %725 = vst.msk [vmem:[#allocation3 + $0x8] sm:$0xff] %vm603_vm2, %v5462_v32  ;;  %726 = vst.msk [vmem:[#allocation3 + $0x10] sm:$0xff] %vm603_vm2, %v5462_v32 }
 0x181   : > { %v4849_v10 = vpop.f32.mrb[12].mxu0  ;;  %729 = vst.msk [vmem:[#allocation3 + $0xa8] sm:$0xff] %vm603_vm2, %v5462_v32  ;;  %730 = vst.msk [vmem:[#allocation3 + $0xb0] sm:$0xff] %vm603_vm2, %v5462_v32 }
 0x182   : > { %v4850_v49 = vpop.f32.mrb[13].mxu0  ;;  %731 = vst.msk [vmem:[#allocation3 + $0xb8] sm:$0xff] %vm603_vm2, %v5462_v32  ;;  %732 = vst.msk [vmem:[#allocation3 + $0xc0] sm:$0xff] %vm603_vm2, %v5462_v32 }
 0x183   : > { %v4851_v14 = vadd.f32 %v4850_v49, %v4849_v10  ;;  %v4852_v50 = vpop.f32.mrb[14].mxu0  ;;  %v4925_v41 = vpop.f32.mrb[28].mxu1  ;;  %733 = vst.msk [vmem:[#allocation3 + $0xc8] sm:$0xff] %vm603_vm2, %v5462_v32  ;;  %3109 = vst.msk [vmem:[#allocation3 + $0x40] sm:$0xff] %vm603_vm2, %v5462_v32 }
 0x184   : > { %v4853_v58 = vpop.f32.mrb[15].mxu0  ;;  %v4926_v59 = vpop.f32.mrb[29].mxu1  ;;  %3111 = vst.msk [vmem:[#allocation3 + $0x50] sm:$0xff] %vm603_vm2, %v5462_v32  ;;  %3113 = vst.msk [vmem:[#allocation3 + $0x60] sm:$0xff] %vm603_vm2, %v5462_v32 }
 0x185   : > { %v1522_v22 = vadd.f32 %v6158_v20, %v4851_v14  ;;  %v4927_v61 = vadd.f32 %v4926_v59, %v4925_v41  ;;  %v4928_v62 = vpop.f32.mrb[30].mxu1  ;;  %3115 = vst.msk [vmem:[#allocation3 + $0x70] sm:$0xff] %vm603_vm2, %v5462_v32  ;;  %3117 = vst.msk [vmem:[#allocation3 + $0x80] sm:$0xff] %vm603_vm2, %v5462_v32 }
 0x186   : > { %v4929_v16 = vpop.f32.mrb[31].mxu1  ;;  %3119 = vst.msk [vmem:[#allocation3 + $0x90] sm:$0xff] %vm603_vm2, %v5462_v32  ;;  %3121 = vst.msk [vmem:[#allocation3 + $0xa0] sm:$0xff] %vm603_vm2, %v5462_v32 }
 0x187   : > { %v6291_v33 = vadd.f32 %v4927_v61, %v1522_v22 }
 0x189   : > { %v4855_v25 = vpop.f32.mrb[16].mxu0 }
 0x18a   : > { %v4856_v12 = vpop.f32.mrb[17].mxu0 }
 0x18b   : > { %v4857_v26 = vadd.f32 %v4856_v12, %v4855_v25  ;;  %v4858_v5 = vpop.f32.mrb[18].mxu0  ;;  %v4931_v27 = vpop.f32.mrb[32].mxu1 }
 0x18c   : > { %v4859_v6 = vpop.f32.mrb[19].mxu0  ;;  %v4932_v17 = vpop.f32.mrb[33].mxu1 }
 0x18d   : > { %v1530_v39 = vadd.f32 %v4857_v26, %v6192_v55  ;;  %v4933_v43 = vadd.f32 %v4932_v17, %v4931_v27  ;;  %v4934_v8 = vpop.f32.mrb[34].mxu1 }
 0x18e   : > { %v4935_v53 = vpop.f32.mrb[35].mxu1 }
 0x18f   : > { %v6294_v51 = vadd.f32 %v4933_v43, %v1530_v39 }
 0x191   : > { %v4861_v20 = vpop.f32.mrb[20].mxu0 }
 0x192   : > { %v4862_v56 = vpop.f32.mrb[21].mxu0 }
 0x193   : > { %v4863_v57 = vadd.f32 %v4862_v56, %v4861_v20  ;;  %v4864_v21 = vpop.f32.mrb[22].mxu0  ;;  %v4937_v4 = vpop.f32.mrb[36].mxu1 }
 0x194   : > { %v4865_v24 = vpop.f32.mrb[23].mxu0  ;;  %v4938_v15 = vpop.f32.mrb[37].mxu1 }
 0x195   : > { %v1538_v29 = vadd.f32 %v6187_v47, %v4863_v57  ;;  %v4939_v23 = vadd.f32 %v4938_v15, %v4937_v4  ;;  %v4940_v34 = vpop.f32.mrb[38].mxu1 }
 0x196   : > { %v4941_v36 = vpop.f32.mrb[39].mxu1 }
 0x197   : > { %v6297_v48 = vadd.f32 %v4939_v23, %v1538_v29 }
 0x199   : > { %v4867_v55 = vpop.f32.mrb[24].mxu0 }
 0x19a   : > { %v4868_v52 = vpop.f32.mrb[25].mxu0 }
 0x19b   : > { %v4869_v3 = vadd.f32 %v4868_v52, %v4867_v55  ;;  %v4870_v31 = vpop.f32.mrb[26].mxu0  ;;  %v4943_v9 = vpop.f32.mrb[40].mxu1 }
 0x19c   : > { %v4871_v60 = vpop.f32.mrb[27].mxu0  ;;  %v4944_v13 = vpop.f32.mrb[41].mxu1 }
 0x19d   : > { %v1546_v7 = vadd.f32 %v4869_v3, %v6215_v54  ;;  %v4945_v11 = vadd.f32 %v4944_v13, %v4943_v9  ;;  %v4946_v0 = vpop.f32.mrb[42].mxu1 }
 0x19e   : > { %v4947_v37 = vpop.f32.mrb[43].mxu1 }
 0x19f   : > { %v6300_v19 = vadd.f32 %v4945_v11, %v1546_v7 }
 0x1a1   : > { %v4873_v47 = vpop.f32.mrb[28].mxu0 }
 0x1a2   : > { %v4874_v42 = vpop.f32.mrb[29].mxu0 }
 0x1a3   : > { %v4875_v28 = vadd.f32 %v4874_v42, %v4873_v47  ;;  %v4876_v30 = vpop.f32.mrb[30].mxu0  ;;  %v4949_v54 = vpop.f32.mrb[44].mxu1 }
 0x1a4   : > { %v4877_v2 = vpop.f32.mrb[31].mxu0  ;;  %v4950_v40 = vpop.f32.mrb[45].mxu1 }
 0x1a5   : > { %v1554_v35 = vadd.f32 %v6213_v63, %v4875_v28  ;;  %v4951_v44 = vadd.f32 %v4950_v40, %v4949_v54  ;;  %v4952_v38 = vpop.f32.mrb[46].mxu1 }
 0x1a6   : > { %v4953_v45 = vpop.f32.mrb[47].mxu1 }
 0x1a7   : > { %v1795_v10 = vadd.f32 %v4951_v44, %v1554_v35 }
 0x1a9   : > { %v5229_v49 = vpop.f32.mrb[32].mxu0 }
 0x1aa   : > { %v1844_v14 = vadd.f32 %v5229_v49, %v6285_v18  ;;  %v1835_v50 = vpop.f32.mrb[33].mxu0 }
 0x1ab   : > { %v1836_v41 = vadd.f32 %v1835_v50, %v6281_v1  ;;  %v5230_v58 = vpop.f32.mrb[34].mxu0  ;;  %v4983_v22 = vpop.f32.mrb[48].mxu1 }
 0x1ac   : > { %v1838_v59 = vpop.f32.mrb[35].mxu0  ;;  %v4984_v61 = vpop.f32.mrb[49].mxu1 }
 0x1ad   : > { %v4985_v62 = vadd.f32 %v4984_v61, %v4983_v22  ;;  %v4986_v16 = vpop.f32.mrb[50].mxu1 }
 0x1ae   : > { %v4987_v25 = vpop.f32.mrb[51].mxu1 }
 0x1b1   : > { %v5233_v12 = vpop.f32.mrb[36].mxu0 }
 0x1b2   : > { %v1860_v63 = vadd.f32 %v5233_v12, %v6291_v33  ;;  %v1851_v26 = vpop.f32.mrb[37].mxu0 }
 0x1b3   : > { %v1852_v5 = vadd.f32 %v1851_v26, %v6288_v46  ;;  %v5234_v27 = vpop.f32.mrb[38].mxu0  ;;  %v4989_v6 = vpop.f32.mrb[52].mxu1 }
 0x1b4   : > { %v1854_v39 = vpop.f32.mrb[39].mxu0  ;;  %v4990_v18 = vpop.f32.mrb[53].mxu1 }
 0x1b5   : > { %v4991_v17 = vadd.f32 %v4990_v18, %v4989_v6  ;;  %v4992_v43 = vpop.f32.mrb[54].mxu1 }
 0x1b6   : > { %v4993_v1 = vpop.f32.mrb[55].mxu1 }
 0x1b9   : > { %v5237_v8 = vpop.f32.mrb[40].mxu0 }
 0x1ba   : > { %v1876_v53 = vadd.f32 %v5237_v8, %v6297_v48  ;;  %v1867_v20 = vpop.f32.mrb[41].mxu0 }
 0x1bb   : > { %v1868_v56 = vadd.f32 %v1867_v20, %v6294_v51  ;;  %v5238_v57 = vpop.f32.mrb[42].mxu0  ;;  %v4995_v21 = vpop.f32.mrb[56].mxu1 }
 0x1bc   : > { %v1870_v4 = vpop.f32.mrb[43].mxu0  ;;  %v4996_v33 = vpop.f32.mrb[57].mxu1 }
 0x1bd   : > { %v4997_v24 = vadd.f32 %v4996_v33, %v4995_v21  ;;  %v4998_v29 = vpop.f32.mrb[58].mxu1 }
 0x1be   : > { %v4999_v46 = vpop.f32.mrb[59].mxu1 }
 0x1c1   : > { %v5241_v15 = vpop.f32.mrb[44].mxu0 }
 0x1c2   : > { %v1892_v23 = vadd.f32 %v5241_v15, %v1795_v10  ;;  %v1883_v34 = vpop.f32.mrb[45].mxu0 }
 0x1c3   : > { %v1884_v36 = vadd.f32 %v1883_v34, %v6300_v19  ;;  %v5242_v55 = vpop.f32.mrb[46].mxu0  ;;  %v5001_v52 = vpop.f32.mrb[60].mxu1 }
 0x1c4   : > { %v1886_v3 = vpop.f32.mrb[47].mxu0  ;;  %v5002_v31 = vpop.f32.mrb[61].mxu1 }
 0x1c5   : > { %v5003_v48 = vadd.f32 %v5002_v31, %v5001_v52  ;;  %v5004_v9 = vpop.f32.mrb[62].mxu1 }
 0x1c6   : > { %v5005_v60 = vpop.f32.mrb[63].mxu1 }
 0x1c9   : > { %v5253_v51 = vpop.f32.mrb[48].mxu0 }
 0x1ca   : > { %v2212_v7 = vadd.f32 %v5253_v51, %v4991_v17  ;;  %v2203_v13 = vpop.f32.mrb[49].mxu0 }
 0x1cb   : > { %v2204_v11 = vadd.f32 %v4985_v62, %v2203_v13  ;;  %v5254_v0 = vpop.f32.mrb[50].mxu0  ;;  %v5007_v37 = vpop.f32.mrb[64].mxu1 }
 0x1cc   : > { %v6328_v47 = vadd.f32 %v2212_v7, %v1844_v14  ;;  %v2206_v42 = vpop.f32.mrb[51].mxu0  ;;  %v5008_v28 = vpop.f32.mrb[65].mxu1 }
 0x1cd   : > { %v2266_v30 = vadd.f32 %v2204_v11, %v1836_v41  ;;  %v5009_v32 = vadd.f32 %v5008_v28, %v5007_v37  ;;  %v5010_v19 = vpop.f32.mrb[66].mxu1 }
 0x1ce   : > { %v5011_v54 = vpop.f32.mrb[67].mxu1 }
 0x1d1   : > { %v5257_v2 = vpop.f32.mrb[52].mxu0 }
 0x1d2   : > { %v2228_v35 = vadd.f32 %v5257_v2, %v5003_v48  ;;  %v2219_v40 = vpop.f32.mrb[53].mxu0 }
 0x1d3   : > { %v2220_v44 = vadd.f32 %v4997_v24, %v2219_v40  ;;  %v5258_v38 = vpop.f32.mrb[54].mxu0  ;;  %v5013_v45 = vpop.f32.mrb[68].mxu1 }
 0x1d4   : > { %v6330_v10 = vadd.f32 %v2228_v35, %v1860_v63  ;;  %v2222_v49 = vpop.f32.mrb[55].mxu0  ;;  %v5014_v50 = vpop.f32.mrb[69].mxu1 }
 0x1d5   : > { %v2270_v58 = vadd.f32 %v2220_v44, %v1852_v5  ;;  %v5015_v22 = vadd.f32 %v5014_v50, %v5013_v45  ;;  %v5016_v14 = vpop.f32.mrb[70].mxu1 }
 0x1d6   : > { %v5017_v59 = vpop.f32.mrb[71].mxu1 }
 0x1d9   : > { %v5261_v61 = vpop.f32.mrb[56].mxu0 }
 0x1da   : > { %v2244_v62 = vadd.f32 %v5261_v61, %v5015_v22  ;;  %v2235_v41 = vpop.f32.mrb[57].mxu0 }
 0x1db   : > { %v2236_v16 = vadd.f32 %v5009_v32, %v2235_v41  ;;  %v5262_v25 = vpop.f32.mrb[58].mxu0  ;;  %v5019_v12 = vpop.f32.mrb[72].mxu1 }
 0x1dc   : > { %v6332_v26 = vadd.f32 %v2244_v62, %v1876_v53  ;;  %v2238_v27 = vpop.f32.mrb[59].mxu0  ;;  %v5020_v6 = vpop.f32.mrb[73].mxu1 }
 0x1dd   : > { %v6334_v39 = vadd.f32 %v2236_v16, %v1868_v56  ;;  %v5021_v63 = vadd.f32 %v5020_v6, %v5019_v12  ;;  %v5022_v18 = vpop.f32.mrb[74].mxu1  ;;  %v3140_v12 = vlaneseq }
 0x1de   : > { %v5023_v17 = vpop.f32.mrb[75].mxu1 }
 0x1df   : > { %v6352_v17 = vshrl.u32 %v3140_v12, 7 }
 0x1e1   : > { %v5265_v43 = vpop.f32.mrb[60].mxu0 }
 0x1e2   : > { %v2251_v5 = vpop.f32.mrb[61].mxu0 }
 0x1e3   : > { %v2252_v1 = vadd.f32 %v5021_v63, %v2251_v5  ;;  %v5266_v8 = vpop.f32.mrb[62].mxu0  ;;  %v5025_v20 = vpop.f32.mrb[76].mxu1 }
 0x1e4   : > { %v2254_v57 = vpop.f32.mrb[63].mxu0  ;;  %v5026_v21 = vpop.f32.mrb[77].mxu1 }
 0x1e5   : > { %v6336_v4 = vadd.f32 %v2252_v1, %v1884_v36  ;;  %v5027_v33 = vadd.f32 %v5026_v21, %v5025_v20  ;;  %v5028_v24 = vpop.f32.mrb[78].mxu1  ;;  %v6355_v21 = vsub.s32 0, %v6352_v17 }
 0x1e6   : > { %v5029_v53 = vpop.f32.mrb[79].mxu1 }
 0x1e7   : > { %v2260_v29 = vadd.f32 %v5265_v43, %v5027_v33  ;;  %v6358_v33 = vsub.s32 1, %v6352_v17  ;;  %v6365_v53 = vld [vmem:[%s7602_s3] sm:$0xff] }
 0x1e9   : > { %v5059_v46 = vpop.f32.mrb[64].mxu0  ;;  %v6338_v15 = vadd.f32 %v2260_v29, %v1892_v23 }
 0x1ea   : > { %v5060_v56 = vpop.f32.mrb[65].mxu0 }
 0x1eb   : > { %v5061_v34 = vadd.f32 %v5060_v56, %v5059_v46  ;;  %v5062_v55 = vpop.f32.mrb[66].mxu0  ;;  %v5277_v52 = vpop.f32.mrb[80].mxu1  ;;  %v6371_v56 = vsub.s32 2, %v6352_v17 }
 0x1ec   : > { %v5063_v3 = vpop.f32.mrb[67].mxu0  ;;  %v2587_v31 = vpop.f32.mrb[81].mxu1  ;;  %v6375_v55 = vrot.slane %v6365_v53, %v6355_v21 }
 0x1ed   : > { %v2588_v48 = vadd.f32 %v5061_v34, %v2587_v31  ;;  %v5278_v9 = vpop.f32.mrb[82].mxu1  ;;  %v3124_v31 = vld [vmem:[#allocation3 + $0x6] sm:$0xff] }
 0x1ee   : > { %v2590_v60 = vpop.f32.mrb[83].mxu1  ;;  %7689 = vst [vmem:[#allocation5_spill] sm:$0xff] %v6375_v55 }
 0x1ef   : > { %v6340_v51 = vadd.f32 %v2588_v48, %v2266_v30  ;;  %v3178_v48 = vld [vmem:[#allocation3 + $0x7] sm:$0xff] }
 0x1f1   : > { %v5065_v36 = vpop.f32.mrb[68].mxu0 }
 0x1f2   : > { %v5066_v7 = vpop.f32.mrb[69].mxu0 }
 0x1f3   : > { %v5067_v13 = vadd.f32 %v5066_v7, %v5065_v36  ;;  %v5068_v11 = vpop.f32.mrb[70].mxu0  ;;  %v5281_v37 = vpop.f32.mrb[84].mxu1  ;;  %v6383_v7 = vrot.slane %v6365_v53, %v6371_v56 }
 0x1f4   : > { %v5069_v0 = vpop.f32.mrb[71].mxu0  ;;  %v2603_v23 = vpop.f32.mrb[85].mxu1 }
 0x1f5   : > { %v2596_v42 = vadd.f32 %v5277_v52, %v5067_v13  ;;  %v5282_v28 = vpop.f32.mrb[86].mxu1  ;;  %v6379_v52 = vrot.slane %v6365_v53, %v6358_v33  ;;  %7691 = vst [vmem:[#allocation7_spill] sm:$0xff] %v6383_v7  ;;  %v6386_v0 = vsub.s32 3, %v6352_v17 }
 0x1f6   : > { %v2606_v32 = vpop.f32.mrb[87].mxu1 }
 0x1f7   : > { %v6343_v19 = vadd.f32 %v2596_v42, %v6328_v47  ;;  %7690 = vst [vmem:[#allocation6_spill] sm:$0xff] %v6379_v52  ;;  %v3198_v42 = vmul.f32 %v6379_v52, %v3178_v48  ;;  %v3232_v32 = vld [vmem:[#allocation3 + $0x8] sm:$0xff] }
 0x1f9   : > { %v5071_v54 = vpop.f32.mrb[72].mxu0 }
 0x1fa   : > { %v5072_v2 = vpop.f32.mrb[73].mxu0 }
 0x1fb   : > { %v5073_v35 = vadd.f32 %v5072_v2, %v5071_v54  ;;  %v5074_v40 = vpop.f32.mrb[74].mxu0  ;;  %v5285_v30 = vpop.f32.mrb[88].mxu1 }
 0x1fc   : > { %v5075_v44 = vpop.f32.mrb[75].mxu0  ;;  %v2619_v45 = vpop.f32.mrb[89].mxu1 }
 0x1fd   : > { %v2604_v38 = vadd.f32 %v5073_v35, %v2603_v23  ;;  %v5286_v49 = vpop.f32.mrb[90].mxu1  ;;  %v6396_v35 = vsub.s32 4, %v6352_v17  ;;  %v6400_v44 = vrot.slane %v6365_v53, %v6386_v0 }
 0x1fe   : > { %v2622_v50 = vpop.f32.mrb[91].mxu1  ;;  %v3286_v49 = vld [vmem:[#allocation3 + $0x9] sm:$0xff] }
 0x1ff   : > { %v6345_v22 = vadd.f32 %v2604_v38, %v2270_v58  ;;  %v3252_v38 = vmul.f32 %v6383_v7, %v3232_v32 }
 0x201   : > { %v5077_v14 = vpop.f32.mrb[76].mxu0 }
 0x202   : > { %v5078_v59 = vpop.f32.mrb[77].mxu0 }
 0x203   : > { %v5079_v61 = vadd.f32 %v5078_v59, %v5077_v14  ;;  %v5080_v62 = vpop.f32.mrb[78].mxu0  ;;  %v6347_v16 = vpop.f32.mrb[92].mxu1 }
 0x204   : > { %v5081_v41 = vpop.f32.mrb[79].mxu0  ;;  %v2635_v25 = vpop.f32.mrb[93].mxu1  ;;  %v3125_v62 = vld [vmem:[#allocation3 + $0xe] sm:$0xff] }
 0x205   : > { %v2612_v47 = vadd.f32 %v5281_v37, %v5079_v61  ;;  %v5290_v27 = vpop.f32.mrb[94].mxu1  ;;  %v3144_v37 = vmul.f32 %v6375_v55, %v3124_v31  ;;  %v3179_v41 = vld [vmem:[#allocation3 + $0xf] sm:$0xff] }
 0x206   : > { %v2638_v6 = vpop.f32.mrb[95].mxu1  ;;  %v6408_v27 = vsub.s32 5, %v6352_v17 }
 0x207   : > { %v6350_v63 = vadd.f32 %v2612_v47, %v6330_v10 }
 0x209   : > { %v5083_v18 = vpop.f32.mrb[80].mxu0 }
 0x20a   : > { %v5084_v58 = vpop.f32.mrb[81].mxu0 }
 0x20b   : > { %v5085_v43 = vadd.f32 %v5084_v58, %v5083_v18  ;;  %v5086_v5 = vpop.f32.mrb[82].mxu0  ;;  %v5135_v1 = vpop.f32.mrb[96].mxu1  ;;  %v3306_v18 = vmul.f32 %v6400_v44, %v3286_v49  ;;  %v3448_v49 = vld [vmem:[#allocation3 + $0x17] sm:$0xff] }
 0x20c   : > { %v5087_v8 = vpop.f32.mrb[83].mxu0  ;;  %v5136_v57 = vpop.f32.mrb[97].mxu1  ;;  %v3340_v5 = vld [vmem:[#allocation3 + $0xa] sm:$0xff] }
 0x20d   : > { %v2620_v20 = vadd.f32 %v5085_v43, %v2619_v45  ;;  %v6360_v24 = vadd.f32 %v5136_v57, %v5135_v1  ;;  %v5138_v10 = vpop.f32.mrb[98].mxu1  ;;  %v3199_v57 = vmul.f32 %v6379_v52, %v3179_v41  ;;  %v3341_v41 = vld [vmem:[#allocation3 + $0x12] sm:$0xff] }
 0x20e   : > { %v5139_v29 = vpop.f32.mrb[99].mxu1  ;;  %v3233_v10 = vld [vmem:[#allocation3 + $0x10] sm:$0xff] }
 0x20f   : > { %v6368_v46 = vadd.f32 %v2620_v20, %v6334_v39  ;;  %v3145_v20 = vmul.f32 %v6375_v55, %v3125_v62  ;;  %v3181_v62 = vld [vmem:[#allocation3 + $0x1f] sm:$0xff] }
 0x211   : > { %v5089_v34 = vpop.f32.mrb[84].mxu0 }
 0x212   : > { %v5090_v3 = vpop.f32.mrb[85].mxu0 }
 0x213   : > { %v5091_v9 = vadd.f32 %v5090_v3, %v5089_v34  ;;  %v5092_v60 = vpop.f32.mrb[86].mxu0  ;;  %v5141_v36 = vpop.f32.mrb[100].mxu1  ;;  %v6423_v34 = vrot.slane %v6365_v53, %v6408_v27 }
 0x214   : > { %v5093_v39 = vpop.f32.mrb[87].mxu0  ;;  %v5142_v11 = vpop.f32.mrb[101].mxu1 }
 0x215   : > { %v2628_v13 = vadd.f32 %v5285_v30, %v5091_v9  ;;  %v6390_v23 = vadd.f32 %v5142_v11, %v5141_v36  ;;  %v5144_v28 = vpop.f32.mrb[102].mxu1  ;;  %v3214_v30 = vadd.f32 %v3198_v42, %v3144_v37  ;;  %v3394_v9 = vld [vmem:[#allocation3 + $0x16] sm:$0xff]  ;;  %v3215_v36 = vadd.f32 %v3199_v57, %v3145_v20  ;;  %v6455_v20 = vld [vmem:[%s7601_s2] ss:$0 sm:$0xff] }
 0x216   : > { %v5145_v54 = vpop.f32.mrb[103].mxu1  ;;  %v3253_v39 = vmul.f32 %v6383_v7, %v3233_v10  ;;  %v3287_v42 = vld [vmem:[#allocation3 + $0x11] sm:$0xff] }
 0x217   : > { %v6393_v2 = vadd.f32 %v2628_v13, %v6332_v26  ;;  %v6405_v26 = vrot.slane %v6365_v53, %v6396_v35  ;;  %v3268_v6 = vadd.f32 %v3252_v38, %v3214_v30  ;;  %v6434_v30 = vsub.s32 7, %v6352_v17 }
 0x219   : > { %v5095_v40 = vpop.f32.mrb[88].mxu0  ;;  %v3322_v3 = vadd.f32 %v3306_v18, %v3268_v6  ;;  %v3360_v31 = vmul.f32 %v6405_v26, %v3340_v5  ;;  %v6450_v5 = vld [vmem:[%s7602_s3 + $0x8] sm:$0xff] }
 0x21a   : > { %v5096_v45 = vpop.f32.mrb[89].mxu0 }
 0x21b   : > { %v5097_v50 = vadd.f32 %v5096_v45, %v5095_v40  ;;  %v5098_v14 = vpop.f32.mrb[90].mxu0  ;;  %v5147_v59 = vpop.f32.mrb[104].mxu1  ;;  %v3376_v54 = vadd.f32 %v3360_v31, %v3322_v3  ;;  %v3414_v40 = vmul.f32 %v6423_v34, %v3394_v9 }
 0x21c   : > { %v5099_v61 = vpop.f32.mrb[91].mxu0  ;;  %v5148_v12 = vpop.f32.mrb[105].mxu1 }
 0x21d   : > { %v2636_v47 = vadd.f32 %v5097_v50, %v2635_v25  ;;  %v6411_v58 = vadd.f32 %v5148_v12, %v5147_v59  ;;  %v5150_v43 = vpop.f32.mrb[106].mxu1  ;;  %v6419_v25 = vsub.s32 6, %v6352_v17  ;;  %v3269_v59 = vadd.f32 %v3253_v39, %v3215_v36 }
 0x21e   : > { %v5151_v1 = vpop.f32.mrb[107].mxu1  ;;  %v3307_v61 = vmul.f32 %v6400_v44, %v3287_v42  ;;  %v3430_v12 = vadd.f32 %v3414_v40, %v3376_v54  ;;  %v6443_v17 = vrot.slane %v6365_v53, %v6434_v30  ;;  %v6467_v42 = vrot.slane %v6450_v5, %v6355_v21  ;;  %v3556_v54 = vld [vmem:[#allocation3 + $0x19] sm:$0xff] }
 0x21f   : > { %v6414_v8 = vadd.f32 %v2636_v47, %v6336_v4  ;;  %v6429_v37 = vrot.slane %v6365_v53, %v6419_v25  ;;  %v3127_v47 = vld [vmem:[#allocation3 + $0x1e] sm:$0xff]  ;;  %v3201_v53 = vmul.f32 %v6379_v52, %v3181_v62 }
 0x220   : > { %7692 = vst [vmem:[#allocation8_spill] sm:$0xff] %v6443_v17  ;;  %v3502_v1 = vld [vmem:[#allocation3 + $0x18] sm:$0xff] }
 0x221   : > { %v5101_v29 = vpop.f32.mrb[92].mxu0  ;;  %v3468_v6 = vmul.f32 %v6429_v37, %v3448_v49 }
 0x222   : > { %v5102_v48 = vpop.f32.mrb[93].mxu0 }
 0x223   : > { %v5103_v4 = vadd.f32 %v5102_v48, %v5101_v29  ;;  %v5104_v60 = vpop.f32.mrb[94].mxu0  ;;  %v5153_v13 = vpop.f32.mrb[108].mxu1  ;;  %v3361_v29 = vmul.f32 %v6405_v26, %v3341_v41  ;;  %v3254_v41 = vmul.f32 %v3502_v1, %v6383_v7 }
 0x224   : > { %v5105_v11 = vpop.f32.mrb[95].mxu0  ;;  %v5154_v32 = vpop.f32.mrb[109].mxu1  ;;  %v3200_v60 = vmul.f32 %v3448_v49, %v6379_v52 }
 0x225   : > { %v2644_v28 = vadd.f32 %v6347_v16, %v5103_v4  ;;  %v5155_v38 = vadd.f32 %v5154_v32, %v5153_v13  ;;  %v5156_v45 = vpop.f32.mrb[110].mxu1  ;;  %v3146_v4 = vmul.f32 %v3394_v9, %v6375_v55  ;;  %v3235_v13 = vld [vmem:[#allocation3 + $0x20] sm:$0xff]  ;;  %v3484_v11 = vadd.f32 %v3468_v6, %v3430_v12 }
 0x226   : > { %v5157_v14 = vpop.f32.mrb[111].mxu1 }
 0x227   : > { %v6437_v50 = vadd.f32 %v2644_v28, %v6338_v15  ;;  %v3147_v15 = vmul.f32 %v6375_v55, %v3127_v47 }
 0x229   : > { %v5301_v16 = vpop.f32.mrb[96].mxu0  ;;  %v3217_v40 = vadd.f32 %v3201_v53, %v3147_v15 }
 0x22a   : > { %v2980_v18 = vadd.f32 %v5301_v16, %v6390_v23  ;;  %v2971_v43 = vpop.f32.mrb[97].mxu0  ;;  %v3323_v23 = vadd.f32 %v3307_v61, %v3269_v59  ;;  %v3255_v59 = vmul.f32 %v6383_v7, %v3235_v13  ;;  %v3216_v61 = vadd.f32 %v3200_v60, %v3146_v4 }
 0x22b   : > { %v2972_v57 = vadd.f32 %v6360_v24, %v2971_v43  ;;  %v5302_v10 = vpop.f32.mrb[98].mxu0  ;;  %v5159_v3 = vpop.f32.mrb[112].mxu1  ;;  %v3522_v24 = vmul.f32 %v6443_v17, %v3502_v1  ;;  %v6479_v43 = vrot.slane %v6450_v5, %v6358_v33  ;;  %v6486_v1 = vrot.slane %v6450_v5, %v6371_v56 }
 0x22c   : > { %v3036_v31 = vadd.f32 %v2980_v18, %v6343_v19  ;;  %v2974_v48 = vpop.f32.mrb[99].mxu0  ;;  %v5160_v36 = vpop.f32.mrb[113].mxu1  ;;  %v3377_v49 = vadd.f32 %v3361_v29, %v3323_v23  ;;  %v3576_v18 = vmul.f32 %v6467_v42, %v3556_v54  ;;  %v3469_v29 = vmul.f32 %v6429_v37, %v3181_v62 }
 0x22d   : > { %v3034_v39 = vadd.f32 %v2972_v57, %v6340_v51  ;;  %v6470_v32 = vadd.f32 %v5160_v36, %v5159_v3  ;;  %v5162_v19 = vpop.f32.mrb[114].mxu1  ;;  %v3415_v51 = vmul.f32 %v6423_v34, %v3127_v47  ;;  %v3538_v6 = vadd.f32 %v3522_v24, %v3484_v11  ;;  %v3610_v47 = vld [vmem:[#allocation3 + $0x1a] sm:$0xff]  ;;  %7693 = vst [vmem:[#allocation9_spill] sm:$0xff] %v6486_v1  ;;  %v3237_v3 = vld [vmem:[#allocation3 + $0x30] sm:$0xff] }
 0x22e   : > { %v3058_v28 = vadd.f32 %v6455_v20, %v3036_v31  ;;  %v5163_v45 = vpop.f32.mrb[115].mxu1  ;;  %v6489_v31 = vadd.f32 %v3255_v59, %v3217_v40  ;;  %v3270_v60 = vadd.f32 %v3254_v41, %v3216_v61  ;;  %v3308_v36 = vmul.f32 %v3556_v54, %v6400_v44 }
 0x22f   : > { %v3056_v9 = vadd.f32 %v6455_v20, %v3034_v39  ;;  %v3431_v23 = vadd.f32 %v3415_v51, %v3377_v49  ;;  %v3592_v11 = vadd.f32 %v3576_v18, %v3538_v6  ;;  %v3630_v24 = vmul.f32 %v6479_v43, %v3610_v47 }
 0x230   : > { %v3074_v14 = vmax.f32 %v3058_v28, 0.0  ;;  %v6497_v28 = vrot.slane %v6450_v5, %v6386_v0  ;;  %v6505_v54 = vrot.slane %v6450_v5, %v6396_v35  ;;  %v6512_v40 = vmul.f32 %v6383_v7, %v3237_v3 }
 0x231   : > { %v3072_v16 = vmax.f32 %v3056_v9, 0.0  ;;  %v5305_v12 = vpop.f32.mrb[100].mxu0  ;;  %v3485_v51 = vadd.f32 %v3469_v29, %v3431_v23  ;;  %v6518_v61 = vrot.slane %v6450_v5, %v6419_v25  ;;  %v3324_v41 = vadd.f32 %v3308_v36, %v3270_v60  ;;  %v6556_v36 = vld [vmem:[#allocation3 + $0x50] sm:$0xff] }
 0x232   : > { %3108 = vst.msk [vmem:[#allocation3 + $0x38] sm:$0xff] %vm603_vm2, %v3074_v14  ;;  %v2996_v15 = vadd.f32 %v5305_v12, %v5155_v38  ;;  %v2987_v57 = vpop.f32.mrb[101].mxu0  ;;  %7694 = vst [vmem:[#allocation10_spill] sm:$0xff] %v6505_v54  ;;  %v3523_v14 = vmul.f32 %v6443_v17, %v3235_v13  ;;  %v3646_v18 = vadd.f32 %v3630_v24, %v3592_v11  ;;  %v6575_v24 = vld [vmem:[#allocation3 + $0x60] sm:$0xff] }
 0x233   : > { %3106 = vst.msk [vmem:[#allocation3 + $0x28] sm:$0xff] %vm603_vm2, %v3072_v16  ;;  %v2988_v53 = vadd.f32 %v6411_v58, %v2987_v57  ;;  %v5306_v10 = vpop.f32.mrb[102].mxu0  ;;  %v5165_v48 = vpop.f32.mrb[116].mxu1  ;;  %v3362_v16 = vmul.f32 %v3610_v47, %v6405_v26  ;;  %v6554_v60 = vmul.f32 %v6505_v54, %v3237_v3  ;;  %7699 = vst [vmem:[#allocation15_spill] sm:$0xff] %v6556_v36 }
 0x234   : > { %v3040_v38 = vadd.f32 %v2996_v15, %v6350_v63  ;;  %v2990_v4 = vpop.f32.mrb[103].mxu0  ;;  %v5166_v39 = vpop.f32.mrb[117].mxu1  ;;  %v937_v63 = vld [vmem:[%s7602_s3 + $0x10] sm:$0xff]  ;;  %v6523_v15 = vrot.slane %v6450_v5, %v6434_v30  ;;  %7704 = vst [vmem:[#allocation20_spill] sm:$0xff] %v6575_v24 }
 0x235   : > { %v3038_v58 = vadd.f32 %v2988_v53, %v6345_v22  ;;  %v5167_v19 = vadd.f32 %v5166_v39, %v5165_v48  ;;  %v5168_v9 = vpop.f32.mrb[118].mxu1  ;;  %v6509_v22 = vrot.slane %v6450_v5, %v6408_v27  ;;  %v6526_v57 = vrot.slane %v937_v63, %v6355_v21 }
 0x236   : > { %v3062_v62 = vadd.f32 %v6455_v20, %v3040_v38  ;;  %v5169_v49 = vpop.f32.mrb[119].mxu1  ;;  %v6530_v10 = vrot.slane %v937_v63, %v6358_v33  ;;  %v6533_v23 = vrot.slane %v937_v63, %v6371_v56  ;;  %v6536_v47 = vrot.slane %v937_v63, %v6386_v0  ;;  %v4041_v38 = vld [vmem:[#allocation3 + $0x40] sm:$0xff] }
 0x237   : > { %v3060_v45 = vadd.f32 %v6455_v20, %v3038_v58  ;;  %v6540_v29 = vrot.slane %v937_v63, %v6396_v35  ;;  %v6543_v21 = vrot.slane %v937_v63, %v6408_v27  ;;  %v6546_v48 = vrot.slane %v937_v63, %v6419_v25 }
 0x238   : > { %v3078_v59 = vmax.f32 %v3062_v62, 0.0  ;;  %7695 = vst [vmem:[#allocation11_spill] sm:$0xff] %v6530_v10  ;;  %7696 = vst [vmem:[#allocation12_spill] sm:$0xff] %v6533_v23  ;;  %v6548_v33 = vadd.f32 %v3523_v14, %v3485_v51  ;;  %v6551_v0 = vrot.slane %v937_v63, %v6434_v30  ;;  %v6558_v35 = vadd.f32 %v3362_v16, %v3324_v41 }
 0x239   : > { %v3076_v12 = vmax.f32 %v3060_v45, 0.0  ;;  %v5309_v6 = vpop.f32.mrb[104].mxu0  ;;  %7697 = vst [vmem:[#allocation13_spill] sm:$0xff] %v6536_v47  ;;  %7698 = vst [vmem:[#allocation14_spill] sm:$0xff] %v6546_v48  ;;  %v6561_v27 = vmul.f32 %v6443_v17, %v3237_v3  ;;  %v6566_v58 = vmul.f32 %v6530_v10, %v4041_v38  ;;  %v6570_v30 = vmul.f32 %v6546_v48, %v6556_v36  ;;  %v6599_v16 = vld [vmem:[#allocation3 + $0x36] sm:$0xff] }
 0x23a   : > { %3112 = vst.msk [vmem:[#allocation3 + $0x58] sm:$0xff] %vm603_vm2, %v3078_v59  ;;  %v3012_v13 = vadd.f32 %v5309_v6, %v5167_v19  ;;  %v3003_v53 = vpop.f32.mrb[105].mxu0  ;;  %v6563_v25 = vld [vmem:[#allocation3 + $0x26] sm:$0xff]  ;;  %v6573_v11 = vmul.f32 %v4041_v38, %v6505_v54  ;;  %v6578_v62 = vmul.f32 %v4041_v38, %v6443_v17  ;;  %v6584_v9 = vmul.f32 %v6556_v36, %v6530_v10  ;;  %v6605_v6 = vld [vmem:[#allocation3 + $0x70] sm:$0xff] }
 0x23b   : > { %3110 = vst.msk [vmem:[#allocation3 + $0x48] sm:$0xff] %vm603_vm2, %v3076_v12  ;;  %v5310_v5 = vpop.f32.mrb[106].mxu0  ;;  %v5171_v56 = vpop.f32.mrb[120].mxu1  ;;  %7700 = vst [vmem:[#allocation16_spill] sm:$0xff] %v6561_v27  ;;  %v6580_v3 = vld [vmem:[#allocation3 + $0x27] sm:$0xff]  ;;  %v6588_v63 = vmul.f32 %v6546_v48, %v6575_v24  ;;  %v6592_v45 = vmul.f32 %v6556_v36, %v6505_v54  ;;  %v6595_v49 = vmul.f32 %v4041_v38, %v6383_v7 }
 0x23c   : > { %v3006_v4 = vpop.f32.mrb[107].mxu0  ;;  %v5172_v39 = vpop.f32.mrb[121].mxu1  ;;  %7701 = vst [vmem:[#allocation17_spill] sm:$0xff] %v6566_v58  ;;  %7702 = vst [vmem:[#allocation18_spill] sm:$0xff] %v6570_v30  ;;  %v3044_v51 = vadd.f32 %v3012_v13, %v6393_v2  ;;  %v3004_v59 = vadd.f32 %v6470_v32, %v3003_v53  ;;  %v6603_v12 = vmul.f32 %v6575_v24, %v6530_v10  ;;  %v3129_v53 = vld [vmem:[#allocation3 + $0x2e] sm:$0xff] }
 0x23d   : > { %7703 = vst [vmem:[#allocation19_spill] sm:$0xff] %v6573_v11  ;;  %7705 = vst [vmem:[#allocation21_spill] sm:$0xff] %v6578_v62  ;;  %v5174_v19 = vpop.f32.mrb[122].mxu1  ;;  %v5173_v14 = vadd.f32 %v5172_v39, %v5171_v56  ;;  %v3684_v5 = vmul.f32 %v6486_v1, %v6563_v25  ;;  %v6609_v4 = vld [vmem:[#allocation3 + $0x37] sm:$0xff]  ;;  %v6613_v2 = vmul.f32 %v6546_v48, %v6605_v6  ;;  %v6627_v39 = vld [vmem:[#allocation3 + $0x28] sm:$0xff] }
 0x23e   : > { %7706 = vst [vmem:[#allocation22_spill] sm:$0xff] %v6584_v9  ;;  %7707 = vst [vmem:[#allocation23_spill] sm:$0xff] %v6588_v63  ;;  %v5175_v41 = vpop.f32.mrb[123].mxu1  ;;  %v6617_v32 = vmul.f32 %v6556_v36, %v6443_v17  ;;  %v6621_v13 = vmul.f32 %v6575_v24, %v6505_v54  ;;  %v3148_v38 = vmul.f32 %v6375_v55, %v6563_v25  ;;  %v6649_v30 = vld [vmem:[#allocation3 + $0x2a] sm:$0xff] }
 0x23f   : > { %7708 = vst [vmem:[#allocation24_spill] sm:$0xff] %v6592_v45  ;;  %7709 = vst [vmem:[#allocation25_spill] sm:$0xff] %v6595_v49  ;;  %v3202_v56 = vmul.f32 %v6379_v52, %v6580_v3  ;;  %v3066_v19 = vadd.f32 %v6455_v20, %v3044_v51  ;;  %v3042_v41 = vadd.f32 %v3004_v59, %v6368_v46  ;;  %v3289_v51 = vld [vmem:[#allocation3 + $0x21] sm:$0xff]  ;;  %v6643_v45 = vld [vmem:[#allocation3 + $0x29] sm:$0xff] }
 0x240   : > { %7710 = vst [vmem:[#allocation26_spill] sm:$0xff] %v6603_v12  ;;  %7711 = vst [vmem:[#allocation27_spill] sm:$0xff] %v6605_v6  ;;  %v6631_v12 = vld [vmem:[#allocation3 + $0x38] sm:$0xff]  ;;  %v3738_v63 = vmul.f32 %v6497_v28, %v6580_v3  ;;  %v3952_v49 = vmul.f32 %v6523_v15, %v6599_v16  ;;  %v6641_v36 = vmul.f32 %v6605_v6, %v6530_v10 }
 0x241   : > { %7712 = vst [vmem:[#allocation28_spill] sm:$0xff] %v6609_v4  ;;  %7713 = vst [vmem:[#allocation29_spill] sm:$0xff] %v6613_v2  ;;  %v5313_v2 = vpop.f32.mrb[108].mxu0  ;;  %v3082_v46 = vmax.f32 %v3066_v19, 0.0  ;;  %v3064_v59 = vadd.f32 %v6455_v20, %v3042_v41  ;;  %v4060_v19 = vmul.f32 %v6530_v10, %v6631_v12  ;;  %v3256_v10 = vmul.f32 %v6383_v7, %v6627_v39 }
 0x242   : > { %7714 = vst [vmem:[#allocation30_spill] sm:$0xff] %v6617_v32  ;;  %7715 = vst [vmem:[#allocation31_spill] sm:$0xff] %v6621_v13  ;;  %v6633_v32 = vld [vmem:[#allocation3 + $0x2f] sm:$0xff]  ;;  %v3019_v24 = vpop.f32.mrb[109].mxu0  ;;  %v3700_v13 = vadd.f32 %v3684_v5, %v3646_v18  ;;  %v4006_v18 = vmul.f32 %v6526_v57, %v6609_v4  ;;  %v3149_v5 = vmul.f32 %v6375_v55, %v3129_v53 }
 0x243   : > { %7716 = vst [vmem:[#allocation32_spill] sm:$0xff] %v6641_v36  ;;  %v3020_v9 = vadd.f32 %v5173_v14, %v3019_v24  ;;  %v5314_v62 = vpop.f32.mrb[110].mxu0  ;;  %v5177_v11 = vpop.f32.mrb[124].mxu1  ;;  %v3790_v36 = vmul.f32 %v6505_v54, %v6627_v39  ;;  %v3203_v24 = vmul.f32 %v6379_v52, %v6633_v32  ;;  %v3343_v14 = vld [vmem:[#allocation3 + $0x22] sm:$0xff]  ;;  %3116 = vst.msk [vmem:[#allocation3 + $0x78] sm:$0xff] %vm603_vm2, %v3082_v46  ;;  %v3080_v41 = vmax.f32 %v3064_v59, 0.0 }
 0x244   : > { %v3022_v58 = vpop.f32.mrb[111].mxu0  ;;  %v3754_v27 = vadd.f32 %v3738_v63, %v3700_v13  ;;  %v3218_v62 = vadd.f32 %v3202_v56, %v3148_v38  ;;  %v5178_v6 = vpop.f32.mrb[125].mxu1  ;;  %v3844_v13 = vmul.f32 %v6509_v22, %v6643_v45  ;;  %v3577_v54 = vmul.f32 %v6467_v42, %v3289_v51 }
 0x245   : > { %v3046_v55 = vadd.f32 %v3020_v9, %v6414_v8  ;;  %v5179_v4 = vadd.f32 %v5178_v6, %v5177_v11  ;;  %v5180_v58 = vpop.f32.mrb[126].mxu1  ;;  %v3309_v38 = vmul.f32 %v6400_v44, %v3289_v51  ;;  %3114 = vst.msk [vmem:[#allocation3 + $0x68] sm:$0xff] %vm603_vm2, %v3080_v41  ;;  %v3898_v8 = vmul.f32 %v6518_v61, %v6649_v30 }
 0x246   : > { %v3806_v63 = vadd.f32 %v3790_v36, %v3754_v27  ;;  %v5181_v46 = vpop.f32.mrb[127].mxu1  ;;  %v3593_v27 = vadd.f32 %v3577_v54, %v6548_v33  ;;  %v3631_v9 = vmul.f32 %v6479_v43, %v3343_v14  ;;  %v3272_v6 = vadd.f32 %v3256_v10, %v3218_v62 }
 0x247   : > { %v3068_v56 = vadd.f32 %v6455_v20, %v3046_v55  ;;  %v3028_v11 = vadd.f32 %v5313_v2, %v5179_v4  ;;  %v3416_v59 = vmul.f32 %v6423_v34, %v6563_v25  ;;  %v3417_v51 = vmul.f32 %v6423_v34, %v3129_v53 }
 0x248   : > { %v3860_v36 = vadd.f32 %v3844_v13, %v3806_v63  ;;  %v3647_v46 = vadd.f32 %v3631_v9, %v3593_v27  ;;  %v3685_v7 = vmul.f32 %v6486_v1, %v3129_v53  ;;  %v3219_v52 = vadd.f32 %v3203_v24, %v3149_v5  ;;  %v6688_v24 = vld [vmem:[#allocation3 + $0x39] sm:$0xff]  ;;  %v6711_v27 = vld [vmem:[#allocation3 + $0x48] sm:$0xff] }
 0x249   : > { %v3084_v58 = vmax.f32 %v3068_v56, 0.0  ;;  %v3048_v41 = vadd.f32 %v3028_v11, %v6437_v50  ;;  %v3310_v4 = vmul.f32 %v6400_v44, %v6643_v45  ;;  %v3325_v54 = vadd.f32 %v3309_v38, %v6489_v31  ;;  %7717 = vst [vmem:[#allocation33_spill] sm:$0xff] %v6688_v24  ;;  %v6690_v31 = vld [vmem:[#allocation3 + $0x31] sm:$0xff]  ;;  %v6695_v63 = vld [vmem:[#allocation3 + $0x3a] sm:$0xff] }
 0x24a   : > { %v3914_v55 = vadd.f32 %v3898_v8, %v3860_v36  ;;  %v3363_v10 = vmul.f32 %v6405_v26, %v3343_v14  ;;  %v3701_v2 = vadd.f32 %v3685_v7, %v3647_v46  ;;  %v3739_v50 = vmul.f32 %v6497_v28, %v6633_v32  ;;  %7718 = vst [vmem:[#allocation34_spill] sm:$0xff] %v6695_v63  ;;  %v6700_v8 = vld [vmem:[#allocation3 + $0x46] sm:$0xff] }
 0x24b   : > { %3118 = vst.msk [vmem:[#allocation3 + $0x88] sm:$0xff] %vm603_vm2, %v3084_v58  ;;  %v3070_v33 = vadd.f32 %v6455_v20, %v3048_v41  ;;  %v3326_v62 = vadd.f32 %v3310_v4, %v3272_v6  ;;  %v3364_v53 = vmul.f32 %v6405_v26, %v6649_v30  ;;  %v3470_v5 = vmul.f32 %v6429_v37, %v6580_v3  ;;  %v6702_v3 = vld [vmem:[#allocation3 + $0x32] sm:$0xff]  ;;  %v6709_v36 = vld [vmem:[#allocation3 + $0x47] sm:$0xff]  ;;  %v6720_v6 = vld [vmem:[#allocation3 + $0x3e] sm:$0xff] }
 0x24c   : > { %v3968_v25 = vadd.f32 %v3952_v49, %v3914_v55  ;;  %v3432_v14 = vadd.f32 %v3416_v59, %v6558_v35  ;;  %v3471_v20 = vmul.f32 %v6429_v37, %v6633_v32  ;;  %v3755_v13 = vadd.f32 %v3739_v50, %v3701_v2  ;;  %v6727_v58 = vld [vmem:[%s7602_s3 + $0x18] ss:$0 sm:$0xff]  ;;  %v6731_v55 = vld [vmem:[#allocation3 + $0x49] sm:$0xff] }
 0x24d   : > { %v3086_v7 = vmax.f32 %v3070_v33, 0.0  ;;  %v6698_v38 = vadd.f32 %v6512_v40, %v3219_v52  ;;  %v3379_v56 = vadd.f32 %v3363_v10, %v3325_v54  ;;  %v3524_v35 = vmul.f32 %v6443_v17, %v6627_v39  ;;  %v6733_v46 = vld [vmem:[#allocation3 + $0x4a] sm:$0xff]  ;;  %v6741_v33 = vld [vmem:[#allocation3 + $0x3f] sm:$0xff] }
 0x24e   : > { %v4022_v49 = vadd.f32 %v4006_v18, %v3968_v25  ;;  %v3486_v11 = vadd.f32 %v3470_v5, %v3432_v14  ;;  %v4114_v18 = vmul.f32 %v6533_v23, %v6688_v24  ;;  %v3807_v52 = vadd.f32 %v6554_v60, %v3755_v13  ;;  %v6747_v5 = vld [vmem:[#allocation3 + $0x41] sm:$0xff] }
 0x24f   : > { %3120 = vst.msk [vmem:[#allocation3 + $0x98] sm:$0xff] %vm603_vm2, %v3086_v7  ;;  %v3845_v40 = vmul.f32 %v6509_v22, %v6690_v31  ;;  %v6716_v9 = vadd.f32 %v3364_v53, %v3326_v62  ;;  %v4168_v39 = vmul.f32 %v6536_v47, %v6695_v63  ;;  %v3578_v59 = vmul.f32 %v6467_v42, %v6643_v45  ;;  %v6749_v14 = vld [vmem:[#allocation3 + $0x42] sm:$0xff] }
 0x250   : > { %v4076_v32 = vadd.f32 %v4060_v19, %v4022_v49  ;;  %v3540_v19 = vadd.f32 %v3524_v35, %v3486_v11  ;;  %v4222_v41 = vmul.f32 %v6540_v29, %v6700_v8  ;;  %v3899_v54 = vmul.f32 %v6518_v61, %v6702_v3 }
 0x251   : > { %v3861_v4 = vadd.f32 %v3845_v40, %v3807_v52  ;;  %v4276_v45 = vmul.f32 %v6543_v21, %v6709_v36  ;;  %v4330_v10 = vmul.f32 %v6546_v48, %v6711_v27  ;;  %v3632_v2 = vmul.f32 %v6479_v43, %v6649_v30  ;;  %v6759_v52 = vld [vmem:[#allocation3 + $0x4e] sm:$0xff] }
 0x252   : > { %v4130_v60 = vadd.f32 %v4114_v18, %v4076_v32  ;;  %v3594_v25 = vadd.f32 %v3578_v59, %v3540_v19  ;;  %v3953_v53 = vmul.f32 %v6523_v15, %v6720_v6  ;;  %v3433_v7 = vadd.f32 %v3417_v51, %v3379_v56  ;;  %7719 = vst [vmem:[#allocation35_spill] sm:$0xff] %v6759_v52  ;;  %v6761_v40 = vld [vmem:[#allocation3 + $0x4f] sm:$0xff] }
 0x253   : > { %v3915_v62 = vadd.f32 %v3899_v54, %v3861_v4  ;;  %v4384_v49 = vmul.f32 %v6551_v0, %v6731_v55  ;;  %v4438_v13 = vmul.f32 %v6727_v58, %v6733_v46  ;;  %v3686_v30 = vmul.f32 %v6599_v16, %v6486_v1  ;;  %7720 = vst [vmem:[#allocation36_spill] sm:$0xff] %v6761_v40  ;;  %v7721_v59 = vld [vmem:[#allocation28_spill] sm:$0xff]  ;;  %v6769_v54 = vld [vmem:[#allocation3 + $0x51] sm:$0xff] }
 0x254   : > { %v4184_v50 = vadd.f32 %v4168_v39, %v4130_v60  ;;  %v3648_v11 = vadd.f32 %v3632_v2, %v3594_v25  ;;  %v4007_v18 = vmul.f32 %v6526_v57, %v6741_v33  ;;  %v3487_v51 = vadd.f32 %v3471_v20, %v3433_v7  ;;  %7722 = vst [vmem:[#allocation28_spill] sm:$0xff] %v6769_v54  ;;  %v7723_v25 = vld [vmem:[#allocation16_spill] sm:$0xff]  ;;  %v7724_v7 = vld [vmem:[#allocation10_spill] sm:$0xff] }
 0x255   : > { %v3969_v32 = vadd.f32 %v3953_v53, %v3915_v62  ;;  %v4115_v56 = vmul.f32 %v6533_v23, %v6747_v5  ;;  %v4169_v39 = vmul.f32 %v6536_v47, %v6749_v14  ;;  %v3740_v60 = vmul.f32 %v7721_v59, %v6497_v28 }
 0x256   : > { %v4238_v35 = vadd.f32 %v4222_v41, %v4184_v50  ;;  %v3702_v19 = vadd.f32 %v3686_v30, %v3648_v11  ;;  %v3541_v2 = vadd.f32 %v7723_v25, %v3487_v51  ;;  %v3579_v50 = vmul.f32 %v6690_v31, %v6467_v42 }
 0x257   : > { %v4023_v4 = vadd.f32 %v4007_v18, %v3969_v32  ;;  %v4223_v20 = vmul.f32 %v6540_v29, %v6759_v52  ;;  %v4277_v62 = vmul.f32 %v6543_v21, %v6761_v40  ;;  %v3792_v11 = vmul.f32 %v6631_v12, %v7724_v7 }
 0x258   : > { %v4292_v41 = vadd.f32 %v4276_v45, %v4238_v35  ;;  %v3756_v53 = vadd.f32 %v3740_v60, %v3702_v19  ;;  %v7725_v45 = vld [vmem:[#allocation17_spill] sm:$0xff]  ;;  %v3595_v32 = vadd.f32 %v3579_v50, %v3541_v2  ;;  %v3633_v18 = vmul.f32 %v6702_v3, %v6479_v43 }
 0x259   : > { %v4077_v35 = vadd.f32 %v7725_v45, %v4023_v4  ;;  %v4385_v51 = vmul.f32 %v6551_v0, %v6769_v54  ;;  %v3846_v17 = vmul.f32 %v6688_v24, %v6509_v22  ;;  %v3311_v19 = vmul.f32 %v6690_v31, %v6400_v44 }
 0x25a   : > { %v4346_v30 = vadd.f32 %v4330_v10, %v4292_v41  ;;  %v3808_v25 = vadd.f32 %v3792_v11, %v3756_v53  ;;  %v3649_v7 = vadd.f32 %v3633_v18, %v3595_v32  ;;  %v3687_v10 = vmul.f32 %v6720_v6, %v6486_v1  ;;  %v6791_v41 = vld [vmem:[#allocation3 + $0x52] sm:$0xff] }
 0x25b   : > { %v4131_v48 = vadd.f32 %v4115_v56, %v4077_v35  ;;  %7726 = vst [vmem:[#allocation16_spill] sm:$0xff] %v6791_v41  ;;  %v3900_v2 = vmul.f32 %v6695_v63, %v6518_v61  ;;  %v3327_v50 = vadd.f32 %v3311_v19, %v6698_v38  ;;  %v3365_v53 = vmul.f32 %v6702_v3, %v6405_v26 }
 0x25c   : > { %v4400_v60 = vadd.f32 %v4384_v49, %v4346_v30  ;;  %v3862_v4 = vadd.f32 %v3846_v17, %v3808_v25  ;;  %v3703_v31 = vadd.f32 %v3687_v10, %v3649_v7  ;;  %v3741_v49 = vmul.f32 %v6741_v33, %v6497_v28  ;;  %v6809_v7 = vld [vmem:[#allocation3 + $0x56] sm:$0xff] }
 0x25d   : > { %v4185_v45 = vadd.f32 %v4169_v39, %v4131_v48  ;;  %v3954_v30 = vmul.f32 %v6700_v8, %v6523_v15  ;;  %v3381_v35 = vadd.f32 %v3365_v53, %v3327_v50  ;;  %v3419_v17 = vmul.f32 %v6720_v6, %v6423_v34 }
 0x25e   : > { %v4454_v11 = vadd.f32 %v4438_v13, %v4400_v60  ;;  %v3916_v56 = vadd.f32 %v3900_v2, %v3862_v4  ;;  %v4439_v3 = vmul.f32 %v6727_v58, %v6791_v41  ;;  %v3757_v13 = vadd.f32 %v3741_v49, %v3703_v31  ;;  %v7727_v60 = vld [vmem:[#allocation11_spill] sm:$0xff]  ;;  %v7729_v49 = vld [vmem:[#allocation18_spill] sm:$0xff] }
 0x25f   : > { %v4239_v38 = vadd.f32 %v4223_v20, %v4185_v45  ;;  %v4008_v39 = vmul.f32 %v6709_v36, %v6526_v57  ;;  %v3435_v18 = vadd.f32 %v3419_v17, %v3381_v35  ;;  %v3473_v25 = vmul.f32 %v6741_v33, %v6429_v37  ;;  %v6815_v20 = vld [vmem:[#allocation3 + $0x57] sm:$0xff]  ;;  %v7728_v4 = vld [vmem:[#allocation19_spill] sm:$0xff] }
 0x260   : > { %v4470_v32 = vsel %vm603_vm2, %v4454_v11, 0.0  ;;  %v3970_v48 = vadd.f32 %v3954_v30, %v3916_v56  ;;  %v4062_v10 = vmul.f32 %v6711_v27, %v7727_v60  ;;  %v3809_v2 = vadd.f32 %v7728_v4, %v3757_v13  ;;  %v6854_v60 = vld [vmem:[#allocation3 + $0x5a] sm:$0xff] }
 0x261   : > { %4471 = vadd.xlane.f32.xlu0 %v4470_v32  ;;  %v4293_v19 = vadd.f32 %v4277_v62, %v4239_v38  ;;  %v3847_v50 = vmul.f32 %v6747_v5, %v6509_v22  ;;  %v4116_v11 = vmul.f32 %v6731_v55, %v6533_v23  ;;  %v4170_v45 = vmul.f32 %v6733_v46, %v6536_v47  ;;  %v7730_v38 = vld [vmem:[#allocation21_spill] sm:$0xff] }
 0x262   : > { %v4024_v53 = vadd.f32 %v4008_v39, %v3970_v48  ;;  %v3489_v31 = vadd.f32 %v3473_v25, %v3435_v18  ;;  %v4224_v56 = vmul.f32 %v6540_v29, %v6809_v7  ;;  %v3901_v35 = vmul.f32 %v6749_v14, %v6518_v61  ;;  %v6834_v18 = vld [vmem:[#allocation3 + $0x58] sm:$0xff]  ;;  %7733 = vst [vmem:[#allocation19_spill] sm:$0xff] %v6854_v60 }
 0x263   : > { %v4347_v62 = vadd.f32 %v7729_v49, %v4293_v19  ;;  %v3863_v30 = vadd.f32 %v3847_v50, %v3809_v2  ;;  %v4278_v32 = vmul.f32 %v6543_v21, %v6815_v20  ;;  %v3581_v48 = vmul.f32 %v6747_v5, %v6467_v42  ;;  %v6844_v49 = vld [vmem:[#allocation3 + $0x59] sm:$0xff] }
 0x264   : > { %v4078_v17 = vadd.f32 %v4062_v10, %v4024_v53  ;;  %v3543_v13 = vadd.f32 %v7730_v38, %v3489_v31  ;;  %v3955_v19 = vmul.f32 %v6759_v52, %v6523_v15  ;;  %v3418_v4 = vmul.f32 %v6599_v16, %v6423_v34  ;;  %7731 = vst [vmem:[#allocation17_spill] sm:$0xff] %v6844_v49  ;;  %v7732_v38 = vld [vmem:[#allocation14_spill] sm:$0xff] }
 0x265   : > { %v4401_v39 = vadd.f32 %v4385_v51, %v4347_v62  ;;  %v3917_v25 = vadd.f32 %v3901_v35, %v3863_v30  ;;  %v4009_v10 = vmul.f32 %v6761_v40, %v6526_v57  ;;  %v3635_v53 = vmul.f32 %v6749_v14, %v6479_v43 }
 0x266   : > { %v4132_v2 = vadd.f32 %v4116_v11, %v4078_v17  ;;  %v3597_v50 = vadd.f32 %v3581_v48, %v3543_v13  ;;  %v3434_v62 = vadd.f32 %v3418_v4, %v6716_v9  ;;  %v3472_v30 = vmul.f32 %v7721_v59, %v6429_v37  ;;  %v6860_v4 = vld [vmem:[#allocation3 + $0x5e] sm:$0xff] }
 0x267   : > { %v4455_v31 = vadd.f32 %v4439_v3, %v4401_v39  ;;  %v3971_v51 = vadd.f32 %v3955_v19, %v3917_v25  ;;  %v4332_v11 = vmul.f32 %v7732_v38, %v6834_v18  ;;  %v3689_v13 = vmul.f32 %v6759_v52, %v6486_v1  ;;  %v7734_v25 = vld [vmem:[#allocation8_spill] sm:$0xff]  ;;  %7735 = vst [vmem:[#allocation18_spill] sm:$0xff] %v6860_v4 }
 0x268   : > { %v4186_v35 = vadd.f32 %v4170_v45, %v4132_v2  ;;  %v3651_v17 = vadd.f32 %v3635_v53, %v3597_v50  ;;  %v3488_v39 = vadd.f32 %v3472_v30, %v3434_v62  ;;  %v3526_v9 = vmul.f32 %v6631_v12, %v7734_v25  ;;  %v7736_v53 = vld [vmem:[#allocation22_spill] sm:$0xff] }
 0x269   : > { %v4473_v48 = vsel %vm603_vm2, %v4455_v31, 0.0  ;;  %v4025_v3 = vadd.f32 %v4009_v10, %v3971_v51  ;;  %v4386_v45 = vmul.f32 %v6551_v0, %v6844_v49  ;;  %v3743_v50 = vmul.f32 %v6761_v40, %v6497_v28  ;;  %v6867_v51 = vld [vmem:[#allocation3 + $0x5f] sm:$0xff] }
 0x26a   : > { %4474 = vadd.xlane.f32.xlu1 %v4473_v48  ;;  %v4240_v19 = vadd.f32 %v4224_v56, %v4186_v35  ;;  %v3705_v2 = vadd.f32 %v3689_v13, %v3651_v17  ;;  %v4117_v10 = vmul.f32 %v6769_v54, %v6533_v23  ;;  %v3542_v62 = vadd.f32 %v3526_v9, %v3488_v39 }
 0x26b   : > { %v4079_v31 = vadd.f32 %v7736_v53, %v4025_v3  ;;  %v3580_v56 = vmul.f32 %v6688_v24, %v6467_v42  ;;  %v4440_v35 = vmul.f32 %v6727_v58, %v6854_v60  ;;  %v4171_v17 = vmul.f32 %v6791_v41, %v6536_v47 }
 0x26c   : > { %v4294_v30 = vadd.f32 %v4278_v32, %v4240_v19  ;;  %v3759_v13 = vadd.f32 %v3743_v50, %v3705_v2  ;;  %v4225_v3 = vmul.f32 %v6540_v29, %v6860_v4  ;;  %v3634_v49 = vmul.f32 %v6695_v63, %v6479_v43  ;;  %v7737_v32 = vld [vmem:[#allocation24_spill] sm:$0xff] }
 0x26d   : > { %v4133_v48 = vadd.f32 %v4117_v10, %v4079_v31  ;;  %v3596_v53 = vadd.f32 %v3580_v56, %v3542_v62  ;;  %v4279_v9 = vmul.f32 %v6543_v21, %v6867_v51  ;;  %v3849_v60 = vmul.f32 %v6769_v54, %v6509_v22  ;;  %v7738_v56 = vld [vmem:[#allocation5_spill] sm:$0xff] }
 0x26e   : > { %v4348_v39 = vadd.f32 %v4332_v11, %v4294_v30  ;;  %v3811_v19 = vadd.f32 %v7737_v32, %v3759_v13  ;;  %v3903_v2 = vmul.f32 %v6791_v41, %v6518_v61  ;;  %v3688_v31 = vmul.f32 %v6700_v8, %v6486_v1  ;;  %v7739_v30 = vld [vmem:[#allocation6_spill] sm:$0xff] }
 0x26f   : > { %v4187_v24 = vadd.f32 %v4171_v17, %v4133_v48  ;;  %v3650_v50 = vadd.f32 %v3634_v49, %v3596_v53  ;;  %v3151_v11 = vmul.f32 %v6720_v6, %v7738_v56  ;;  %v3205_v63 = vmul.f32 %v6741_v33, %v7739_v30  ;;  %v6896_v53 = vld [vmem:[#allocation3 + $0x61] sm:$0xff] }
 0x270   : > { %v4402_v10 = vadd.f32 %v4386_v45, %v4348_v39  ;;  %v3865_v62 = vadd.f32 %v3849_v60, %v3811_v19  ;;  %v3957_v32 = vmul.f32 %v6860_v4, %v6523_v15  ;;  %v3742_v48 = vmul.f32 %v6709_v36, %v6497_v28  ;;  %v7740_v19 = vld [vmem:[#allocation10_spill] sm:$0xff]  ;;  %v7741_v33 = vld [vmem:[#allocation7_spill] sm:$0xff] }
 0x271   : > { %v4241_v13 = vadd.f32 %v4225_v3, %v4187_v24  ;;  %v3704_v17 = vadd.f32 %v3688_v31, %v3650_v50  ;;  %v3221_v45 = vadd.f32 %v3205_v63, %v3151_v11  ;;  %v3313_v60 = vmul.f32 %v6747_v5, %v6400_v44  ;;  %v7742_v3 = vld [vmem:[#allocation15_spill] sm:$0xff] }
 0x272   : > { %v4456_v49 = vadd.f32 %v4440_v35, %v4402_v10  ;;  %v3919_v1 = vadd.f32 %v3903_v2, %v3865_v62  ;;  %v3794_v24 = vmul.f32 %v6711_v27, %v7740_v19  ;;  %v6904_v4 = vmul.f32 %v7742_v3, %v7741_v33  ;;  %v6907_v31 = vld [vmem:[#allocation3 + $0x62] sm:$0xff]  ;;  %v7744_v2 = vld [vmem:[#allocation25_spill] sm:$0xff] }
 0x273   : > { %v4295_v6 = vadd.f32 %v4279_v9, %v4241_v13  ;;  %v3758_v39 = vadd.f32 %v3742_v48, %v3704_v17  ;;  %v4011_v63 = vmul.f32 %v6867_v51, %v6526_v57  ;;  %v3275_v10 = vadd.f32 %v7744_v2, %v3221_v45  ;;  %v7745_v5 = vld [vmem:[#allocation23_spill] sm:$0xff] }
 0x274   : > { %7743 = vst [vmem:[#allocation21_spill] sm:$0xff] %v6904_v4  ;;  %v4476_v50 = vsel %vm603_vm2, %v4456_v49, 0.0  ;;  %v3973_v35 = vadd.f32 %v3957_v32, %v3919_v1  ;;  %v4387_v62 = vmul.f32 %v6551_v0, %v6896_v53  ;;  %v3848_v13 = vmul.f32 %v6731_v55, %v6509_v22  ;;  %v6917_v17 = vld [vmem:[#allocation3 + $0x80] sm:$0xff] }
 0x275   : > { %4477 = vadd.xlane.f32.xlu0 %v4476_v50  ;;  %v4349_v9 = vadd.f32 %v7745_v5, %v4295_v6  ;;  %v3810_v11 = vadd.f32 %v3794_v24, %v3758_v39  ;;  %7746 = vst [vmem:[#allocation14_spill] sm:$0xff] %v6917_v17  ;;  %v3329_v49 = vadd.f32 %v3313_v60, %v3275_v10  ;;  %v7748_v24 = vld [vmem:[#allocation26_spill] sm:$0xff]  ;;  %v6936_v10 = vld [vmem:[#allocation3 + $0x6e] sm:$0xff] }
 0x276   : > { %v4027_v48 = vadd.f32 %v4011_v63, %v3973_v35  ;;  %v3367_v1 = vmul.f32 %v6749_v14, %v6405_v26  ;;  %v6923_v32 = vmul.f32 %v7732_v38, %v6917_v17  ;;  %v4441_v6 = vmul.f32 %v6727_v58, %v6907_v31  ;;  %v7759_v4 = vld [vmem:[#allocation34_spill] sm:$0xff] }
 0x277   : > { %v4403_v45 = vadd.f32 %v4387_v62, %v4349_v9  ;;  %v3864_v3 = vadd.f32 %v3848_v13, %v3810_v11  ;;  %v3902_v39 = vmul.f32 %v6733_v46, %v6518_v61  ;;  %v4119_v60 = vmul.f32 %v6896_v53, %v6533_v23 }
 0x278   : > { %7747 = vst [vmem:[#allocation22_spill] sm:$0xff] %v6923_v32  ;;  %v4081_v50 = vadd.f32 %v7748_v24, %v4027_v48  ;;  %v3383_v35 = vadd.f32 %v3367_v1, %v3329_v49  ;;  %v3421_v14 = vmul.f32 %v6759_v52, %v6423_v34  ;;  %v4173_v2 = vmul.f32 %v6907_v31, %v6536_v47  ;;  %v6945_v1 = vld [vmem:[#allocation3 + $0x6f] sm:$0xff] }
 0x279   : > { %v4457_v63 = vadd.f32 %v4441_v6, %v4403_v45  ;;  %v3918_v5 = vadd.f32 %v3902_v39, %v3864_v3  ;;  %v3956_v9 = vmul.f32 %v6809_v7, %v6523_v15  ;;  %v4010_v11 = vmul.f32 %v6815_v20, %v6526_v57  ;;  %7749 = vst [vmem:[#allocation24_spill] sm:$0xff] %v6945_v1 }
 0x27a   : > { %v4135_v62 = vadd.f32 %v4119_v60, %v4081_v50  ;;  %v3437_v13 = vadd.f32 %v3421_v14, %v3383_v35  ;;  %v3475_v48 = vmul.f32 %v6761_v40, %v6429_v37  ;;  %v3150_v6 = vmul.f32 %v6599_v16, %v7738_v56  ;;  %v7750_v60 = vld [vmem:[#allocation20_spill] sm:$0xff] }
 0x27b   : > { %v4479_v49 = vsel %vm603_vm2, %v4457_v63, 0.0  ;;  %v3972_v45 = vadd.f32 %v3956_v9, %v3918_v5  ;;  %v3204_v3 = vmul.f32 %v7721_v59, %v7739_v30  ;;  %v4227_v24 = vmul.f32 %v6540_v29, %v6936_v10  ;;  %v7752_v63 = vld [vmem:[#allocation11_spill] sm:$0xff] }
 0x27c   : > { %4480 = vadd.xlane.f32.xlu0 %v4479_v49  ;;  %v4189_v39 = vadd.f32 %v4173_v2, %v4135_v62  ;;  %v3491_v50 = vadd.f32 %v3475_v48, %v3437_v13  ;;  %v6955_v35 = vmul.f32 %v7750_v60, %v7734_v25  ;;  %v4064_v5 = vmul.f32 %v6834_v18, %v7752_v63  ;;  %v7753_v2 = vld [vmem:[#allocation30_spill] sm:$0xff]  ;;  %v6966_v48 = vld [vmem:[#allocation3 + $0x71] sm:$0xff] }
 0x27d   : > { %v4026_v14 = vadd.f32 %v4010_v11, %v3972_v45  ;;  %v3220_v9 = vadd.f32 %v3204_v3, %v3150_v6  ;;  %v3258_v16 = vmul.f32 %v6631_v12, %v7741_v33  ;;  %v4281_v59 = vmul.f32 %v6543_v21, %v6945_v1  ;;  %7754 = vst [vmem:[#allocation6_spill] sm:$0xff] %v6966_v48  ;;  %v7755_v11 = vld [vmem:[#allocation17_spill] sm:$0xff] }
 0x27e   : > { %7751 = vst [vmem:[#allocation5_spill] sm:$0xff] %v6955_v35  ;;  %v4243_v32 = vadd.f32 %v4227_v24, %v4189_v39  ;;  %v3545_v62 = vadd.f32 %v7753_v2, %v3491_v50  ;;  %v3583_v13 = vmul.f32 %v6769_v54, %v6467_v42  ;;  %v4118_v45 = vmul.f32 %v7755_v11, %v6533_v23  ;;  %v7756_v6 = vld [vmem:[#allocation33_spill] sm:$0xff]  ;;  %v7757_v39 = vld [vmem:[#allocation19_spill] sm:$0xff] }
 0x27f   : > { %v4080_v49 = vadd.f32 %v4064_v5, %v4026_v14  ;;  %v3274_v60 = vadd.f32 %v3258_v16, %v3220_v9  ;;  %v3312_v3 = vmul.f32 %v7756_v6, %v6400_v44  ;;  %v4172_v24 = vmul.f32 %v7757_v39, %v6536_v47  ;;  %v6974_v35 = vld [vmem:[#allocation3 + $0x66] sm:$0xff]  ;;  %v6978_v54 = vld [vmem:[#allocation3 + $0x72] sm:$0xff] }
 0x280   : > { %v4297_v12 = vadd.f32 %v4281_v59, %v4243_v32  ;;  %v3599_v50 = vadd.f32 %v3583_v13, %v3545_v62  ;;  %v3637_v2 = vmul.f32 %v6791_v41, %v6479_v43  ;;  %7758 = vst [vmem:[#allocation10_spill] sm:$0xff] %v6978_v54  ;;  %v3366_v9 = vmul.f32 %v7759_v4, %v6405_v26  ;;  %v7760_v32 = vld [vmem:[#allocation29_spill] sm:$0xff]  ;;  %v6987_v39 = vld [vmem:[#allocation3 + $0x67] sm:$0xff]  ;;  %v7762_v41 = vld [vmem:[#allocation18_spill] sm:$0xff] }
 0x281   : > { %v4134_v14 = vadd.f32 %v4118_v45, %v4080_v49  ;;  %v3328_v5 = vadd.f32 %v3312_v3, %v3274_v60  ;;  %v3420_v16 = vmul.f32 %v6700_v8, %v6423_v34  ;;  %v4389_v6 = vmul.f32 %v6551_v0, %v6966_v48  ;;  %v7761_v13 = vld [vmem:[#allocation9_spill] sm:$0xff]  ;;  %v6993_v45 = vld [vmem:[#allocation3 + $0x68] sm:$0xff] }
 0x282   : > { %v4351_v59 = vadd.f32 %v7760_v32, %v4297_v12  ;;  %v3653_v62 = vadd.f32 %v3637_v2, %v3599_v50  ;;  %v3691_v40 = vmul.f32 %v7762_v41, %v7761_v13  ;;  %v4226_v49 = vmul.f32 %v6540_v29, %v6974_v35  ;;  %v7763_v60 = vld [vmem:[#allocation27_spill] sm:$0xff] }
 0x283   : > { %v4188_v52 = vadd.f32 %v4172_v24, %v4134_v14  ;;  %v3382_v4 = vadd.f32 %v3366_v9, %v3328_v5  ;;  %v6997_v3 = vmul.f32 %v7763_v60, %v7740_v19  ;;  %v3243_v12 = vld [vmem:[#allocation3 + $0x60] sm:$0xff]  ;;  %v4443_v11 = vmul.f32 %v6727_v58, %v6978_v54 }
 0x284   : > { %v4405_v32 = vadd.f32 %v4389_v6, %v4351_v59  ;;  %v3707_v50 = vadd.f32 %v3691_v40, %v3653_v62  ;;  %v3745_v2 = vmul.f32 %v6867_v51, %v6497_v28  ;;  %v4280_v14 = vmul.f32 %v6543_v21, %v6987_v39  ;;  %v7009_v59 = vld [vmem:[#allocation3 + $0x69] sm:$0xff] }
 0x285   : > { %7764 = vst [vmem:[#allocation15_spill] sm:$0xff] %v6997_v3  ;;  %v4242_v24 = vadd.f32 %v4226_v49, %v4188_v52  ;;  %v3436_v41 = vadd.f32 %v3420_v16, %v3382_v4  ;;  %v3474_v5 = vmul.f32 %v6709_v36, %v6429_v37  ;;  %v4334_v60 = vmul.f32 %v7732_v38, %v6993_v45  ;;  %v7768_v4 = vld [vmem:[#allocation31_spill] sm:$0xff] }
 0x286   : > { %v4459_v9 = vadd.f32 %v4443_v11, %v4405_v32  ;;  %7765 = vst [vmem:[#allocation25_spill] sm:$0xff] %v7009_v59  ;;  %v3761_v6 = vadd.f32 %v3745_v2, %v3707_v50  ;;  %v7012_v40 = vmul.f32 %v7741_v33, %v3243_v12  ;;  %v3528_v52 = vmul.f32 %v6711_v27, %v7734_v25  ;;  %v7019_v11 = vld [vmem:[#allocation3 + $0x6a] sm:$0xff] }
 0x287   : > { %v4296_v62 = vadd.f32 %v4280_v14, %v4242_v24  ;;  %v3490_v3 = vadd.f32 %v3474_v5, %v3436_v41  ;;  %v3152_v16 = vmul.f32 %v6700_v8, %v7738_v56  ;;  %7767 = vst [vmem:[#allocation26_spill] sm:$0xff] %v7019_v11  ;;  %v3851_v50 = vmul.f32 %v6896_v53, %v6509_v22 }
 0x288   : > { %7766 = vst [vmem:[#allocation23_spill] sm:$0xff] %v7012_v40  ;;  %v4485_v49 = vsel %vm603_vm2, %v4459_v9, 0.0  ;;  %v3813_v32 = vadd.f32 %v7768_v4, %v3761_v6  ;;  %v3206_v12 = vmul.f32 %v6709_v36, %v7739_v30  ;;  %v4388_v2 = vmul.f32 %v6551_v0, %v7009_v59 }
 0x289   : > { %4486 = vadd.xlane.f32.xlu0 %v4485_v49  ;;  %v4350_v41 = vadd.f32 %v4334_v60, %v4296_v62  ;;  %v3544_v24 = vadd.f32 %v3528_v52, %v3490_v3  ;;  %v3582_v8 = vmul.f32 %v6731_v55, %v6467_v42  ;;  %v3905_v5 = vmul.f32 %v6907_v31, %v6518_v61 }
 0x28a   : > { %v3867_v14 = vadd.f32 %v3851_v50, %v3813_v32  ;;  %v3222_v9 = vadd.f32 %v3206_v12, %v3152_v16  ;;  %v3260_v6 = vmul.f32 %v6711_v27, %v7741_v33  ;;  %v4442_v36 = vmul.f32 %v6727_v58, %v7019_v11 }
 0x28b   : > { %v4404_v4 = vadd.f32 %v4388_v2, %v4350_v41  ;;  %v3598_v60 = vadd.f32 %v3582_v8, %v3544_v24  ;;  %v3636_v62 = vmul.f32 %v6733_v46, %v6479_v43  ;;  %v3959_v52 = vmul.f32 %v6936_v10, %v6523_v15  ;;  %v7050_v24 = vld [vmem:[#allocation3 + $0x7e] sm:$0xff] }
 0x28c   : > { %v3921_v3 = vadd.f32 %v3905_v5, %v3867_v14  ;;  %v3276_v49 = vadd.f32 %v3260_v6, %v3222_v9  ;;  %v3314_v32 = vmul.f32 %v6731_v55, %v6400_v44  ;;  %v3690_v27 = vmul.f32 %v6809_v7, %v7761_v13  ;;  %7770 = vst [vmem:[#allocation30_spill] sm:$0xff] %v7050_v24  ;;  %v7052_v8 = vld [vmem:[#allocation3 + $0x7f] sm:$0xff] }
 0x28d   : > { %v4458_v16 = vadd.f32 %v4442_v36, %v4404_v4  ;;  %v3652_v50 = vadd.f32 %v3636_v62, %v3598_v60  ;;  %v7046_v12 = vmul.f32 %v6917_v17, %v7752_v63  ;;  %v4013_v2 = vmul.f32 %v6945_v1, %v6526_v57  ;;  %7771 = vst [vmem:[#allocation33_spill] sm:$0xff] %v7052_v8  ;;  %v7059_v6 = vld [vmem:[#allocation3 + $0x81] sm:$0xff]  ;;  %v7775_v17 = vld [vmem:[#allocation17_spill] sm:$0xff] }
 0x28e   : > { %v3975_v41 = vadd.f32 %v3959_v52, %v3921_v3  ;;  %v3330_v14 = vadd.f32 %v3314_v32, %v3276_v49  ;;  %v3368_v55 = vmul.f32 %v6733_v46, %v6405_v26  ;;  %v4121_v9 = vmul.f32 %v6966_v48, %v6533_v23  ;;  %7772 = vst [vmem:[#allocation34_spill] sm:$0xff] %v7059_v6  ;;  %v7071_v32 = vld [vmem:[#allocation3 + $0x82] sm:$0xff] }
 0x28f   : > { %7769 = vst [vmem:[#allocation20_spill] sm:$0xff] %v7046_v12  ;;  %v4482_v5 = vsel %vm603_vm2, %v4458_v16, 0.0  ;;  %v3706_v4 = vadd.f32 %v3690_v27, %v3652_v50  ;;  %v3744_v36 = vmul.f32 %v6815_v20, %v6497_v28  ;;  %v4175_v62 = vmul.f32 %v6978_v54, %v6536_v47  ;;  %7773 = vst [vmem:[#allocation29_spill] sm:$0xff] %v7071_v32  ;;  %v7774_v27 = vld [vmem:[#allocation32_spill] sm:$0xff] }
 0x290   : > { %4483 = vadd.xlane.f32.xlu1 %v4482_v5  ;;  %v4029_v60 = vadd.f32 %v4013_v2, %v3975_v41  ;;  %v3384_v3 = vadd.f32 %v3368_v55, %v3330_v14  ;;  %v3422_v46 = vmul.f32 %v6809_v7, %v6423_v34  ;;  %v4229_v52 = vmul.f32 %v6540_v29, %v7050_v24 }
 0x291   : > { %v4283_v49 = vmul.f32 %v6543_v21, %v7052_v8  ;;  %v3760_v16 = vadd.f32 %v3744_v36, %v3706_v4  ;;  %v3796_v50 = vmul.f32 %v6834_v18, %v7740_v19  ;;  %v4391_v2 = vmul.f32 %v6551_v0, %v7059_v6  ;;  %v7776_v8 = vld [vmem:[#allocation35_spill] sm:$0xff]  ;;  %v7777_v4 = vld [vmem:[#allocation36_spill] sm:$0xff] }
 0x292   : > { %v4083_v41 = vadd.f32 %v7774_v27, %v4029_v60  ;;  %v3438_v14 = vadd.f32 %v3422_v46, %v3384_v3  ;;  %v3476_v55 = vmul.f32 %v6815_v20, %v6429_v37  ;;  %v3850_v12 = vmul.f32 %v7775_v17, %v6509_v22 }
 0x293   : > { %v3812_v5 = vadd.f32 %v3796_v50, %v3760_v16  ;;  %v3153_v40 = vmul.f32 %v7776_v8, %v7738_v56  ;;  %v3207_v36 = vmul.f32 %v7777_v4, %v7739_v30  ;;  %v4445_v60 = vmul.f32 %v6727_v58, %v7071_v32  ;;  %v7778_v16 = vld [vmem:[#allocation19_spill] sm:$0xff] }
 0x294   : > { %v4137_v24 = vadd.f32 %v4121_v9, %v4083_v41  ;;  %v3492_v27 = vadd.f32 %v3476_v55, %v3438_v14  ;;  %v3530_v3 = vmul.f32 %v6834_v18, %v7734_v25  ;;  %v3904_v50 = vmul.f32 %v7778_v16, %v6518_v61  ;;  %v7781_v25 = vld [vmem:[#allocation28_spill] sm:$0xff] }
 0x295   : > { %v3866_v46 = vadd.f32 %v3850_v12, %v3812_v5  ;;  %v3958_v6 = vmul.f32 %v6974_v35, %v6523_v15  ;;  %v3223_v54 = vadd.f32 %v3207_v36, %v3153_v40  ;;  %v4012_v4 = vmul.f32 %v6987_v39, %v6526_v57  ;;  %v7100_v12 = vld [vmem:[#allocation3 + $0x76] sm:$0xff] }
 0x296   : > { %v4191_v8 = vadd.f32 %v4175_v62, %v4137_v24  ;;  %v3546_v9 = vadd.f32 %v3530_v3, %v3492_v27  ;;  %v3584_v41 = vmul.f32 %v7775_v17, %v6467_v42  ;;  %v4066_v55 = vmul.f32 %v6993_v45, %v7752_v63  ;;  %7779 = vst [vmem:[#allocation9_spill] sm:$0xff] %v7100_v12  ;;  %v7780_v5 = vld [vmem:[#allocation21_spill] sm:$0xff] }
 0x297   : > { %v3920_v14 = vadd.f32 %v3904_v50, %v3866_v46  ;;  %v3277_v32 = vadd.f32 %v7780_v5, %v3223_v54  ;;  %v3315_v48 = vmul.f32 %v7781_v25, %v6400_v44  ;;  %v4120_v24 = vmul.f32 %v7009_v59, %v6533_v23  ;;  %v7107_v62 = vld [vmem:[#allocation3 + $0x77] sm:$0xff]  ;;  %v7782_v5 = vld [vmem:[#allocation16_spill] sm:$0xff] }
 0x298   : > { %v4245_v40 = vadd.f32 %v4229_v52, %v4191_v8  ;;  %v3600_v36 = vadd.f32 %v3584_v41, %v3546_v9  ;;  %v3638_v27 = vmul.f32 %v7778_v16, %v6479_v43  ;;  %v4174_v46 = vmul.f32 %v7019_v11, %v6536_v47  ;;  %v7113_v50 = vld [vmem:[#allocation3 + $0x78] sm:$0xff] }
 0x299   : > { %v3974_v3 = vadd.f32 %v3958_v6, %v3920_v14  ;;  %v3331_v54 = vadd.f32 %v3315_v48, %v3277_v32  ;;  %v3369_v25 = vmul.f32 %v7782_v5, %v6405_v26  ;;  %v4228_v8 = vmul.f32 %v6540_v29, %v7100_v12  ;;  %v7783_v47 = vld [vmem:[#allocation18_spill] sm:$0xff] }
 0x29a   : > { %v4299_v52 = vadd.f32 %v4283_v49, %v4245_v40  ;;  %v3654_v1 = vadd.f32 %v3638_v27, %v3600_v36  ;;  %v3692_v9 = vmul.f32 %v6974_v35, %v7761_v13  ;;  %v4282_v6 = vmul.f32 %v6543_v21, %v7107_v62  ;;  %v7784_v48 = vld [vmem:[#allocation22_spill] sm:$0xff] }
 0x29b   : > { %v4028_v41 = vadd.f32 %v4012_v4, %v3974_v3  ;;  %v3385_v14 = vadd.f32 %v3369_v25, %v3331_v54  ;;  %v3423_v23 = vmul.f32 %v7783_v47, %v6423_v34  ;;  %v4336_v49 = vmul.f32 %v7732_v38, %v7113_v50  ;;  %v7128_v40 = vld [vmem:[#allocation3 + $0x79] sm:$0xff] }
 0x29c   : > { %v4353_v32 = vadd.f32 %v7784_v48, %v4299_v52  ;;  %v3708_v5 = vadd.f32 %v3692_v9, %v3654_v1  ;;  %v3746_v36 = vmul.f32 %v6987_v39, %v6497_v28  ;;  %v3477_v3 = vmul.f32 %v6867_v51, %v6429_v37 }
 0x29d   : > { %v4082_v27 = vadd.f32 %v4066_v55, %v4028_v41  ;;  %v3439_v4 = vadd.f32 %v3423_v23, %v3385_v14  ;;  %v3154_v54 = vmul.f32 %v6809_v7, %v7738_v56  ;;  %v3798_v52 = vmul.f32 %v6993_v45, %v7740_v19 }
 0x29e   : > { %v4407_v47 = vadd.f32 %v4391_v2, %v4353_v32  ;;  %v3762_v25 = vadd.f32 %v3746_v36, %v3708_v5  ;;  %v3208_v48 = vmul.f32 %v6815_v20, %v7739_v30  ;;  %v4390_v9 = vmul.f32 %v6551_v0, %v7128_v40  ;;  %v7785_v5 = vld [vmem:[#allocation5_spill] sm:$0xff] }
 0x29f   : > { %v4136_v1 = vadd.f32 %v4120_v24, %v4082_v27  ;;  %v3852_v23 = vmul.f32 %v7009_v59, %v6509_v22  ;;  %v3493_v55 = vadd.f32 %v3477_v3, %v3439_v4  ;;  %v3262_v7 = vmul.f32 %v6834_v18, %v7741_v33  ;;  %v7152_v27 = vld [vmem:[#allocation3 + $0x7a] sm:$0xff] }
 0x2a0   : > { %v4461_v51 = vadd.f32 %v4445_v60, %v4407_v47  ;;  %v3814_v41 = vadd.f32 %v3798_v52, %v3762_v25  ;;  %v3224_v14 = vadd.f32 %v3208_v48, %v3154_v54  ;;  %v3906_v32 = vmul.f32 %v7019_v11, %v6518_v61 }
 0x2a1   : > { %v4190_v2 = vadd.f32 %v4174_v46, %v4136_v1  ;;  %v3547_v20 = vadd.f32 %v7785_v5, %v3493_v55  ;;  %v3585_v24 = vmul.f32 %v6896_v53, %v6467_v42  ;;  %v3316_v3 = vmul.f32 %v7775_v17, %v6400_v44  ;;  %v7788_v5 = vld [vmem:[#allocation24_spill] sm:$0xff] }
 0x2a2   : > { %v4491_v36 = vsel %vm603_vm2, %v4461_v51, 0.0  ;;  %v3868_v4 = vadd.f32 %v3852_v23, %v3814_v41  ;;  %v3278_v60 = vadd.f32 %v3262_v7, %v3224_v14  ;;  %v3960_v46 = vmul.f32 %v7100_v12, %v6523_v15  ;;  %v7172_v41 = vld [vmem:[#allocation3 + $0x86] sm:$0xff] }
 0x2a3   : > { %4492 = vadd.xlane.f32.xlu0 %v4491_v36  ;;  %v4244_v18 = vadd.f32 %v4228_v8, %v4190_v2  ;;  %v3601_v54 = vadd.f32 %v3585_v24, %v3547_v20  ;;  %v3639_v47 = vmul.f32 %v6907_v31, %v6479_v43  ;;  %v3370_v52 = vmul.f32 %v7778_v16, %v6405_v26  ;;  %v7174_v16 = vld [vmem:[#allocation3 + $0x87] sm:$0xff]  ;;  %v7789_v36 = vld [vmem:[#allocation13_spill] sm:$0xff] }
 0x2a4   : > { %v3922_v25 = vadd.f32 %v3906_v32, %v3868_v4  ;;  %v3332_v53 = vadd.f32 %v3316_v3, %v3278_v60  ;;  %v3424_v48 = vmul.f32 %v6974_v35, %v6423_v34  ;;  %v4444_v17 = vmul.f32 %v6727_v58, %v7152_v27  ;;  %7786 = vst [vmem:[#allocation27_spill] sm:$0xff] %v7174_v16  ;;  %v7787_v7 = vld [vmem:[#allocation12_spill] sm:$0xff] }
 0x2a5   : > { %v4298_v1 = vadd.f32 %v4282_v6, %v4244_v18  ;;  %v3655_v8 = vadd.f32 %v3639_v47, %v3601_v54  ;;  %v3693_v23 = vmul.f32 %v6936_v10, %v7761_v13  ;;  %v4014_v31 = vmul.f32 %v7107_v62, %v6526_v57  ;;  %v3135_v18 = vld [vmem:[#allocation3 + $0x5e] sm:$0xff] }
 0x2a6   : > { %v3976_v55 = vadd.f32 %v3960_v46, %v3922_v25  ;;  %v4068_v51 = vmul.f32 %v7113_v50, %v7752_v63  ;;  %v3386_v14 = vadd.f32 %v3370_v52, %v3332_v53  ;;  %v4122_v2 = vmul.f32 %v7128_v40, %v7787_v7  ;;  %v3189_v46 = vld [vmem:[#allocation3 + $0x5f] sm:$0xff] }
 0x2a7   : > { %v4352_v6 = vadd.f32 %v4336_v49, %v4298_v1  ;;  %v3709_v32 = vadd.f32 %v3693_v23, %v3655_v8  ;;  %v3747_v20 = vmul.f32 %v7788_v5, %v6497_v28  ;;  %v4176_v4 = vmul.f32 %v7152_v27, %v7789_v36  ;;  %v7790_v52 = vld [vmem:[#allocation6_spill] sm:$0xff]  ;;  %v7791_v23 = vld [vmem:[#allocation8_spill] sm:$0xff] }
 0x2a8   : > { %v4030_v24 = vadd.f32 %v4014_v31, %v3976_v55  ;;  %v3440_v60 = vadd.f32 %v3424_v48, %v3386_v14  ;;  %v3478_v3 = vmul.f32 %v6987_v39, %v6429_v37  ;;  %v4230_v49 = vmul.f32 %v6540_v29, %v7172_v41  ;;  %v3297_v55 = vld [vmem:[#allocation3 + $0x61] sm:$0xff] }
 0x2a9   : > { %v4406_v54 = vadd.f32 %v4390_v9, %v4352_v6  ;;  %v4284_v47 = vmul.f32 %v6543_v21, %v7174_v16  ;;  %v3763_v25 = vadd.f32 %v3747_v20, %v3709_v32  ;;  %v3853_v1 = vmul.f32 %v7790_v52, %v6509_v22  ;;  %v7192_v14 = vld [vmem:[#allocation3 + $0x88] sm:$0xff] }
 0x2aa   : > { %v4084_v53 = vadd.f32 %v4068_v51, %v4030_v24  ;;  %v3494_v8 = vadd.f32 %v3478_v3, %v3440_v60  ;;  %v3532_v48 = vmul.f32 %v6993_v45, %v7791_v23  ;;  %v7792_v9 = vld [vmem:[#allocation15_spill] sm:$0xff]  ;;  %v3155_v63 = vmul.f32 %v7738_v56, %v3135_v18  ;;  %v7197_v32 = vld [vmem:[#allocation3 + $0x89] sm:$0xff]  ;;  %v7794_v51 = vld [vmem:[#allocation10_spill] sm:$0xff] }
 0x2ab   : > { %v4460_v31 = vadd.f32 %v4444_v17, %v4406_v54  ;;  %v3815_v6 = vadd.f32 %v7792_v9, %v3763_v25  ;;  %v3209_v33 = vmul.f32 %v7739_v30, %v3189_v46  ;;  %7793 = vst [vmem:[#allocation31_spill] sm:$0xff] %v7197_v32  ;;  %v3907_v20 = vmul.f32 %v7794_v51, %v6518_v61  ;;  %v7204_v3 = vld [vmem:[#allocation3 + $0x8a] sm:$0xff] }
 0x2ac   : > { %v4138_v16 = vadd.f32 %v4122_v2, %v4084_v53  ;;  %v3548_v24 = vadd.f32 %v3532_v48, %v3494_v8  ;;  %v3586_v60 = vmul.f32 %v7009_v59, %v6467_v42  ;;  %7795 = vst [vmem:[#allocation32_spill] sm:$0xff] %v7204_v3  ;;  %v3317_v18 = vmul.f32 %v6400_v44, %v3297_v55  ;;  %v3351_v48 = vld [vmem:[#allocation3 + $0x62] sm:$0xff]  ;;  %v7796_v59 = vld [vmem:[#allocation30_spill] sm:$0xff] }
 0x2ad   : > { %v4488_v17 = vsel %vm603_vm2, %v4460_v31, 0.0  ;;  %v3869_v54 = vadd.f32 %v3853_v1, %v3815_v6  ;;  %v3225_v25 = vadd.f32 %v3209_v33, %v3155_v63  ;;  %v4338_v2 = vmul.f32 %v7732_v38, %v7192_v14  ;;  %v7797_v33 = vld [vmem:[#allocation23_spill] sm:$0xff] }
 0x2ae   : > { %4489 = vadd.xlane.f32.xlu1 %v4488_v17  ;;  %v4192_v46 = vadd.f32 %v4176_v4, %v4138_v16  ;;  %v3602_v53 = vadd.f32 %v3586_v60, %v3548_v24  ;;  %v3640_v8 = vmul.f32 %v7019_v11, %v6479_v43  ;;  %v4392_v9 = vmul.f32 %v6551_v0, %v7197_v32  ;;  %v7798_v60 = vld [vmem:[#allocation33_spill] sm:$0xff] }
 0x2af   : > { %v3923_v31 = vadd.f32 %v3907_v20, %v3869_v54  ;;  %v3961_v1 = vmul.f32 %v7796_v59, %v6523_v15  ;;  %v3279_v63 = vadd.f32 %v7797_v33, %v3225_v25  ;;  %v4446_v16 = vmul.f32 %v6727_v58, %v7204_v3  ;;  %v7222_v11 = vld [vmem:[#allocation3 + $0x8e] sm:$0xff]  ;;  %v7799_v25 = vld [vmem:[#allocation34_spill] sm:$0xff] }
 0x2b0   : > { %v4246_v55 = vadd.f32 %v4230_v49, %v4192_v46  ;;  %v3656_v4 = vadd.f32 %v3640_v8, %v3602_v53  ;;  %v3694_v6 = vmul.f32 %v7100_v12, %v7761_v13  ;;  %v4015_v17 = vmul.f32 %v7798_v60, %v6526_v57  ;;  %v7800_v33 = vld [vmem:[#allocation29_spill] sm:$0xff] }
 0x2b1   : > { %v3977_v24 = vadd.f32 %v3961_v1, %v3923_v31  ;;  %v3333_v20 = vadd.f32 %v3317_v18, %v3279_v63  ;;  %v3371_v54 = vmul.f32 %v6405_v26, %v3351_v48  ;;  %v4123_v49 = vmul.f32 %v7799_v25, %v7787_v7  ;;  %v7231_v1 = vld [vmem:[#allocation3 + $0x8f] sm:$0xff] }
 0x2b2   : > { %v4300_v32 = vadd.f32 %v4284_v47, %v4246_v55  ;;  %v3710_v46 = vadd.f32 %v3694_v6, %v3656_v4  ;;  %v3748_v53 = vmul.f32 %v7107_v62, %v6497_v28  ;;  %v4177_v31 = vmul.f32 %v7800_v33, %v7789_v36  ;;  %v7801_v4 = vld [vmem:[#allocation20_spill] sm:$0xff] }
 0x2b3   : > { %v4031_v8 = vadd.f32 %v4015_v17, %v3977_v24  ;;  %v3387_v3 = vadd.f32 %v3371_v54, %v3333_v20  ;;  %v3425_v18 = vmul.f32 %v6936_v10, %v6423_v34  ;;  %v4231_v47 = vmul.f32 %v6540_v29, %v7222_v11  ;;  %v5451_v33 = vld [vmem:[#allocation3 + $0x70] sm:$0xff] }
 0x2b4   : > { %v4354_v63 = vadd.f32 %v4338_v2, %v4300_v32  ;;  %v3764_v48 = vadd.f32 %v3748_v53, %v3710_v46  ;;  %v3800_v55 = vmul.f32 %v7113_v50, %v7740_v19  ;;  %v3479_v17 = vmul.f32 %v7788_v5, %v6429_v37  ;;  %v7245_v32 = vld [vmem:[#allocation3 + $0x90] sm:$0xff] }
 0x2b5   : > { %v4085_v6 = vadd.f32 %v7801_v4, %v4031_v8  ;;  %v3441_v24 = vadd.f32 %v3425_v18, %v3387_v3  ;;  %v3533_v20 = vmul.f32 %v5451_v33, %v7791_v23  ;;  %v4285_v10 = vmul.f32 %v6543_v21, %v7231_v1  ;;  %v7253_v33 = vld [vmem:[#allocation3 + $0x91] sm:$0xff] }
 0x2b6   : > { %v4408_v54 = vadd.f32 %v4392_v9, %v4354_v63  ;;  %v3816_v2 = vadd.f32 %v3800_v55, %v3764_v48  ;;  %v3854_v46 = vmul.f32 %v7128_v40, %v6509_v22  ;;  %v4339_v3 = vmul.f32 %v7732_v38, %v7245_v32  ;;  %7802 = vst [vmem:[#allocation17_spill] sm:$0xff] %v7253_v33 }
 0x2b7   : > { %v4139_v53 = vadd.f32 %v4123_v49, %v4085_v6  ;;  %v3495_v8 = vadd.f32 %v3479_v17, %v3441_v24  ;;  %v3156_v5 = vmul.f32 %v6974_v35, %v7738_v56  ;;  %v3908_v63 = vmul.f32 %v7152_v27, %v6518_v61 }
 0x2b8   : > { %v4462_v18 = vadd.f32 %v4446_v16, %v4408_v54  ;;  %v3870_v9 = vadd.f32 %v3854_v46, %v3816_v2  ;;  %v3210_v48 = vmul.f32 %v6987_v39, %v7739_v30  ;;  %v3962_v49 = vmul.f32 %v7172_v41, %v6523_v15  ;;  %v7264_v16 = vld [vmem:[#allocation3 + $0x92] sm:$0xff]  ;;  %v7803_v54 = vld [vmem:[#allocation7_spill] sm:$0xff] }
 0x2b9   : > { %v4193_v55 = vadd.f32 %v4177_v31, %v4139_v53  ;;  %v3549_v4 = vadd.f32 %v3533_v20, %v3495_v8  ;;  %v3587_v6 = vmul.f32 %v7790_v52, %v6467_v42  ;;  %v3264_v2 = vmul.f32 %v6993_v45, %v7803_v54  ;;  %v7804_v52 = vld [vmem:[#allocation27_spill] sm:$0xff] }
 0x2ba   : > { %v4494_v35 = vsel %vm603_vm2, %v4462_v18, 0.0  ;;  %v3924_v24 = vadd.f32 %v3908_v63, %v3870_v9  ;;  %v3226_v17 = vadd.f32 %v3210_v48, %v3156_v5  ;;  %v4393_v39 = vmul.f32 %v6551_v0, %v7253_v33  ;;  %v7805_v9 = vld [vmem:[#allocation25_spill] sm:$0xff] }
 0x2bb   : > { %4495 = vadd.xlane.f32.xlu1 %v4494_v35  ;;  %v4247_v46 = vadd.f32 %v4231_v47, %v4193_v55  ;;  %v3603_v31 = vadd.f32 %v3587_v6, %v3549_v4  ;;  %v3641_v20 = vmul.f32 %v7794_v51, %v6479_v43  ;;  %v4016_v8 = vmul.f32 %v7804_v52, %v6526_v57  ;;  %v7806_v4 = vld [vmem:[#allocation11_spill] sm:$0xff]  ;;  %v7808_v35 = vld [vmem:[#allocation26_spill] sm:$0xff] }
 0x2bc   : > { %v3978_v53 = vadd.f32 %v3962_v49, %v3924_v24  ;;  %v3280_v18 = vadd.f32 %v3264_v2, %v3226_v17  ;;  %v3318_v5 = vmul.f32 %v7805_v9, %v6400_v44  ;;  %v4447_v45 = vmul.f32 %v6727_v58, %v7264_v16  ;;  %v7282_v49 = vld [vmem:[#allocation3 + $0x96] sm:$0xff] }
 0x2bd   : > { %v4301_v63 = vadd.f32 %v4285_v10, %v4247_v46  ;;  %v3657_v47 = vadd.f32 %v3641_v20, %v3603_v31  ;;  %v3695_v48 = vmul.f32 %v7796_v59, %v7761_v13  ;;  %v4070_v51 = vmul.f32 %v7192_v14, %v7806_v4  ;;  %7807 = vst [vmem:[#allocation35_spill] sm:$0xff] %v7282_v49  ;;  %v7286_v2 = vld [vmem:[#allocation3 + $0x97] sm:$0xff] }
 0x2be   : > { %v4032_v55 = vadd.f32 %v4016_v8, %v3978_v53  ;;  %v3334_v6 = vadd.f32 %v3318_v5, %v3280_v18  ;;  %v3372_v24 = vmul.f32 %v7808_v35, %v6405_v26  ;;  %7809 = vst [vmem:[#allocation36_spill] sm:$0xff] %v7286_v2  ;;  %v3749_v58 = vmul.f32 %v7798_v60, %v6497_v28  ;;  %v7810_v46 = vld [vmem:[#allocation14_spill] sm:$0xff]  ;;  %v7811_v53 = vld [vmem:[#allocation31_spill] sm:$0xff]  ;;  %v3137_v35 = vld [vmem:[#allocation3 + $0x6e] sm:$0xff] }
 0x2bf   : > { %v4355_v17 = vadd.f32 %v4339_v3, %v4301_v63  ;;  %v3711_v10 = vadd.f32 %v3695_v48, %v3657_v47  ;;  %v3801_v31 = vmul.f32 %v7810_v46, %v7740_v19  ;;  %v4124_v8 = vmul.f32 %v7811_v53, %v7787_v7  ;;  %v7812_v3 = vld [vmem:[#allocation32_spill] sm:$0xff] }
 0x2c0   : > { %v4086_v20 = vadd.f32 %v4070_v51, %v4032_v55  ;;  %v3388_v9 = vadd.f32 %v3372_v24, %v3334_v6  ;;  %v3426_v18 = vmul.f32 %v7100_v12, %v6423_v34  ;;  %v4178_v63 = vmul.f32 %v7812_v3, %v7789_v36  ;;  %v3191_v24 = vld [vmem:[#allocation3 + $0x6f] sm:$0xff] }
 0x2c1   : > { %v4409_v5 = vadd.f32 %v4393_v39, %v4355_v17  ;;  %v4232_v47 = vmul.f32 %v6540_v29, %v7282_v49  ;;  %v3765_v48 = vadd.f32 %v3749_v58, %v3711_v10  ;;  %v4286_v55 = vmul.f32 %v6543_v21, %v7286_v2  ;;  %v3245_v53 = vld [vmem:[#allocation3 + $0x70] sm:$0xff]  ;;  %v7304_v39 = vld [vmem:[#allocation3 + $0x98] sm:$0xff] }
 0x2c2   : > { %v4140_v60 = vadd.f32 %v4124_v8, %v4086_v20  ;;  %v3442_v51 = vadd.f32 %v3426_v18, %v3388_v9  ;;  %v3480_v6 = vmul.f32 %v7107_v62, %v6429_v37  ;;  %v3855_v3 = vmul.f32 %v7799_v25, %v6509_v22  ;;  %v7813_v10 = vld [vmem:[#allocation29_spill] sm:$0xff]  ;;  %v7310_v8 = vld [vmem:[#allocation3 + $0x99] sm:$0xff] }
 0x2c3   : > { %v4463_v12 = vadd.f32 %v4447_v45, %v4409_v5  ;;  %v3817_v17 = vadd.f32 %v3801_v31, %v3765_v48  ;;  %v3909_v58 = vmul.f32 %v7813_v10, %v6518_v61  ;;  %7814 = vst [vmem:[#allocation19_spill] sm:$0xff] %v7310_v8  ;;  %v3534_v9 = vmul.f32 %v7113_v50, %v7791_v23  ;;  %v7324_v10 = vld [vmem:[#allocation3 + $0x9a] sm:$0xff] }
 0x2c4   : > { %v4194_v20 = vadd.f32 %v4178_v63, %v4140_v60  ;;  %v3496_v2 = vadd.f32 %v3480_v6, %v3442_v51  ;;  %v3157_v18 = vmul.f32 %v7738_v56, %v3137_v35  ;;  %v3211_v31 = vmul.f32 %v7739_v30, %v3191_v24  ;;  %v3299_v6 = vld [vmem:[#allocation3 + $0x71] sm:$0xff]  ;;  %7815 = vst [vmem:[#allocation21_spill] sm:$0xff] %v7324_v10 }
 0x2c5   : > { %v4497_v45 = vsel %vm603_vm2, %v4463_v12, 0.0  ;;  %v3871_v5 = vadd.f32 %v3855_v3, %v3817_v17  ;;  %v3265_v48 = vmul.f32 %v7803_v54, %v3245_v53  ;;  %v4340_v60 = vmul.f32 %v7732_v38, %v7304_v39 }
 0x2c6   : > { %4498 = vadd.xlane.f32.xlu0 %v4497_v45  ;;  %v4248_v49 = vadd.f32 %v4232_v47, %v4194_v20  ;;  %v3550_v63 = vadd.f32 %v3534_v9, %v3496_v2  ;;  %v3588_v51 = vmul.f32 %v7128_v40, %v6467_v42  ;;  %v4394_v35 = vmul.f32 %v6551_v0, %v7310_v8  ;;  %v3353_v20 = vld [vmem:[#allocation3 + $0x72] sm:$0xff] }
 0x2c7   : > { %v3925_v12 = vadd.f32 %v3909_v58, %v3871_v5  ;;  %v3963_v3 = vmul.f32 %v7222_v11, %v6523_v15  ;;  %v3227_v53 = vadd.f32 %v3211_v31, %v3157_v18  ;;  %v4017_v47 = vmul.f32 %v7231_v1, %v6526_v57  ;;  %v7342_v18 = vld [vmem:[#allocation3 + $0x9e] sm:$0xff] }
 0x2c8   : > { %v4302_v24 = vadd.f32 %v4286_v55, %v4248_v49  ;;  %v3604_v17 = vadd.f32 %v3588_v51, %v3550_v63  ;;  %v3642_v2 = vmul.f32 %v7152_v27, %v6479_v43  ;;  %v4071_v45 = vmul.f32 %v7245_v32, %v7806_v4  ;;  %v7338_v49 = vld [vmem:[%s7602_s3 + $0x18] ss:$0 sm:$0xff] }
 0x2c9   : > { %v3979_v9 = vadd.f32 %v3963_v3, %v3925_v12  ;;  %v3281_v8 = vadd.f32 %v3265_v48, %v3227_v53  ;;  %v3319_v58 = vmul.f32 %v6400_v44, %v3299_v6  ;;  %v4448_v55 = vmul.f32 %v7338_v49, %v7324_v10  ;;  %v7348_v6 = vld [vmem:[#allocation3 + $0x9f] sm:$0xff] }
 0x2ca   : > { %v4356_v5 = vadd.f32 %v4340_v60, %v4302_v24  ;;  %v3658_v31 = vadd.f32 %v3642_v2, %v3604_v17  ;;  %v3696_v63 = vmul.f32 %v7172_v41, %v7761_v13  ;;  %v4125_v48 = vmul.f32 %v7253_v33, %v7787_v7  ;;  %7816 = vst [vmem:[#allocation28_spill] sm:$0xff] %v7348_v6 }
 0x2cb   : > { %v4033_v51 = vadd.f32 %v4017_v47, %v3979_v9  ;;  %v3335_v60 = vadd.f32 %v3319_v58, %v3281_v8  ;;  %v3373_v12 = vmul.f32 %v6405_v26, %v3353_v20  ;;  %v4179_v53 = vmul.f32 %v7264_v16, %v7789_v36 }
 0x2cc   : > { %v4410_v3 = vadd.f32 %v4394_v35, %v4356_v5  ;;  %v3712_v24 = vadd.f32 %v3696_v63, %v3658_v31  ;;  %v3750_v17 = vmul.f32 %v7804_v52, %v6497_v28  ;;  %v4233_v47 = vmul.f32 %v6540_v29, %v7342_v18  ;;  %v7363_v5 = vld [vmem:[#allocation3 + $0xa0] sm:$0xff] }
 0x2cd   : > { %v4087_v2 = vadd.f32 %v4071_v45, %v4033_v51  ;;  %v3389_v9 = vadd.f32 %v3373_v12, %v3335_v60  ;;  %v3427_v33 = vmul.f32 %v7796_v59, %v6423_v34  ;;  %v4287_v8 = vmul.f32 %v6543_v21, %v7348_v6  ;;  %7817 = vst [vmem:[#allocation16_spill] sm:$0xff] %v7363_v5  ;;  %v7818_v45 = vld [vmem:[#allocation33_spill] sm:$0xff]  ;;  %v7819_v12 = vld [vmem:[#allocation31_spill] sm:$0xff] }
 0x2ce   : > { %v4464_v10 = vadd.f32 %v4448_v55, %v4410_v3  ;;  %v3766_v35 = vadd.f32 %v3750_v17, %v3712_v24  ;;  %v3802_v20 = vmul.f32 %v7192_v14, %v7740_v19  ;;  %v3481_v63 = vmul.f32 %v7818_v45, %v6429_v37  ;;  %v7374_v24 = vld [vmem:[#allocation3 + $0xa1] sm:$0xff]  ;;  %v7821_v17 = vld [vmem:[#allocation9_spill] sm:$0xff] }
 0x2cf   : > { %v4141_v58 = vadd.f32 %v4125_v48, %v4087_v2  ;;  %v3443_v31 = vadd.f32 %v3427_v33, %v3389_v9  ;;  %v3535_v51 = vmul.f32 %v7810_v46, %v7791_v23  ;;  %v4341_v55 = vmul.f32 %v7732_v38, %v7363_v5  ;;  %7820 = vst [vmem:[#allocation18_spill] sm:$0xff] %v7374_v24 }
 0x2d0   : > { %v4500_v59 = vsel %vm603_vm2, %v4464_v10, 0.0  ;;  %v3818_v60 = vadd.f32 %v3802_v20, %v3766_v35  ;;  %v3856_v3 = vmul.f32 %v7819_v12, %v6509_v22  ;;  %v3158_v2 = vmul.f32 %v7821_v17, %v7738_v56  ;;  %v7822_v35 = vld [vmem:[#allocation32_spill] sm:$0xff] }
 0x2d1   : > { %4501 = vadd.xlane.f32.xlu1 %v4500_v59  ;;  %v4195_v48 = vadd.f32 %v4179_v53, %v4141_v58  ;;  %v3497_v33 = vadd.f32 %v3481_v63, %v3443_v31  ;;  %v3212_v46 = vmul.f32 %v7107_v62, %v7739_v30  ;;  %v4395_v10 = vmul.f32 %v6551_v0, %v7374_v24  ;;  %v7386_v58 = vld [vmem:[#allocation3 + $0xa2] sm:$0xff]  ;;  %v7825_v24 = vld [vmem:[#allocation29_spill] sm:$0xff] }
 0x2d2   : > { %v3872_v9 = vadd.f32 %v3856_v3, %v3818_v60  ;;  %v3910_v20 = vmul.f32 %v7822_v35, %v6518_v61  ;;  %v3589_v45 = vmul.f32 %v7799_v25, %v6467_v42  ;;  %7823 = vst [vmem:[#allocation22_spill] sm:$0xff] %v7386_v58  ;;  %v3266_v59 = vmul.f32 %v7113_v50, %v7803_v54  ;;  %v7824_v60 = vld [vmem:[#allocation35_spill] sm:$0xff] }
 0x2d3   : > { %v4249_v53 = vadd.f32 %v4233_v47, %v4195_v48  ;;  %v3551_v31 = vadd.f32 %v3535_v51, %v3497_v33  ;;  %v3228_v63 = vadd.f32 %v3212_v46, %v3158_v2  ;;  %v4449_v62 = vmul.f32 %v7338_v49, %v7386_v58  ;;  %v7826_v33 = vld [vmem:[#allocation36_spill] sm:$0xff] }
 0x2d4   : > { %v3926_v17 = vadd.f32 %v3910_v20, %v3872_v9  ;;  %v3964_v3 = vmul.f32 %v7824_v60, %v6523_v15  ;;  %v3643_v5 = vmul.f32 %v7825_v24, %v6479_v43  ;;  %v3320_v51 = vmul.f32 %v7128_v40, %v6400_v44 }
 0x2d5   : > { %v4303_v6 = vadd.f32 %v4287_v8, %v4249_v53  ;;  %v3605_v25 = vadd.f32 %v3589_v45, %v3551_v31  ;;  %v3282_v47 = vadd.f32 %v3266_v59, %v3228_v63  ;;  %v4018_v50 = vmul.f32 %v7826_v33, %v6526_v57 }
 0x2d6   : > { %v3980_v48 = vadd.f32 %v3964_v3, %v3926_v17  ;;  %v3697_v2 = vmul.f32 %v7222_v11, %v7761_v13  ;;  %v3374_v46 = vmul.f32 %v7152_v27, %v6405_v26  ;;  %v3428_v8 = vmul.f32 %v7172_v41, %v6423_v34  ;;  %v3139_v17 = vld [vmem:[#allocation3 + $0x7e] sm:$0xff] }
 0x2d7   : > { %v4357_v9 = vadd.f32 %v4341_v55, %v4303_v6  ;;  %v3659_v20 = vadd.f32 %v3643_v5, %v3605_v25  ;;  %v3336_v58 = vadd.f32 %v3320_v51, %v3282_v47  ;;  %v4072_v40 = vmul.f32 %v7304_v39, %v7806_v4  ;;  %v7827_v6 = vld [vmem:[#allocation19_spill] sm:$0xff]  ;;  %v7828_v55 = vld [vmem:[#allocation21_spill] sm:$0xff] }
 0x2d8   : > { %v4034_v24 = vadd.f32 %v4018_v50, %v3980_v48  ;;  %v3751_v45 = vmul.f32 %v7231_v1, %v6497_v28  ;;  %v3803_v63 = vmul.f32 %v7245_v32, %v7740_v19  ;;  %v4126_v5 = vmul.f32 %v7827_v6, %v7787_v7  ;;  %v7416_v25 = vld [vmem:[#allocation3 + $0xa6] sm:$0xff] }
 0x2d9   : > { %v4411_v53 = vadd.f32 %v4395_v10, %v4357_v9  ;;  %v3713_v31 = vadd.f32 %v3697_v2, %v3659_v20  ;;  %v3390_v59 = vadd.f32 %v3374_v46, %v3336_v58  ;;  %v4180_v41 = vmul.f32 %v7828_v55, %v7789_v36  ;;  %v3193_v48 = vld [vmem:[#allocation3 + $0x7f] sm:$0xff]  ;;  %v7829_v46 = vld [vmem:[#allocation17_spill] sm:$0xff] }
 0x2da   : > { %v4088_v27 = vadd.f32 %v4072_v40, %v4034_v24  ;;  %v3482_v10 = vmul.f32 %v7804_v52, %v6429_v37  ;;  %v3247_v50 = vld [vmem:[#allocation3 + $0x80] sm:$0xff]  ;;  %v4234_v58 = vmul.f32 %v6540_v29, %v7416_v25  ;;  %v3857_v9 = vmul.f32 %v7829_v46, %v6509_v22 }
 0x2db   : > { %v4465_v3 = vadd.f32 %v4449_v62, %v4411_v53  ;;  %v3767_v47 = vadd.f32 %v3751_v45, %v3713_v31  ;;  %v3444_v51 = vadd.f32 %v3428_v8, %v3390_v59  ;;  %v3536_v20 = vmul.f32 %v7192_v14, %v7791_v23  ;;  %v7427_v24 = vld [vmem:[#allocation3 + $0xa7] sm:$0xff] }
 0x2dc   : > { %v4142_v2 = vadd.f32 %v4126_v5, %v4088_v27  ;;  %v3159_v52 = vmul.f32 %v7738_v56, %v3139_v17  ;;  %v3301_v45 = vld [vmem:[#allocation3 + $0x81] sm:$0xff]  ;;  %v4288_v31 = vmul.f32 %v6543_v21, %v7427_v24  ;;  %v3213_v59 = vmul.f32 %v7739_v30, %v3193_v48  ;;  %v7443_v30 = vld [vmem:[#allocation3 + $0xa9] sm:$0xff] }
 0x2dd   : > { %v4503_v62 = vsel %vm603_vm2, %v4465_v3, 0.0  ;;  %v3819_v8 = vadd.f32 %v3803_v63, %v3767_v47  ;;  %v3498_v40 = vadd.f32 %v3482_v10, %v3444_v51  ;;  %v3267_v27 = vmul.f32 %v7803_v54, %v3247_v50  ;;  %v7434_v5 = vld [vmem:[#allocation3 + $0xa8] sm:$0xff] }
 0x2de   : > { %4504 = vadd.xlane.f32.xlu0 %v4503_v62  ;;  %v4196_v53 = vadd.f32 %v4180_v41, %v4142_v2  ;;  %v3911_v3 = vmul.f32 %v7264_v16, %v6518_v61  ;;  %v3590_v56 = vmul.f32 %v7819_v12, %v6467_v42  ;;  %v4342_v41 = vmul.f32 %v7732_v38, %v7434_v5  ;;  %v3355_v2 = vld [vmem:[#allocation3 + $0x82] sm:$0xff] }
 0x2df   : > { %v3873_v14 = vadd.f32 %v3857_v9, %v3819_v8  ;;  %v3552_v63 = vadd.f32 %v3536_v20, %v3498_v40  ;;  %v3229_v47 = vadd.f32 %v3213_v59, %v3159_v52  ;;  %v3321_v51 = vmul.f32 %v6400_v44, %v3301_v45  ;;  %v7453_v44 = vld [vmem:[#allocation3 + $0xaa] sm:$0xff] }
 0x2e0   : > { %v4250_v17 = vadd.f32 %v4234_v58, %v4196_v53  ;;  %v3965_v10 = vmul.f32 %v7342_v18, %v6523_v15  ;;  %v3644_v50 = vmul.f32 %v7822_v35, %v6479_v43  ;;  %v4396_v12 = vmul.f32 %v6551_v0, %v7443_v30  ;;  %v7830_v58 = vld [vmem:[#allocation28_spill] sm:$0xff] }
 0x2e1   : > { %v3927_v54 = vadd.f32 %v3911_v3, %v3873_v14  ;;  %v3606_v48 = vadd.f32 %v3590_v56, %v3552_v63  ;;  %v4019_v20 = vmul.f32 %v7830_v58, %v6526_v57  ;;  %v3283_v62 = vadd.f32 %v3267_v27, %v3229_v47  ;;  %v7831_v40 = vld [vmem:[#allocation16_spill] sm:$0xff]  ;;  %v7832_v27 = vld [vmem:[#allocation18_spill] sm:$0xff] }
 0x2e2   : > { %v4304_v9 = vadd.f32 %v4288_v31, %v4250_v17  ;;  %v4073_v52 = vmul.f32 %v7831_v40, %v7806_v4  ;;  %v3698_v53 = vmul.f32 %v7824_v60, %v7761_v13  ;;  %v4450_v31 = vmul.f32 %v7338_v49, %v7453_v44 }
 0x2e3   : > { %v3981_v8 = vadd.f32 %v3965_v10, %v3927_v54  ;;  %v3660_v45 = vadd.f32 %v3644_v50, %v3606_v48  ;;  %v3337_v59 = vadd.f32 %v3321_v51, %v3283_v62  ;;  %v3375_v14 = vmul.f32 %v6405_v26, %v3355_v2  ;;  %v7833_v10 = vld [vmem:[#allocation22_spill] sm:$0xff]  ;;  %v7472_v2 = vld [vmem:[#allocation3 + $0xae] sm:$0xff] }
 0x2e4   : > { %v4358_v35 = vadd.f32 %v4342_v41, %v4304_v9  ;;  %v4127_v63 = vmul.f32 %v7832_v27, %v7787_v7  ;;  %v3752_v17 = vmul.f32 %v7826_v33, %v6497_v28  ;;  %v3429_v60 = vmul.f32 %v7222_v11, %v6423_v34 }
 0x2e5   : > { %v4035_v3 = vadd.f32 %v4019_v20, %v3981_v8  ;;  %v3714_v56 = vadd.f32 %v3698_v53, %v3660_v45  ;;  %v3391_v54 = vadd.f32 %v3375_v14, %v3337_v59  ;;  %v4181_v48 = vmul.f32 %v7833_v10, %v7789_v36  ;;  %v7480_v20 = vld [vmem:[#allocation3 + $0xaf] sm:$0xff] }
 0x2e6   : > { %v4412_v47 = vadd.f32 %v4396_v12, %v4358_v35  ;;  %v3804_v26 = vmul.f32 %v7304_v39, %v7740_v19  ;;  %v3483_v33 = vmul.f32 %v7231_v1, %v6429_v37  ;;  %v3537_v12 = vmul.f32 %v7245_v32, %v7791_v23  ;;  %v7488_v23 = vld [vmem:[#allocation3 + $0xb0] sm:$0xff] }
 0x2e7   : > { %v4089_v41 = vadd.f32 %v4073_v52, %v4035_v3  ;;  %v3768_v51 = vadd.f32 %v3752_v17, %v3714_v56  ;;  %v3445_v9 = vadd.f32 %v3429_v60, %v3391_v54  ;;  %v4235_v11 = vmul.f32 %v6540_v29, %v7472_v2  ;;  %v7494_v35 = vld [vmem:[#allocation4] ss:$0 sm:$0xff]  ;;  %v4431_v60 = vld [vmem:[#allocation3 + $0xb2] sm:$0xff] }
 0x2e8   : > { %v4466_v50 = vadd.f32 %v4450_v31, %v4412_v47  ;;  %v3858_v39 = vmul.f32 %v7827_v6, %v6509_v22  ;;  %v4289_v52 = vmul.f32 %v6543_v21, %v7480_v20  ;;  %v3912_v32 = vmul.f32 %v7828_v55, %v6518_v61 }
 0x2e9   : > { %v4143_v34 = vadd.f32 %v4127_v63, %v4089_v41  ;;  %v3820_v62 = vadd.f32 %v3804_v26, %v3768_v51  ;;  %v3499_v45 = vadd.f32 %v3483_v33, %v3445_v9  ;;  %v3966_v53 = vmul.f32 %v7416_v25, %v6523_v15  ;;  %v4377_v25 = vld [vmem:[#allocation3 + $0xb1] sm:$0xff] }
 0x2ea   : > { %v4506_v8 = vsel %vm603_vm2, %v4466_v50, 0.0  ;;  %v4343_v6 = vmul.f32 %v7732_v38, %v7488_v23  ;;  %v3591_v59 = vmul.f32 %v7829_v46, %v6467_v42  ;;  %v4020_v63 = vmul.f32 %v7427_v24, %v6526_v57  ;;  %v4216_v50 = vld [vmem:[#allocation3 + $0xb6] sm:$0xff] }
 0x2eb   : > { %4507 = vadd.xlane.f32.xlu1 %v4506_v8  ;;  %v4197_v37 = vadd.f32 %v4181_v48, %v4143_v34  ;;  %v3874_v1 = vadd.f32 %v3858_v39, %v3820_v62  ;;  %v3553_v31 = vadd.f32 %v3537_v12, %v3499_v45  ;;  %v3645_v17 = vmul.f32 %v7264_v16, %v6479_v43 }
 0x2ec   : > { %v4397_v47 = vmul.f32 %v6551_v0, %v4377_v25  ;;  %v4074_v24 = vmul.f32 %v7434_v5, %v7806_v4  ;;  %v3699_v48 = vmul.f32 %v7342_v18, %v7761_v13  ;;  %v4451_v26 = vmul.f32 %v7338_v49, %v4431_v60  ;;  %v4270_v18 = vld [vmem:[#allocation3 + $0xb7] sm:$0xff] }
 0x2ed   : > { %v4251_v14 = vadd.f32 %v4235_v11, %v4197_v37  ;;  %v3928_v3 = vadd.f32 %v3912_v32, %v3874_v1  ;;  %v3607_v56 = vadd.f32 %v3591_v59, %v3553_v31  ;;  %v4128_v16 = vmul.f32 %v7443_v30, %v7787_v7  ;;  %v4378_v37 = vld [vmem:[#allocation3 + $0xb9] sm:$0xff] }
 0x2ee   : > { %v4472_v55 = vpop.xlane.xlu0 %4471  ;;  %v3753_v33 = vmul.f32 %v7830_v58, %v6497_v28  ;;  %v3805_v5 = vmul.f32 %v7831_v40, %v7740_v19  ;;  %v4182_v13 = vmul.f32 %v7453_v44, %v7789_v36  ;;  %v3859_v62 = vmul.f32 %v7832_v27, %v6509_v22 }
 0x2ef   : > { %v4524_v42 = vadd.f32 %v7494_v35, %v4472_v55  ;;  %v4305_v46 = vadd.f32 %v4289_v52, %v4251_v14  ;;  %v3982_v54 = vadd.f32 %v3966_v53, %v3928_v3  ;;  %v3661_v41 = vadd.f32 %v3645_v17, %v3607_v56  ;;  %v4324_v52 = vld [vmem:[#allocation3 + $0xb8] sm:$0xff] }
 0x2f0   : > { %v4236_v8 = vmul.f32 %v6540_v29, %v4216_v50  ;;  %v3913_v28 = vmul.f32 %v7833_v10, %v6518_v61  ;;  %v4290_v44 = vmul.f32 %v6543_v21, %v4270_v18  ;;  %v3967_v22 = vmul.f32 %v7472_v2, %v6523_v15  ;;  %v4217_v17 = vld [vmem:[#allocation3 + $0xbe] sm:$0xff] }
 0x2f1   : > { %4541 = vst.msk [vmem:[%s7505_s29] sm:$0xff] %vm4540_vm5, %v4524_v42  ;;  %v4359_v51 = vadd.f32 %v4343_v6, %v4305_v46  ;;  %v4036_v43 = vadd.f32 %v4020_v63, %v3982_v54  ;;  %v3715_v9 = vadd.f32 %v3699_v48, %v3661_v41  ;;  %v4344_v53 = vmul.f32 %v7732_v38, %v4324_v52  ;;  %v4432_v6 = vld [vmem:[#allocation3 + $0xba] sm:$0xff] }
 0x2f2   : > { %v4021_v61 = vmul.f32 %v7480_v20, %v6526_v57  ;;  %v4398_v59 = vmul.f32 %v6551_v0, %v4378_v37  ;;  %v4075_v3 = vmul.f32 %v7488_v23, %v7806_v4  ;;  %v4452_v2 = vmul.f32 %v7338_v49, %v4432_v6  ;;  %v4271_v46 = vld [vmem:[#allocation3 + $0xbf] sm:$0xff] }
 0x2f3   : > { %v4413_v12 = vadd.f32 %v4397_v47, %v4359_v51  ;;  %v4090_v34 = vadd.f32 %v4074_v24, %v4036_v43  ;;  %v3769_v11 = vadd.f32 %v3753_v33, %v3715_v9  ;;  %v4129_v55 = vmul.f32 %v4377_v25, %v7787_v7  ;;  %v4325_v23 = vld [vmem:[#allocation3 + $0xc0] sm:$0xff] }
 0x2f4   : > { %v4183_v57 = vmul.f32 %v4431_v60, %v7789_v36  ;;  %v4237_v54 = vmul.f32 %v6540_v29, %v4217_v17  ;;  %v4291_v25 = vmul.f32 %v6543_v21, %v4271_v46  ;;  %v4379_v48 = vld [vmem:[#allocation3 + $0xc1] sm:$0xff]  ;;  %v4345_v60 = vmul.f32 %v7732_v38, %v4325_v23 }
 0x2f5   : > { %v4467_v39 = vadd.f32 %v4451_v26, %v4413_v12  ;;  %v4144_v30 = vadd.f32 %v4128_v16, %v4090_v34  ;;  %v3821_v45 = vadd.f32 %v3805_v5, %v3769_v11  ;;  %v4433_v51 = vld [vmem:[#allocation3 + $0xc2] sm:$0xff]  ;;  %v4399_v26 = vmul.f32 %v6551_v0, %v4379_v48 }
 0x2f6   : > { %v4453_v50 = vmul.f32 %v7338_v49, %v4433_v51 }
 0x2f7   : > { %v4509_v19 = vsel %vm603_vm2, %v4467_v39, 0.0  ;;  %v4198_v58 = vadd.f32 %v4182_v13, %v4144_v30  ;;  %v4475_v40 = vpop.xlane.xlu1 %4474  ;;  %v3875_v1 = vadd.f32 %v3859_v62, %v3821_v45 }
 0x2f8   : > { %4510 = vadd.xlane.f32.xlu0 %v4509_v19  ;;  %v4525_v27 = vadd.f32 %v7494_v35, %v4475_v40 }
 0x2f9   : > { %v4252_v32 = vadd.f32 %v4236_v8, %v4198_v58  ;;  %v3929_v31 = vadd.f32 %v3913_v28, %v3875_v1 }
 0x2fa   : > { %4542 = vst.msk [vmem:[%s7505_s29 + $0x8] sm:$0xff] %vm4540_vm5, %v4525_v27 }
 0x2fb   : > { %v4306_v10 = vadd.f32 %v4290_v44, %v4252_v32  ;;  %v3983_v14 = vadd.f32 %v3967_v22, %v3929_v31 }
 0x2fd   : > { %v4360_v15 = vadd.f32 %v4344_v53, %v4306_v10  ;;  %v4037_v63 = vadd.f32 %v4021_v61, %v3983_v14 }
 0x2ff   : > { %v4414_v56 = vadd.f32 %v4398_v59, %v4360_v15  ;;  %v4091_v42 = vadd.f32 %v4075_v3, %v4037_v63 }
 0x301   : > { %v4468_v20 = vadd.f32 %v4452_v2, %v4414_v56  ;;  %v4145_v47 = vadd.f32 %v4129_v55, %v4091_v42 }
 0x302   : > { %v4478_v24 = vpop.xlane.xlu0 %4477 }
 0x303   : > { %v4512_v4 = vsel %vm603_vm2, %v4468_v20, 0.0  ;;  %v4526_v41 = vadd.f32 %v7494_v35, %v4478_v24  ;;  %v4199_v7 = vadd.f32 %v4183_v57, %v4145_v47 }
 0x304   : > { %4513 = vadd.xlane.f32.xlu1 %v4512_v4 }
 0x305   : > { %4543 = vst.msk [vmem:[%s7505_s29 + $0x10] sm:$0xff] %vm4540_vm5, %v4526_v41  ;;  %v4253_v36 = vadd.f32 %v4237_v54, %v4199_v7 }
 0x307   : > { %v4307_v29 = vadd.f32 %v4291_v25, %v4253_v36 }
 0x309   : > { %v4481_v43 = vpop.xlane.xlu0 %4480  ;;  %v4361_v16 = vadd.f32 %v4345_v60, %v4307_v29 }
 0x30a   : > { %v4527_v9 = vadd.f32 %v7494_v35, %v4481_v43 }
 0x30b   : > { %v4415_v21 = vadd.f32 %v4399_v26, %v4361_v16 }
 0x30c   : > { %4544 = vst.msk [vmem:[%s7505_s29 + $0x18] sm:$0xff] %vm4540_vm5, %v4527_v9 }
 0x30d   : > { %v4469_v33 = vadd.f32 %v4453_v50, %v4415_v21 }
 0x30f   : > { %v4515_v5 = vsel %vm603_vm2, %v4469_v33, 0.0 }
 0x310   : > { %4516 = vadd.xlane.f32.xlu0 %v4515_v5 }
 0x316   : > { %v4487_v38 = vpop.xlane.xlu0 %4486 }
 0x317   : > { %v4529_v12 = vadd.f32 %v7494_v35, %v4487_v38 }
 0x319   : > { %4546 = vst.msk [vmem:[%s7505_s29 + $0x28] sm:$0xff] %vm4540_vm5, %v4529_v12 }
 0x31d   : > { %v4484_v0 = vpop.xlane.xlu1 %4483 }
 0x31e   : > { %v4528_v49 = vadd.f32 %v7494_v35, %v4484_v0 }
 0x320   : > { %4545 = vst.msk [vmem:[%s7505_s29 + $0x20] sm:$0xff] %vm4540_vm5, %v4528_v49 }
 0x330   : > { %v4493_v34 = vpop.xlane.xlu0 %4492 }
 0x331   : > { %v4531_v13 = vadd.f32 %v7494_v35, %v4493_v34 }
 0x333   : > { %4548 = vst.msk [vmem:[%s7505_s29 + $0x38] sm:$0xff] %vm4540_vm5, %v4531_v13 }
 0x33b   : > { %v4490_v18 = vpop.xlane.xlu1 %4489 }
 0x33c   : > { %v4530_v11 = vadd.f32 %v7494_v35, %v4490_v18 }
 0x33e   : > { %4547 = vst.msk [vmem:[%s7505_s29 + $0x30] sm:$0xff] %vm4540_vm5, %v4530_v11 }
 0x348   : > { %v4496_v62 = vpop.xlane.xlu1 %4495 }
 0x349   : > { %v4532_v39 = vadd.f32 %v7494_v35, %v4496_v62 }
 0x34b   : > { %4549 = vst.msk [vmem:[%s7505_s29 + $0x40] sm:$0xff] %vm4540_vm5, %v4532_v39 }
 0x353   : > { %v4499_v30 = vpop.xlane.xlu0 %4498 }
 0x354   : > { %v4533_v8 = vadd.f32 %v7494_v35, %v4499_v30 }
 0x356   : > { %4550 = vst.msk [vmem:[%s7505_s29 + $0x48] sm:$0xff] %vm4540_vm5, %v4533_v8 }
 0x35e   : > { %v4502_v52 = vpop.xlane.xlu1 %4501 }
 0x35f   : > { %v4534_v45 = vadd.f32 %v7494_v35, %v4502_v52 }
 0x361   : > { %4551 = vst.msk [vmem:[%s7505_s29 + $0x50] sm:$0xff] %vm4540_vm5, %v4534_v45 }
 0x36b   : > { %v4505_v28 = vpop.xlane.xlu0 %4504 }
 0x36c   : > { %v4535_v19 = vadd.f32 %v7494_v35, %v4505_v28 }
 0x36e   : > { %4552 = vst.msk [vmem:[%s7505_s29 + $0x58] sm:$0xff] %vm4540_vm5, %v4535_v19 }
 0x378   : > { %v4508_v58 = vpop.xlane.xlu1 %4507 }
 0x379   : > { %v4536_v44 = vadd.f32 %v7494_v35, %v4508_v58 }
 0x37b   : > { %4553 = vst.msk [vmem:[%s7505_s29 + $0x60] sm:$0xff] %vm4540_vm5, %v4536_v44 }
 0x385   : > { %v4511_v40 = vpop.xlane.xlu0 %4510 }
 0x386   : > { %v4537_v37 = vadd.f32 %v7494_v35, %v4511_v40 }
 0x388   : > { %4554 = vst.msk [vmem:[%s7505_s29 + $0x68] sm:$0xff] %vm4540_vm5, %v4537_v37 }
 0x391   : > { %v4514_v1 = vpop.xlane.xlu1 %4513 }
 0x392   : > { %v4538_v22 = vadd.f32 %v7494_v35, %v4514_v1 }
 0x394   : > { %4555 = vst.msk [vmem:[%s7505_s29 + $0x70] sm:$0xff] %vm4540_vm5, %v4538_v22 }
 0x39d   : > { %v4517_v27 = vpop.xlane.xlu0 %4516 }
 0x39e   : > { %v4539_v32 = vadd.f32 %v7494_v35, %v4517_v27 }
 0x3a0   : > { %4556 = vst.msk [vmem:[%s7505_s29 + $0x78] sm:$0xff] %vm4540_vm5, %v4539_v32 }
 0x3a1 PF: > { %s17_s20 = sadd.s32 1, %s5459_s20  }
 0x3a2   : > { %p14_p4 = scmp.ge.s32.totalorder %s17_s20, 4  }
 0x3a4   :  { %16 = sbr.rel (!%p14_p4) target bundleno = 3 (0x3), region = 100 }

</bundles_post_ra>
